<compile_context>
chip_gen: v6e
topology: v6e:2x2x1
jax: 0.10.0
libtpu: 0.0.40
codegen_flags: <defaults>
</compile_context>

<pallas_src>
import functools

import jax
import jax.numpy as jnp
from jax.experimental import pallas as pl
from jax.experimental.pallas import tpu as pltpu

BN_EPS = 1e-5
_LANE = 128


def _round_up(x, m):
    return (x + m - 1) // m * m


def _cdiv(a, b):
    return -(-a // b)


def _vmem_capacity_bytes():
    """Physical VMEM of the local generation (v5e/v6e 128MiB, v7x 64MiB)."""
    try:
        cap = getattr(pltpu.get_tpu_info(), "vmem_capacity_bytes", None)
        if cap:
            return int(cap)
    except Exception:
        pass
    return 64 * 1024 * 1024  # conservative (v7x-sized) fallback


def _pick_tile_rows(batch, height, width, cin_p, cout_p, act_bytes, vmem_limit):
    """Largest row tile whose per-step VMEM footprint fits this generation."""
    wp2 = _round_up(width + 2, 8)          # sublane-padded stored width
    cin_l = _round_up(cin_p, _LANE)        # lane-padded VMEM footprint
    budget = max(vmem_limit // 2, 8 * 1024 * 1024)

    def step_bytes(th):
        in_tiles = 2 * (th + 2) * wp2 * cin_l * act_bytes   # body + halos, double-buffered
        out_tiles = 2 * th * wp2 * cout_p * 4               # z tile (upper bound), x2 buffers
        weights = 2 * 9 * cin_l * cout_p * act_bytes        # resident, double-buffered
        h_tmp = (th + 2) * wp2 * cin_l * 4                  # masked/affined input copy
        patch = th * width * 3 * cin_l * act_bytes          # per-dy K-packed patch
        acc = th * width * cout_p * 4                       # f32 accumulator
        return in_tiles + out_tiles + weights + h_tmp + patch + acc

    th = height
    while th > 1 and step_bytes(th) > budget:
        th = (th + 1) // 2
    n_blk = _cdiv(height, th)
    if batch * n_blk < 2 and height > 1:   # keep both v7x TensorCores busy
        n_blk = 2
    th = _cdiv(height, n_blk)              # re-balance (minimal row padding)
    return th, n_blk


# --------------------------------------------------------------------------
# Kernel: one (tile_h x W) tile of a 3x3 conv (+ optional fused input BN+ReLU)
#         + per-tile BatchNorm partial statistics.
# The halo rows arrive as separate clamped 1-row blocks (no host re-blocking);
# boundary / out-of-image rows and the stored padding columns are zeroed with
# a select mask, so clamped duplicates or garbage can never propagate.
# --------------------------------------------------------------------------
def _conv_bn_kernel(top_ref, body_ref, bot_ref, w_ref, scale_ref, shift_ref,
                    z_ref, stats_ref, *, tile_h, height, width,
                    dx_prepacked, fuse_input_bn_relu, compute_dtype):
    # top_ref/bot_ref: (1, 1, Wst, Cst)   clamped halo rows
    # body_ref:        (1, tile_h, Wst, Cst)
    # w_ref:           (3, K, Cout_p)     K = 3*Cin (dx-major, channel-minor)
    # scale/shift:     (1, Cst)           BN affine of the previous layer (fused)
    # z_ref:           (1, tile_h, W+2, Cout_p)  raw conv output tile (pre-BN)
    # stats_ref:       (1, 2, Cout_p)     rows = [sum, sum_of_squares]
    i = pl.program_id(1)
    cout_p = w_ref.shape[-1]
    k_per_dy = w_ref.shape[1]

    # Assemble the halo'd tile: (tile_h+2, Wst, Cst).  Concat is along the
    # outermost axis only (cheap tile stacking in VMEM).
    x3 = jnp.concatenate([top_ref[0], body_ref[0], bot_ref[0]], axis=0)

    # Validity of each input position: global row r = i*tile_h + l - 1 must be
    # inside the true image; for non-prepacked inputs the stored columns 0 and
    # W+1 are conv zero-padding positions.
    l = jax.lax.broadcasted_iota(jnp.int32, x3.shape, 0)
    r = i * tile_h + l - 1
    valid = (r >= 0) & (r < height)
    if not dx_prepacked:
        c = jax.lax.broadcasted_iota(jnp.int32, x3.shape, 1)
        valid = valid & (c >= 1) & (c <= width)

    if fuse_input_bn_relu:
        # h = relu(z_prev * scale + shift), with padding positions forced to 0
        # *after* the affine (select kills any garbage/NaN in unwritten borders).
        hf = jnp.maximum(
            x3.astype(jnp.float32) * scale_ref[...] + shift_ref[...], 0.0)
        h = jnp.where(valid, hf, 0.0).astype(compute_dtype)
    else:
        h = jnp.where(valid, x3, 0).astype(compute_dtype)

    # 3x3 conv as 3 K-packed MXU matmuls (K = 3*Cin per dy) into an f32 acc.
    m = tile_h * width
    acc = jnp.zeros((m, cout_p), jnp.float32)
    for dy in range(3):
        if dx_prepacked:
            patch = h[dy:dy + tile_h]                      # (tile_h, W, 3*cin)
        else:
            patch = jnp.concatenate(                       # lane-aligned pieces
                [h[dy:dy + tile_h, dx:dx + width, :] for dx in range(3)],
                axis=-1)
        acc = acc + jnp.dot(patch.reshape(m, k_per_dy), w_ref[dy],
                            preferred_element_type=jnp.float32)

    # Per-tile BN partial statistics in f32 (var = E[x^2] - mean^2 outside).
    acc_s = acc
    if height % tile_h != 0:
        # Rows beyond the true image height (row-padding of H) must not count.
        orow = jax.lax.broadcasted_iota(jnp.int32, (tile_h, width, cout_p), 0)
        orow = orow.reshape(m, cout_p) + i * tile_h
        acc_s = jnp.where(orow < height, acc, 0.0)
    stats_ref[0] = jnp.concatenate(
        [jnp.sum(acc_s, axis=0, keepdims=True),
         jnp.sum(acc_s * acc_s, axis=0, keepdims=True)], axis=0)

    # Store the tile in the column-padded layout the next layer reads.
    zt = acc.reshape(tile_h, width, cout_p).astype(z_ref.dtype)
    zc = jnp.zeros((tile_h, 1, cout_p), z_ref.dtype)
    z_ref[0, :, 1:width + 1, :] = zt
    z_ref[0, :, 0:1, :] = zc
    z_ref[0, :, width + 1:width + 2, :] = zc


def _conv_bn_stats(x, w_packed, in_scale, in_shift, *, height, width, tile_h,
                   dx_prepacked, fuse_input_bn_relu, compute_dtype, z_dtype,
                   vmem_limit):
    batch, h_pad, w_stored, c_stored = x.shape
    n_blk = h_pad // tile_h
    _, k_per_dy, cout_p = w_packed.shape
    cin_eff = k_per_dy // 3

    kernel = functools.partial(
        _conv_bn_kernel, tile_h=tile_h, height=height, width=width,
        dx_prepacked=dx_prepacked, fuse_input_bn_relu=fuse_input_bn_relu,
        compute_dtype=compute_dtype)

    # Overlapping windows without re-blocking: body tile + clamped 1-row halos
    # read from the same HBM array.  Clamped duplicates are masked in-kernel.
    top_spec = pl.BlockSpec(
        (1, 1, w_stored, c_stored),
        lambda n, i: (n, jnp.maximum(i * tile_h - 1, 0), 0, 0))
    body_spec = pl.BlockSpec(
        (1, tile_h, w_stored, c_stored), lambda n, i: (n, i, 0, 0))
    bot_spec = pl.BlockSpec(
        (1, 1, w_stored, c_stored),
        lambda n, i: (n, jnp.minimum((i + 1) * tile_h, h_pad - 1), 0, 0))

    flops = 2 * batch * height * width * 9 * cin_eff * cout_p
    bytes_accessed = int(
        x.size * x.dtype.itemsize
        + w_packed.size * w_packed.dtype.itemsize
        + batch * h_pad * (width + 2) * cout_p * jnp.dtype(z_dtype).itemsize
        + batch * n_blk * 2 * cout_p * 4)

    z, stats = pl.pallas_call(
        kernel,
        out_shape=(
            jax.ShapeDtypeStruct((batch, h_pad, width + 2, cout_p), z_dtype),
            jax.ShapeDtypeStruct((batch * n_blk, 2, cout_p), jnp.float32),
        ),
        grid=(batch, n_blk),
        in_specs=[
            top_spec, body_spec, bot_spec,
            # conv weights: constant index -> resident in VMEM across the grid
            pl.BlockSpec((3, k_per_dy, cout_p), lambda n, i: (0, 0, 0)),
            pl.BlockSpec((1, c_stored), lambda n, i: (0, 0)),
            pl.BlockSpec((1, c_stored), lambda n, i: (0, 0)),
        ],
        out_specs=(
            pl.BlockSpec((1, tile_h, width + 2, cout_p),
                         lambda n, i: (n, i, 0, 0)),
            pl.BlockSpec((1, 2, cout_p), lambda n, i: (n * n_blk + i, 0, 0)),
        ),
        compiler_params=pltpu.CompilerParams(
            dimension_semantics=("parallel", "parallel"),
            vmem_limit_bytes=vmem_limit),
        cost_estimate=pl.CostEstimate(
            flops=flops, transcendentals=0, bytes_accessed=bytes_accessed),
    )(x, x, x, w_packed, in_scale, in_shift)
    return z, stats


# --------------------------------------------------------------------------
# Host-side helpers (layout plumbing only; all heavy math is in the kernel).
# --------------------------------------------------------------------------
def _pack_weight(w_oihw, cin_eff, cout_p):
    # torch Conv2d weight (Cout, Cin, 3, 3) -> (3[dy], 3*Cin_eff, Cout_p),
    # K index = kx*Cin_eff + c (matches both the dx-prepacked input layout and
    # the in-kernel dx concatenation order).
    cout, cin = w_oihw.shape[0], w_oihw.shape[1]
    w = jnp.transpose(w_oihw, (2, 3, 1, 0))                     # (3,3,Cin,Cout)
    w = jnp.pad(w, ((0, 0), (0, 0), (0, cin_eff - cin), (0, cout_p - cout)))
    return w.reshape(3, 3 * cin_eff, cout_p)


def _pad_channels(v, cp):
    return jnp.pad(v.astype(jnp.float32), (0, cp - v.shape[0]))


def _bn_scale_shift(stats, gamma_p, beta_p, n_pixels):
    total = jnp.sum(stats[:, 0, :], axis=0)
    total_sq = jnp.sum(stats[:, 1, :], axis=0)
    mean = total / n_pixels
    var = jnp.maximum(total_sq / n_pixels - mean * mean, 0.0)    # biased var
    scale = gamma_p * jax.lax.rsqrt(var + BN_EPS)
    shift = beta_p - mean * scale
    return scale.reshape(1, -1), shift.reshape(1, -1)


def init_double_conv_params(key, in_channels, out_channels):
    k1, k2 = jax.random.split(key)

    def kaiming_uniform(k, cout, cin):
        fan_in = cin * 9
        bound = (1.0 / fan_in) ** 0.5
        return jax.random.uniform(k, (cout, cin, 3, 3), jnp.float32, -bound, bound)

    return dict(
        w1=kaiming_uniform(k1, out_channels, in_channels),
        g1=jnp.ones((out_channels,), jnp.float32),
        b1=jnp.zeros((out_channels,), jnp.float32),
        w2=kaiming_uniform(k2, out_channels, out_channels),
        g2=jnp.ones((out_channels,), jnp.float32),
        b2=jnp.zeros((out_channels,), jnp.float32),
    )


def double_conv(x_nchw, params, *, compute_dtype=jnp.bfloat16):
    """Forward pass of DoubleConv.  Input/output: NCHW float32 (PyTorch layout)."""
    batch, cin, height, width = x_nchw.shape
    cout = params["w1"].shape[0]
    cout_p = _round_up(cout, _LANE)
    act_bytes = jnp.dtype(compute_dtype).itemsize

    cap = _vmem_capacity_bytes()
    vmem_limit = max(min(int(cap * 0.9), 112 * 1024 * 1024), 32 * 1024 * 1024)
    # Size the shared row tile on the heavier layer (layer 2: cin = cout_p).
    tile_h, n_blk = _pick_tile_rows(batch, height, width, cout_p, cout_p,
                                    act_bytes, vmem_limit)
    h_pad = tile_h * n_blk

    # Stem: for small cin, pre-pack the 3 horizontal taps into channels on the
    # host (x is the tiny module input) -> layer 1 does K=3*cin matmuls with no
    # 128-lane padding and no in-kernel channel concat.
    prepack_stem = cin <= 32
    cin1 = cin if prepack_stem else _round_up(cin, _LANE)

    w1p = _pack_weight(params["w1"], cin1, cout_p).astype(compute_dtype)
    w2p = _pack_weight(params["w2"], cout_p, cout_p).astype(compute_dtype)
    g1 = _pad_channels(params["g1"], cout_p)
    b1 = _pad_channels(params["b1"], cout_p)
    g2 = _pad_channels(params["g2"], cout_p)
    b2 = _pad_channels(params["b2"], cout_p)

    # Single host layout pass over x only: NCHW -> NHWC, zero-pad W by 1 each
    # side, zero-pad rows up to h_pad.
    x = jnp.transpose(x_nchw, (0, 2, 3, 1)).astype(compute_dtype)
    x = jnp.pad(x, ((0, 0), (0, h_pad - height), (1, 1), (0, 0)))
    if prepack_stem:
        x1 = jnp.concatenate([x[:, :, d:d + width, :] for d in range(3)], axis=-1)
    else:
        x1 = jnp.pad(x, ((0, 0), (0, 0), (0, 0), (0, cin1 - cin)))

    c1 = x1.shape[-1]
    one = jnp.ones((1, c1), jnp.float32)
    zero = jnp.zeros((1, c1), jnp.float32)

    # Layer 1: conv1 + per-tile BN statistics (z1 stays in compute dtype).
    z1, st1 = _conv_bn_stats(
        x1, w1p, one, zero, height=height, width=width, tile_h=tile_h,
        dx_prepacked=prepack_stem, fuse_input_bn_relu=False,
        compute_dtype=compute_dtype, z_dtype=compute_dtype,
        vmem_limit=vmem_limit)
    scale1, shift1 = _bn_scale_shift(st1, g1, b1, batch * height * width)

    # Layer 2: BN1 + ReLU fused into conv2's input side, + BN2 statistics.
    z2, st2 = _conv_bn_stats(
        z1, w2p, scale1, shift1, height=height, width=width, tile_h=tile_h,
        dx_prepacked=False, fuse_input_bn_relu=True,
        compute_dtype=compute_dtype, z_dtype=compute_dtype,
        vmem_limit=vmem_limit)
    scale2, shift2 = _bn_scale_shift(st2, g2, b2, batch * height * width)

    # Fused epilogue (one XLA pass): BN2 affine + ReLU + interior slice +
    # channel un-pad + NHWC -> NCHW.  No extra Pallas round-trip over z2.
    y = jnp.maximum(
        z2.astype(jnp.float32) * scale2.reshape(1, 1, 1, -1)
        + shift2.reshape(1, 1, 1, -1), 0.0)
    y = y[:, :height, 1:width + 1, :cout]
    return jnp.transpose(y, (0, 3, 1, 2))


def _reference(x_nchw, params):
    # Pure-JAX reference (f32 conv, training-mode BatchNorm) for validation.
    def conv(x, w):
        return jax.lax.conv_general_dilated(
            x, w, window_strides=(1, 1), padding=((1, 1), (1, 1)),
            dimension_numbers=("NCHW", "OIHW", "NCHW"))

    def bn_relu(x, g, b):
        mean = jnp.mean(x, axis=(0, 2, 3), keepdims=True)
        var = jnp.mean((x - mean) ** 2, axis=(0, 2, 3), keepdims=True)
        y = (x - mean) * jax.lax.rsqrt(var + BN_EPS)
        y = y * g.reshape(1, -1, 1, 1) + b.reshape(1, -1, 1, 1)
        return jnp.maximum(y, 0.0)

    h = bn_relu(conv(x_nchw, params["w1"]), params["g1"], params["b1"])
    return bn_relu(conv(h, params["w2"]), params["g2"], params["b2"])


if __name__ == "__main__":
    key = jax.random.PRNGKey(0)
    kx, kp = jax.random.split(key)
    n, cin, h, w, cout = 2, 4, 16, 16, 8
    x = jax.random.normal(kx, (n, cin, h, w), jnp.float32)
    params = init_double_conv_params(kp, cin, cout)

    ref = _reference(x, params)
    run = jax.jit(double_conv, static_argnames=("compute_dtype",))

    # Default path: bf16 MXU operands / bf16 intermediates, f32 accumulate+stats.
    out = jax.block_until_ready(run(x, params))
    assert out.shape == (n, cout, h, w)
    err = float(jnp.max(jnp.abs(out - ref)))
    assert jnp.allclose(out, ref, atol=5e-2, rtol=5e-2), err

    # Full-f32 path (same kernels, tight tolerance).
    out_f32 = jax.block_until_ready(run(x, params, compute_dtype=jnp.float32))
    err_f32 = float(jnp.max(jnp.abs(out_f32 - ref)))
    assert jnp.allclose(out_f32, ref, atol=2e-3, rtol=2e-3), err_f32

    print("KERNEL_OK")
</pallas_src>

<mosaic_0001>
module attributes {stable_mosaic.version = 11 : i64} {
  func.func @_conv_bn_kernel(%arg0: i32, %arg1: i32, %arg2: memref<1x1x16x12xbf16, #tpu.memory_space<vmem>>, %arg3: memref<1x16x16x12xbf16, #tpu.memory_space<vmem>>, %arg4: memref<1x1x16x12xbf16, #tpu.memory_space<vmem>>, %arg5: memref<3x12x128xbf16, #tpu.memory_space<vmem>>, %arg6: memref<1x12xf32, #tpu.memory_space<vmem>>, %arg7: memref<1x12xf32, #tpu.memory_space<vmem>>, %arg8: memref<1x16x18x128xbf16, #tpu.memory_space<vmem>>, %arg9: memref<1x2x128xf32, #tpu.memory_space<vmem>>) attributes {dimension_semantics = [#tpu.dimension_semantics<parallel>, #tpu.dimension_semantics<parallel>], iteration_bounds = array<i64: 2, 1>, scalar_prefetch = 0 : i64, scratch_operands = 0 : i64, tpu.core_type = #tpu.core_type<tc>, window_params = [{transform_indices = @transform_0, window_bounds = array<i64: 1, 1, 16, 12>}, {transform_indices = @transform_1, window_bounds = array<i64: 1, 16, 16, 12>}, {transform_indices = @transform_2, window_bounds = array<i64: 1, 1, 16, 12>}, {pipeline_mode = #tpu.pipeline_mode<synchronous>, transform_indices = @transform_3, window_bounds = array<i64: 3, 12, 128>}, {pipeline_mode = #tpu.pipeline_mode<synchronous>, transform_indices = @transform_4, window_bounds = array<i64: 1, 12>}, {pipeline_mode = #tpu.pipeline_mode<synchronous>, transform_indices = @transform_5, window_bounds = array<i64: 1, 12>}, {transform_indices = @transform_6, window_bounds = array<i64: 1, 16, 18, 128>}, {transform_indices = @transform_7, window_bounds = array<i64: 1, 2, 128>}]} {
    %c0 = arith.constant 0 : index
    %c0_0 = arith.constant 0 : index
    %c0_1 = arith.constant 0 : index
    %c0_2 = arith.constant 0 : index
    %0 = vector.load %arg2[%c0, %c0_0, %c0_1, %c0_2] : memref<1x1x16x12xbf16, #tpu.memory_space<vmem>>, vector<1x1x16x12xbf16>
    %1 = vector.shape_cast %0 : vector<1x1x16x12xbf16> to vector<1x16x12xbf16>
    %c0_3 = arith.constant 0 : index
    %c0_4 = arith.constant 0 : index
    %c0_5 = arith.constant 0 : index
    %c0_6 = arith.constant 0 : index
    %2 = vector.load %arg3[%c0_3, %c0_4, %c0_5, %c0_6] : memref<1x16x16x12xbf16, #tpu.memory_space<vmem>>, vector<1x16x16x12xbf16>
    %3 = vector.shape_cast %2 : vector<1x16x16x12xbf16> to vector<16x16x12xbf16>
    %c0_7 = arith.constant 0 : index
    %c0_8 = arith.constant 0 : index
    %c0_9 = arith.constant 0 : index
    %c0_10 = arith.constant 0 : index
    %4 = vector.load %arg4[%c0_7, %c0_8, %c0_9, %c0_10] : memref<1x1x16x12xbf16, #tpu.memory_space<vmem>>, vector<1x1x16x12xbf16>
    %5 = vector.shape_cast %4 : vector<1x1x16x12xbf16> to vector<1x16x12xbf16>
    %6 = tpu.concatenate %1, %3, %5 in 0 : vector<1x16x12xbf16>, vector<16x16x12xbf16>, vector<1x16x12xbf16> -> vector<18x16x12xbf16>
    %7 = tpu.iota {dimensions = array<i32: 0>} : vector<18x16x12xi32>
    %c16_i32 = arith.constant 16 : i32
    %8 = arith.muli %arg1, %c16_i32 : i32
    %9 = vector.broadcast %8 : i32 to vector<18x16x12xi32>
    %10 = arith.addi %9, %7 : vector<18x16x12xi32>
    %c1_i32 = arith.constant 1 : i32
    %11 = vector.broadcast %c1_i32 : i32 to vector<18x16x12xi32>
    %12 = arith.subi %10, %11 : vector<18x16x12xi32>
    %c0_i32 = arith.constant 0 : i32
    %13 = vector.broadcast %c0_i32 : i32 to vector<18x16x12xi32>
    %14 = arith.cmpi sge, %12, %13 : vector<18x16x12xi32>
    %c16_i32_11 = arith.constant 16 : i32
    %15 = vector.broadcast %c16_i32_11 : i32 to vector<18x16x12xi32>
    %16 = arith.cmpi slt, %12, %15 : vector<18x16x12xi32>
    %17 = arith.andi %14, %16 : vector<18x16x12xi1>
    %c0_i32_12 = arith.constant 0 : i32
    %18 = arith.sitofp %c0_i32_12 : i32 to bf16
    %19 = vector.broadcast %18 : bf16 to vector<18x16x12xbf16>
    %20 = arith.select %17, %6, %19 : vector<18x16x12xi1>, vector<18x16x12xbf16>
    %cst = arith.constant 0.000000e+00 : f32
    %21 = vector.broadcast %cst : f32 to vector<256x128xf32>
    %22 = vector.extract_strided_slice %20 {offsets = [0, 0, 0], sizes = [16, 16, 12], strides = [1, 1, 1]} : vector<18x16x12xbf16> to vector<16x16x12xbf16>
    %23 = vector.shape_cast %22 : vector<16x16x12xbf16> to vector<256x12xbf16>
    %c0_13 = arith.constant 0 : index
    %c0_14 = arith.constant 0 : index
    %c0_15 = arith.constant 0 : index
    %24 = vector.load %arg5[%c0_13, %c0_14, %c0_15] : memref<3x12x128xbf16, #tpu.memory_space<vmem>>, vector<1x12x128xbf16>
    %25 = vector.shape_cast %24 : vector<1x12x128xbf16> to vector<12x128xbf16>
    %cst_16 = arith.constant dense<0.000000e+00> : vector<256x128xf32>
    %26 = tpu.matmul %23, %25, %cst_16 {dimension_numbers = #tpu.dot_dimension_numbers<[1], [0], [0], [1], [0, 0, 1, 1], [], []>} : vector<256x12xbf16>, vector<12x128xbf16>, vector<256x128xf32> -> vector<256x128xf32>
    %27 = arith.addf %21, %26 : vector<256x128xf32>
    %28 = vector.extract_strided_slice %20 {offsets = [1, 0, 0], sizes = [16, 16, 12], strides = [1, 1, 1]} : vector<18x16x12xbf16> to vector<16x16x12xbf16>
    %29 = vector.shape_cast %28 : vector<16x16x12xbf16> to vector<256x12xbf16>
    %c1 = arith.constant 1 : index
    %c0_17 = arith.constant 0 : index
    %c0_18 = arith.constant 0 : index
    %30 = vector.load %arg5[%c1, %c0_17, %c0_18] : memref<3x12x128xbf16, #tpu.memory_space<vmem>>, vector<1x12x128xbf16>
    %31 = vector.shape_cast %30 : vector<1x12x128xbf16> to vector<12x128xbf16>
    %cst_19 = arith.constant dense<0.000000e+00> : vector<256x128xf32>
    %32 = tpu.matmul %29, %31, %cst_19 {dimension_numbers = #tpu.dot_dimension_numbers<[1], [0], [0], [1], [0, 0, 1, 1], [], []>} : vector<256x12xbf16>, vector<12x128xbf16>, vector<256x128xf32> -> vector<256x128xf32>
    %33 = arith.addf %27, %32 : vector<256x128xf32>
    %34 = vector.extract_strided_slice %20 {offsets = [2, 0, 0], sizes = [16, 16, 12], strides = [1, 1, 1]} : vector<18x16x12xbf16> to vector<16x16x12xbf16>
    %35 = vector.shape_cast %34 : vector<16x16x12xbf16> to vector<256x12xbf16>
    %c2 = arith.constant 2 : index
    %c0_20 = arith.constant 0 : index
    %c0_21 = arith.constant 0 : index
    %36 = vector.load %arg5[%c2, %c0_20, %c0_21] : memref<3x12x128xbf16, #tpu.memory_space<vmem>>, vector<1x12x128xbf16>
    %37 = vector.shape_cast %36 : vector<1x12x128xbf16> to vector<12x128xbf16>
    %cst_22 = arith.constant dense<0.000000e+00> : vector<256x128xf32>
    %38 = tpu.matmul %35, %37, %cst_22 {dimension_numbers = #tpu.dot_dimension_numbers<[1], [0], [0], [1], [0, 0, 1, 1], [], []>} : vector<256x12xbf16>, vector<12x128xbf16>, vector<256x128xf32> -> vector<256x128xf32>
    %39 = arith.addf %33, %38 : vector<256x128xf32>
    %cst_23 = arith.constant dense<0.000000e+00> : vector<128xf32>
    %40 = vector.multi_reduction <add>, %39, %cst_23 [0] : vector<256x128xf32> to vector<128xf32>
    %41 = vector.shape_cast %40 : vector<128xf32> to vector<1x128xf32>
    %42 = arith.mulf %39, %39 : vector<256x128xf32>
    %cst_24 = arith.constant dense<0.000000e+00> : vector<128xf32>
    %43 = vector.multi_reduction <add>, %42, %cst_24 [0] : vector<256x128xf32> to vector<128xf32>
    %44 = vector.shape_cast %43 : vector<128xf32> to vector<1x128xf32>
    %45 = tpu.concatenate %41, %44 in 0 : vector<1x128xf32>, vector<1x128xf32> -> vector<2x128xf32>
    %c0_25 = arith.constant 0 : index
    %c0_26 = arith.constant 0 : index
    %c0_27 = arith.constant 0 : index
    %46 = vector.load %arg9[%c0_25, %c0_26, %c0_27] : memref<1x2x128xf32, #tpu.memory_space<vmem>>, vector<1x2x128xf32>
    %47 = vector.shape_cast %46 : vector<1x2x128xf32> to vector<2x128xf32>
    %48 = vector.shape_cast %45 : vector<2x128xf32> to vector<1x2x128xf32>
    tpu.vector_store %arg9[%c0_25, %c0_26, %c0_27], %48 {strides = array<i32>} : memref<1x2x128xf32, #tpu.memory_space<vmem>>, vector<1x2x128xf32>,
    %49 = vector.shape_cast %39 : vector<256x128xf32> to vector<16x16x128xf32>
    %50 = arith.truncf %49 : vector<16x16x128xf32> to vector<16x16x128xbf16>
    %cst_28 = arith.constant 0.000000e+00 : bf16
    %51 = vector.broadcast %cst_28 : bf16 to vector<16x1x128xbf16>
    %c0_29 = arith.constant 0 : index
    %c0_30 = arith.constant 0 : index
    %c1_31 = arith.constant 1 : index
    %c0_32 = arith.constant 0 : index
    %52 = vector.load %arg8[%c0_29, %c0_30, %c1_31, %c0_32] : memref<1x16x18x128xbf16, #tpu.memory_space<vmem>>, vector<1x16x16x128xbf16>
    %53 = vector.shape_cast %52 : vector<1x16x16x128xbf16> to vector<16x16x128xbf16>
    %54 = vector.shape_cast %50 : vector<16x16x128xbf16> to vector<1x16x16x128xbf16>
    tpu.vector_store %arg8[%c0_29, %c0_30, %c1_31, %c0_32], %54 {strides = array<i32>} : memref<1x16x18x128xbf16, #tpu.memory_space<vmem>>, vector<1x16x16x128xbf16>,
    %c0_33 = arith.constant 0 : index
    %c0_34 = arith.constant 0 : index
    %c0_35 = arith.constant 0 : index
    %c0_36 = arith.constant 0 : index
    %55 = vector.load %arg8[%c0_33, %c0_34, %c0_35, %c0_36] : memref<1x16x18x128xbf16, #tpu.memory_space<vmem>>, vector<1x16x1x128xbf16>
    %56 = vector.shape_cast %55 : vector<1x16x1x128xbf16> to vector<16x1x128xbf16>
    %57 = vector.shape_cast %51 : vector<16x1x128xbf16> to vector<1x16x1x128xbf16>
    tpu.vector_store %arg8[%c0_33, %c0_34, %c0_35, %c0_36], %57 {strides = array<i32>} : memref<1x16x18x128xbf16, #tpu.memory_space<vmem>>, vector<1x16x1x128xbf16>,
    %c0_37 = arith.constant 0 : index
    %c0_38 = arith.constant 0 : index
    %c17 = arith.constant 17 : index
    %c0_39 = arith.constant 0 : index
    %58 = vector.load %arg8[%c0_37, %c0_38, %c17, %c0_39] : memref<1x16x18x128xbf16, #tpu.memory_space<vmem>>, vector<1x16x1x128xbf16>
    %59 = vector.shape_cast %58 : vector<1x16x1x128xbf16> to vector<16x1x128xbf16>
    %60 = vector.shape_cast %51 : vector<16x1x128xbf16> to vector<1x16x1x128xbf16>
    tpu.vector_store %arg8[%c0_37, %c0_38, %c17, %c0_39], %60 {strides = array<i32>} : memref<1x16x18x128xbf16, #tpu.memory_space<vmem>>, vector<1x16x1x128xbf16>,
    return
  }
  func.func @transform_0(%arg0: i32, %arg1: i32) -> (i32, i32, i32, i32) {
    %c16_i32 = arith.constant 16 : i32
    %0 = arith.muli %arg1, %c16_i32 : i32
    %c1_i32 = arith.constant 1 : i32
    %1 = arith.subi %0, %c1_i32 : i32
    %c0_i32 = arith.constant 0 : i32
    %2 = arith.maxsi %1, %c0_i32 : i32
    %c0_i32_0 = arith.constant 0 : i32
    %c0_i32_1 = arith.constant 0 : i32
    %c0_i32_2 = arith.constant 0 : i32
    return %arg0, %2, %c0_i32_0, %c0_i32_1 : i32, i32, i32, i32
  }
  func.func @transform_1(%arg0: i32, %arg1: i32) -> (i32, i32, i32, i32) {
    %c0_i32 = arith.constant 0 : i32
    %c0_i32_0 = arith.constant 0 : i32
    %c0_i32_1 = arith.constant 0 : i32
    return %arg0, %arg1, %c0_i32, %c0_i32_0 : i32, i32, i32, i32
  }
  func.func @transform_2(%arg0: i32, %arg1: i32) -> (i32, i32, i32, i32) {
    %c1_i32 = arith.constant 1 : i32
    %0 = arith.addi %arg1, %c1_i32 : i32
    %c16_i32 = arith.constant 16 : i32
    %1 = arith.muli %0, %c16_i32 : i32
    %c15_i32 = arith.constant 15 : i32
    %2 = arith.minsi %1, %c15_i32 : i32
    %c0_i32 = arith.constant 0 : i32
    %c0_i32_0 = arith.constant 0 : i32
    %c0_i32_1 = arith.constant 0 : i32
    return %arg0, %2, %c0_i32, %c0_i32_0 : i32, i32, i32, i32
  }
  func.func @transform_3(%arg0: i32, %arg1: i32) -> (i32, i32, i32) {
    %c0_i32 = arith.constant 0 : i32
    %c0_i32_0 = arith.constant 0 : i32
    %c0_i32_1 = arith.constant 0 : i32
    %c0_i32_2 = arith.constant 0 : i32
    return %c0_i32, %c0_i32_0, %c0_i32_1 : i32, i32, i32
  }
  func.func @transform_4(%arg0: i32, %arg1: i32) -> (i32, i32) {
    %c0_i32 = arith.constant 0 : i32
    %c0_i32_0 = arith.constant 0 : i32
    %c0_i32_1 = arith.constant 0 : i32
    return %c0_i32, %c0_i32_0 : i32, i32
  }
  func.func @transform_5(%arg0: i32, %arg1: i32) -> (i32, i32) {
    %c0_i32 = arith.constant 0 : i32
    %c0_i32_0 = arith.constant 0 : i32
    %c0_i32_1 = arith.constant 0 : i32
    return %c0_i32, %c0_i32_0 : i32, i32
  }
  func.func @transform_6(%arg0: i32, %arg1: i32) -> (i32, i32, i32, i32) {
    %c0_i32 = arith.constant 0 : i32
    %c0_i32_0 = arith.constant 0 : i32
    %c0_i32_1 = arith.constant 0 : i32
    return %arg0, %arg1, %c0_i32, %c0_i32_0 : i32, i32, i32, i32
  }
  func.func @transform_7(%arg0: i32, %arg1: i32) -> (i32, i32, i32) {
    %c1_i32 = arith.constant 1 : i32
    %0 = arith.muli %arg0, %c1_i32 : i32
    %1 = arith.addi %0, %arg1 : i32
    %c0_i32 = arith.constant 0 : i32
    %c0_i32_0 = arith.constant 0 : i32
    %c0_i32_1 = arith.constant 0 : i32
    return %1, %c0_i32, %c0_i32_0 : i32, i32, i32
  }
}

module attributes {stable_mosaic.version = 11 : i64} {
  func.func @_conv_bn_kernel(%arg0: i32, %arg1: i32, %arg2: memref<1x1x18x128xbf16, #tpu.memory_space<vmem>>, %arg3: memref<1x16x18x128xbf16, #tpu.memory_space<vmem>>, %arg4: memref<1x1x18x128xbf16, #tpu.memory_space<vmem>>, %arg5: memref<3x384x128xbf16, #tpu.memory_space<vmem>>, %arg6: memref<1x128xf32, #tpu.memory_space<vmem>>, %arg7: memref<1x128xf32, #tpu.memory_space<vmem>>, %arg8: memref<1x16x18x128xbf16, #tpu.memory_space<vmem>>, %arg9: memref<1x2x128xf32, #tpu.memory_space<vmem>>) attributes {dimension_semantics = [#tpu.dimension_semantics<parallel>, #tpu.dimension_semantics<parallel>], iteration_bounds = array<i64: 2, 1>, scalar_prefetch = 0 : i64, scratch_operands = 0 : i64, tpu.core_type = #tpu.core_type<tc>, window_params = [{transform_indices = @transform_0, window_bounds = array<i64: 1, 1, 18, 128>}, {transform_indices = @transform_1, window_bounds = array<i64: 1, 16, 18, 128>}, {transform_indices = @transform_2, window_bounds = array<i64: 1, 1, 18, 128>}, {pipeline_mode = #tpu.pipeline_mode<synchronous>, transform_indices = @transform_3, window_bounds = array<i64: 3, 384, 128>}, {pipeline_mode = #tpu.pipeline_mode<synchronous>, transform_indices = @transform_4, window_bounds = array<i64: 1, 128>}, {pipeline_mode = #tpu.pipeline_mode<synchronous>, transform_indices = @transform_5, window_bounds = array<i64: 1, 128>}, {transform_indices = @transform_6, window_bounds = array<i64: 1, 16, 18, 128>}, {transform_indices = @transform_7, window_bounds = array<i64: 1, 2, 128>}]} {
    %c0 = arith.constant 0 : index
    %c0_0 = arith.constant 0 : index
    %c0_1 = arith.constant 0 : index
    %c0_2 = arith.constant 0 : index
    %0 = vector.load %arg2[%c0, %c0_0, %c0_1, %c0_2] : memref<1x1x18x128xbf16, #tpu.memory_space<vmem>>, vector<1x1x18x128xbf16>
    %1 = vector.shape_cast %0 : vector<1x1x18x128xbf16> to vector<1x18x128xbf16>
    %c0_3 = arith.constant 0 : index
    %c0_4 = arith.constant 0 : index
    %c0_5 = arith.constant 0 : index
    %c0_6 = arith.constant 0 : index
    %2 = vector.load %arg3[%c0_3, %c0_4, %c0_5, %c0_6] : memref<1x16x18x128xbf16, #tpu.memory_space<vmem>>, vector<1x16x18x128xbf16>
    %3 = vector.shape_cast %2 : vector<1x16x18x128xbf16> to vector<16x18x128xbf16>
    %c0_7 = arith.constant 0 : index
    %c0_8 = arith.constant 0 : index
    %c0_9 = arith.constant 0 : index
    %c0_10 = arith.constant 0 : index
    %4 = vector.load %arg4[%c0_7, %c0_8, %c0_9, %c0_10] : memref<1x1x18x128xbf16, #tpu.memory_space<vmem>>, vector<1x1x18x128xbf16>
    %5 = vector.shape_cast %4 : vector<1x1x18x128xbf16> to vector<1x18x128xbf16>
    %6 = tpu.concatenate %1, %3, %5 in 0 : vector<1x18x128xbf16>, vector<16x18x128xbf16>, vector<1x18x128xbf16> -> vector<18x18x128xbf16>
    %7 = tpu.iota {dimensions = array<i32: 0>} : vector<18x18x128xi32>
    %c16_i32 = arith.constant 16 : i32
    %8 = arith.muli %arg1, %c16_i32 : i32
    %9 = vector.broadcast %8 : i32 to vector<18x18x128xi32>
    %10 = arith.addi %9, %7 : vector<18x18x128xi32>
    %c1_i32 = arith.constant 1 : i32
    %11 = vector.broadcast %c1_i32 : i32 to vector<18x18x128xi32>
    %12 = arith.subi %10, %11 : vector<18x18x128xi32>
    %c0_i32 = arith.constant 0 : i32
    %13 = vector.broadcast %c0_i32 : i32 to vector<18x18x128xi32>
    %14 = arith.cmpi sge, %12, %13 : vector<18x18x128xi32>
    %c16_i32_11 = arith.constant 16 : i32
    %15 = vector.broadcast %c16_i32_11 : i32 to vector<18x18x128xi32>
    %16 = arith.cmpi slt, %12, %15 : vector<18x18x128xi32>
    %17 = arith.andi %14, %16 : vector<18x18x128xi1>
    %18 = tpu.iota {dimensions = array<i32: 1>} : vector<18x18x128xi32>
    %c1_i32_12 = arith.constant 1 : i32
    %19 = vector.broadcast %c1_i32_12 : i32 to vector<18x18x128xi32>
    %20 = arith.cmpi sge, %18, %19 : vector<18x18x128xi32>
    %21 = arith.andi %17, %20 : vector<18x18x128xi1>
    %c16_i32_13 = arith.constant 16 : i32
    %22 = vector.broadcast %c16_i32_13 : i32 to vector<18x18x128xi32>
    %23 = arith.cmpi sle, %18, %22 : vector<18x18x128xi32>
    %24 = arith.andi %21, %23 : vector<18x18x128xi1>
    %25 = arith.extf %6 : vector<18x18x128xbf16> to vector<18x18x128xf32>
    %c0_14 = arith.constant 0 : index
    %c0_15 = arith.constant 0 : index
    %26 = vector.load %arg6[%c0_14, %c0_15] : memref<1x128xf32, #tpu.memory_space<vmem>>, vector<1x128xf32>
    %27 = vector.shape_cast %26 : vector<1x128xf32> to vector<1x1x128xf32>
    %28 = vector.broadcast %27 : vector<1x1x128xf32> to vector<18x18x128xf32>
    %29 = arith.mulf %25, %28 : vector<18x18x128xf32>
    %c0_16 = arith.constant 0 : index
    %c0_17 = arith.constant 0 : index
    %30 = vector.load %arg7[%c0_16, %c0_17] : memref<1x128xf32, #tpu.memory_space<vmem>>, vector<1x128xf32>
    %31 = vector.shape_cast %30 : vector<1x128xf32> to vector<1x1x128xf32>
    %32 = vector.broadcast %31 : vector<1x1x128xf32> to vector<18x18x128xf32>
    %33 = arith.addf %29, %32 : vector<18x18x128xf32>
    %cst = arith.constant 0.000000e+00 : f32
    %34 = vector.broadcast %cst : f32 to vector<18x18x128xf32>
    %35 = arith.maximumf %33, %34 : vector<18x18x128xf32>
    %cst_18 = arith.constant 0.000000e+00 : f32
    %36 = vector.broadcast %cst_18 : f32 to vector<18x18x128xf32>
    %37 = arith.select %24, %35, %36 : vector<18x18x128xi1>, vector<18x18x128xf32>
    %38 = arith.truncf %37 : vector<18x18x128xf32> to vector<18x18x128xbf16>
    %cst_19 = arith.constant 0.000000e+00 : f32
    %39 = vector.broadcast %cst_19 : f32 to vector<256x128xf32>
    %40 = vector.extract_strided_slice %38 {offsets = [0, 0, 0], sizes = [16, 16, 128], strides = [1, 1, 1]} : vector<18x18x128xbf16> to vector<16x16x128xbf16>
    %41 = vector.extract_strided_slice %38 {offsets = [0, 1, 0], sizes = [16, 16, 128], strides = [1, 1, 1]} : vector<18x18x128xbf16> to vector<16x16x128xbf16>
    %42 = vector.extract_strided_slice %38 {offsets = [0, 2, 0], sizes = [16, 16, 128], strides = [1, 1, 1]} : vector<18x18x128xbf16> to vector<16x16x128xbf16>
    %43 = tpu.concatenate %40, %41, %42 in 2 : vector<16x16x128xbf16>, vector<16x16x128xbf16>, vector<16x16x128xbf16> -> vector<16x16x384xbf16>
    %44 = vector.shape_cast %43 : vector<16x16x384xbf16> to vector<256x384xbf16>
    %c0_20 = arith.constant 0 : index
    %c0_21 = arith.constant 0 : index
    %c0_22 = arith.constant 0 : index
    %45 = vector.load %arg5[%c0_20, %c0_21, %c0_22] : memref<3x384x128xbf16, #tpu.memory_space<vmem>>, vector<1x384x128xbf16>
    %46 = vector.shape_cast %45 : vector<1x384x128xbf16> to vector<384x128xbf16>
    %cst_23 = arith.constant dense<0.000000e+00> : vector<256x128xf32>
    %47 = tpu.matmul %44, %46, %cst_23 {dimension_numbers = #tpu.dot_dimension_numbers<[1], [0], [0], [1], [0, 0, 1, 1], [], []>} : vector<256x384xbf16>, vector<384x128xbf16>, vector<256x128xf32> -> vector<256x128xf32>
    %48 = arith.addf %39, %47 : vector<256x128xf32>
    %49 = vector.extract_strided_slice %38 {offsets = [1, 0, 0], sizes = [16, 16, 128], strides = [1, 1, 1]} : vector<18x18x128xbf16> to vector<16x16x128xbf16>
    %50 = vector.extract_strided_slice %38 {offsets = [1, 1, 0], sizes = [16, 16, 128], strides = [1, 1, 1]} : vector<18x18x128xbf16> to vector<16x16x128xbf16>
    %51 = vector.extract_strided_slice %38 {offsets = [1, 2, 0], sizes = [16, 16, 128], strides = [1, 1, 1]} : vector<18x18x128xbf16> to vector<16x16x128xbf16>
    %52 = tpu.concatenate %49, %50, %51 in 2 : vector<16x16x128xbf16>, vector<16x16x128xbf16>, vector<16x16x128xbf16> -> vector<16x16x384xbf16>
    %53 = vector.shape_cast %52 : vector<16x16x384xbf16> to vector<256x384xbf16>
    %c1 = arith.constant 1 : index
    %c0_24 = arith.constant 0 : index
    %c0_25 = arith.constant 0 : index
    %54 = vector.load %arg5[%c1, %c0_24, %c0_25] : memref<3x384x128xbf16, #tpu.memory_space<vmem>>, vector<1x384x128xbf16>
    %55 = vector.shape_cast %54 : vector<1x384x128xbf16> to vector<384x128xbf16>
    %cst_26 = arith.constant dense<0.000000e+00> : vector<256x128xf32>
    %56 = tpu.matmul %53, %55, %cst_26 {dimension_numbers = #tpu.dot_dimension_numbers<[1], [0], [0], [1], [0, 0, 1, 1], [], []>} : vector<256x384xbf16>, vector<384x128xbf16>, vector<256x128xf32> -> vector<256x128xf32>
    %57 = arith.addf %48, %56 : vector<256x128xf32>
    %58 = vector.extract_strided_slice %38 {offsets = [2, 0, 0], sizes = [16, 16, 128], strides = [1, 1, 1]} : vector<18x18x128xbf16> to vector<16x16x128xbf16>
    %59 = vector.extract_strided_slice %38 {offsets = [2, 1, 0], sizes = [16, 16, 128], strides = [1, 1, 1]} : vector<18x18x128xbf16> to vector<16x16x128xbf16>
    %60 = vector.extract_strided_slice %38 {offsets = [2, 2, 0], sizes = [16, 16, 128], strides = [1, 1, 1]} : vector<18x18x128xbf16> to vector<16x16x128xbf16>
    %61 = tpu.concatenate %58, %59, %60 in 2 : vector<16x16x128xbf16>, vector<16x16x128xbf16>, vector<16x16x128xbf16> -> vector<16x16x384xbf16>
    %62 = vector.shape_cast %61 : vector<16x16x384xbf16> to vector<256x384xbf16>
    %c2 = arith.constant 2 : index
    %c0_27 = arith.constant 0 : index
    %c0_28 = arith.constant 0 : index
    %63 = vector.load %arg5[%c2, %c0_27, %c0_28] : memref<3x384x128xbf16, #tpu.memory_space<vmem>>, vector<1x384x128xbf16>
    %64 = vector.shape_cast %63 : vector<1x384x128xbf16> to vector<384x128xbf16>
    %cst_29 = arith.constant dense<0.000000e+00> : vector<256x128xf32>
    %65 = tpu.matmul %62, %64, %cst_29 {dimension_numbers = #tpu.dot_dimension_numbers<[1], [0], [0], [1], [0, 0, 1, 1], [], []>} : vector<256x384xbf16>, vector<384x128xbf16>, vector<256x128xf32> -> vector<256x128xf32>
    %66 = arith.addf %57, %65 : vector<256x128xf32>
    %cst_30 = arith.constant dense<0.000000e+00> : vector<128xf32>
    %67 = vector.multi_reduction <add>, %66, %cst_30 [0] : vector<256x128xf32> to vector<128xf32>
    %68 = vector.shape_cast %67 : vector<128xf32> to vector<1x128xf32>
    %69 = arith.mulf %66, %66 : vector<256x128xf32>
    %cst_31 = arith.constant dense<0.000000e+00> : vector<128xf32>
    %70 = vector.multi_reduction <add>, %69, %cst_31 [0] : vector<256x128xf32> to vector<128xf32>
    %71 = vector.shape_cast %70 : vector<128xf32> to vector<1x128xf32>
    %72 = tpu.concatenate %68, %71 in 0 : vector<1x128xf32>, vector<1x128xf32> -> vector<2x128xf32>
    %c0_32 = arith.constant 0 : index
    %c0_33 = arith.constant 0 : index
    %c0_34 = arith.constant 0 : index
    %73 = vector.load %arg9[%c0_32, %c0_33, %c0_34] : memref<1x2x128xf32, #tpu.memory_space<vmem>>, vector<1x2x128xf32>
    %74 = vector.shape_cast %73 : vector<1x2x128xf32> to vector<2x128xf32>
    %75 = vector.shape_cast %72 : vector<2x128xf32> to vector<1x2x128xf32>
    tpu.vector_store %arg9[%c0_32, %c0_33, %c0_34], %75 {strides = array<i32>} : memref<1x2x128xf32, #tpu.memory_space<vmem>>, vector<1x2x128xf32>,
    %76 = vector.shape_cast %66 : vector<256x128xf32> to vector<16x16x128xf32>
    %77 = arith.truncf %76 : vector<16x16x128xf32> to vector<16x16x128xbf16>
    %cst_35 = arith.constant 0.000000e+00 : bf16
    %78 = vector.broadcast %cst_35 : bf16 to vector<16x1x128xbf16>
    %c0_36 = arith.constant 0 : index
    %c0_37 = arith.constant 0 : index
    %c1_38 = arith.constant 1 : index
    %c0_39 = arith.constant 0 : index
    %79 = vector.load %arg8[%c0_36, %c0_37, %c1_38, %c0_39] : memref<1x16x18x128xbf16, #tpu.memory_space<vmem>>, vector<1x16x16x128xbf16>
    %80 = vector.shape_cast %79 : vector<1x16x16x128xbf16> to vector<16x16x128xbf16>
    %81 = vector.shape_cast %77 : vector<16x16x128xbf16> to vector<1x16x16x128xbf16>
    tpu.vector_store %arg8[%c0_36, %c0_37, %c1_38, %c0_39], %81 {strides = array<i32>} : memref<1x16x18x128xbf16, #tpu.memory_space<vmem>>, vector<1x16x16x128xbf16>,
    %c0_40 = arith.constant 0 : index
    %c0_41 = arith.constant 0 : index
    %c0_42 = arith.constant 0 : index
    %c0_43 = arith.constant 0 : index
    %82 = vector.load %arg8[%c0_40, %c0_41, %c0_42, %c0_43] : memref<1x16x18x128xbf16, #tpu.memory_space<vmem>>, vector<1x16x1x128xbf16>
    %83 = vector.shape_cast %82 : vector<1x16x1x128xbf16> to vector<16x1x128xbf16>
    %84 = vector.shape_cast %78 : vector<16x1x128xbf16> to vector<1x16x1x128xbf16>
    tpu.vector_store %arg8[%c0_40, %c0_41, %c0_42, %c0_43], %84 {strides = array<i32>} : memref<1x16x18x128xbf16, #tpu.memory_space<vmem>>, vector<1x16x1x128xbf16>,
    %c0_44 = arith.constant 0 : index
    %c0_45 = arith.constant 0 : index
    %c17 = arith.constant 17 : index
    %c0_46 = arith.constant 0 : index
    %85 = vector.load %arg8[%c0_44, %c0_45, %c17, %c0_46] : memref<1x16x18x128xbf16, #tpu.memory_space<vmem>>, vector<1x16x1x128xbf16>
    %86 = vector.shape_cast %85 : vector<1x16x1x128xbf16> to vector<16x1x128xbf16>
    %87 = vector.shape_cast %78 : vector<16x1x128xbf16> to vector<1x16x1x128xbf16>
    tpu.vector_store %arg8[%c0_44, %c0_45, %c17, %c0_46], %87 {strides = array<i32>} : memref<1x16x18x128xbf16, #tpu.memory_space<vmem>>, vector<1x16x1x128xbf16>,
    return
  }
  func.func @transform_0(%arg0: i32, %arg1: i32) -> (i32, i32, i32, i32) {
    %c16_i32 = arith.constant 16 : i32
    %0 = arith.muli %arg1, %c16_i32 : i32
    %c1_i32 = arith.constant 1 : i32
    %1 = arith.subi %0, %c1_i32 : i32
    %c0_i32 = arith.constant 0 : i32
    %2 = arith.maxsi %1, %c0_i32 : i32
    %c0_i32_0 = arith.constant 0 : i32
    %c0_i32_1 = arith.constant 0 : i32
    %c0_i32_2 = arith.constant 0 : i32
    return %arg0, %2, %c0_i32_0, %c0_i32_1 : i32, i32, i32, i32
  }
  func.func @transform_1(%arg0: i32, %arg1: i32) -> (i32, i32, i32, i32) {
    %c0_i32 = arith.constant 0 : i32
    %c0_i32_0 = arith.constant 0 : i32
    %c0_i32_1 = arith.constant 0 : i32
    return %arg0, %arg1, %c0_i32, %c0_i32_0 : i32, i32, i32, i32
  }
  func.func @transform_2(%arg0: i32, %arg1: i32) -> (i32, i32, i32, i32) {
    %c1_i32 = arith.constant 1 : i32
    %0 = arith.addi %arg1, %c1_i32 : i32
    %c16_i32 = arith.constant 16 : i32
    %1 = arith.muli %0, %c16_i32 : i32
    %c15_i32 = arith.constant 15 : i32
    %2 = arith.minsi %1, %c15_i32 : i32
    %c0_i32 = arith.constant 0 : i32
    %c0_i32_0 = arith.constant 0 : i32
    %c0_i32_1 = arith.constant 0 : i32
    return %arg0, %2, %c0_i32, %c0_i32_0 : i32, i32, i32, i32
  }
  func.func @transform_3(%arg0: i32, %arg1: i32) -> (i32, i32, i32) {
    %c0_i32 = arith.constant 0 : i32
    %c0_i32_0 = arith.constant 0 : i32
    %c0_i32_1 = arith.constant 0 : i32
    %c0_i32_2 = arith.constant 0 : i32
    return %c0_i32, %c0_i32_0, %c0_i32_1 : i32, i32, i32
  }
  func.func @transform_4(%arg0: i32, %arg1: i32) -> (i32, i32) {
    %c0_i32 = arith.constant 0 : i32
    %c0_i32_0 = arith.constant 0 : i32
    %c0_i32_1 = arith.constant 0 : i32
    return %c0_i32, %c0_i32_0 : i32, i32
  }
  func.func @transform_5(%arg0: i32, %arg1: i32) -> (i32, i32) {
    %c0_i32 = arith.constant 0 : i32
    %c0_i32_0 = arith.constant 0 : i32
    %c0_i32_1 = arith.constant 0 : i32
    return %c0_i32, %c0_i32_0 : i32, i32
  }
  func.func @transform_6(%arg0: i32, %arg1: i32) -> (i32, i32, i32, i32) {
    %c0_i32 = arith.constant 0 : i32
    %c0_i32_0 = arith.constant 0 : i32
    %c0_i32_1 = arith.constant 0 : i32
    return %arg0, %arg1, %c0_i32, %c0_i32_0 : i32, i32, i32, i32
  }
  func.func @transform_7(%arg0: i32, %arg1: i32) -> (i32, i32, i32) {
    %c1_i32 = arith.constant 1 : i32
    %0 = arith.muli %arg0, %c1_i32 : i32
    %1 = arith.addi %0, %arg1 : i32
    %c0_i32 = arith.constant 0 : i32
    %c0_i32_0 = arith.constant 0 : i32
    %c0_i32_1 = arith.constant 0 : i32
    return %1, %c0_i32, %c0_i32_0 : i32, i32, i32
  }
}

</mosaic_0001>

<bundles_post_ra>
// kernel: double_conv.2
= control target key start
LH: loop header
LB: loop body
LE: loop exit
PB: predicated region body
PF: predicated region fallthrough
CT: control target
= control target key end

     0   :  { %s2657_s23 = smov 0   ;;  %s2659_s24 = smov 0   ;;  %s3359_s0 = inlined_call_operand.vmem [shape: bf16[2,16,16,12], index: 0, kind: input, shape index: {}, may-alias: {0,1,2}]   ;;  %s3360_s1 = inlined_call_operand.vmem [shape: bf16[2,16,16,12], index: 1, kind: input, shape index: {}, may-alias: {0,1,2}]   ;;  %s3361_s2 = inlined_call_operand.vmem [shape: bf16[2,16,16,12], index: 2, kind: input, shape index: {}, may-alias: {0,1,2}]   ;;  %s3362_s3 = inlined_call_operand.vmem [shape: bf16[3,12,128], index: 3, kind: input, shape index: {}]   ;;  %s3363_s4 = inlined_call_operand.vmem [shape: f32[1,12], index: 4, kind: input, shape index: {}]   ;;  %s3364_s5 = inlined_call_operand.vmem [shape: f32[1,12], index: 5, kind: input, shape index: {}]   ;;  %s3365_s6 = inlined_call_operand.vmem [shape: bf16[2,16,18,128], index: 6, kind: output, shape index: {0}]   ;;  %s3366_s7 = inlined_call_operand.vmem [shape: f32[2,2,128], index: 7, kind: output, shape index: {1}]  }
   0x1   :  { %s2661_s2 = smov 0  }
   0x2 LB: > { %s30_s4 = sadd.s32 1, %s2610_s24  ;;  %p2236_p0 = scmp.ge.s32.totalorder %s2614_s2, 1  ;;  %s2614_s2 = sphi %s2661_s2, %s18_s2   ;;  %s2610_s24 = sphi %s2659_s24, %s3376_s24   ;;  %s2606_s23 = sphi %s2657_s23, %s3375_s23  }
   0x3   : > { %p32_p1 = scmp.ge.s32.totalorder %s30_s4, 2  ;;  %p328_p2 = scmp.lt.s32.totalorder %s2614_s2, 3 }
   0x5   : > { %s3378_s4 = smov (%p32_p1, %s30_s4), 0  ;;  %p329_p3 = pnand %p2236_p0, %p328_p2 }
   0x6   : > { %p419_p4 = scmp.lt.s32.totalorder (!%p329_p3), %s2606_s23, 1 }
   0x7   : > { %332 = sbr.rel (%p329_p3) target bundleno = 371 (0x173), region = 44 }
   0xc   : > { %v2573_v0 = vld [vmem:[%s3362_s3 + $0x8] sm:$0x3f]   ;;  %vm764_vm0 = vcmask 1045504   ;;  %v2576_v2 = vld [vmem:[%s3362_s3] sm:$0x3f]   ;;  %s3380_s23 = smov (!%p419_p4, %s2606_s23), 1 }
   0xd   : > { %2544 = vmatprep.subr.msk.bf16.mxu1 %vm764_vm0, %v2573_v0  ;;  %2543 = vmatprep.subr.msk.bf16.mxu0 %vm764_vm0, %v2573_v0  ;;  %v766_v1 = vsel %vm764_vm0, %v2573_v0, 0  ;;  %v2579_v3 = vld [vmem:[%s3362_s3 + $0x10] sm:$0x3f]   ;;  %s2353_s30 = sshll.u32 %s3380_s23, 7  ;;  %vm715_vm1 = vcmask 97280   ;;  %v943_v9 = vsel %vm764_vm0, %v2576_v2, 0 }
   0xe   : > { %2542 = vmatpush3.bf16.msra.mxu1 %v766_v1  ;;  %2440 = vmatpush3.bf16.msra.mxu0 %v766_v1  ;;  %s2694_s10 = scalar_lea.vmem %s3360_s1, %s2353_s30  ;;  %v1123_v7 = vsel %vm764_vm0, %v2579_v3, 0  ;;  %v2616_v22 = vmov 0   ;;  %s2547_s11 = smul.u32 192, %s3380_s23  ;;  %vm1424_vm2 = vcmask 1040384   ;;  %vm1523_vm3 = vsmask.f32 256 }
   0xf   : > { %2545 = vmatprep.subr.msk.bf16.mxu1 %vm764_vm0, %v2576_v2  ;;  %2546 = vmatprep.subr.msk.bf16.mxu0 %vm764_vm0, %v2579_v3  ;;  %v2574_v4 = vld [vmem:[%s2694_s10] sm:$0xff]   ;;  %v2577_v6 = vld [vmem:[%s2694_s10 + $0x8] sm:$0xff]   ;;  %v2580_v10 = vld [vmem:[%s2694_s10 + $0x10] sm:$0xff]   ;;  %v2280_v23 = vcombine.low %v2616_v22, %v2616_v22  ;;  %vm1846_vm4 = vcmask 1043456   ;;  %vm1847_vm5 = vsmask.f32 7938 }
  0x10   : > { %v2575_v5 = vld [vmem:[%s2694_s10 + $0x40] sm:$0xff]   ;;  %2441 = vmatprep.mubr.msk.bf16.mxu0 %vm715_vm1, %v2574_v4  ;;  %v2578_v8 = vld [vmem:[%s2694_s10 + $0x48] sm:$0xff]   ;;  %v2581_v11 = vld [vmem:[%s2694_s10 + $0x50] sm:$0xff]   ;;  %s2821_s14 = scalar_lea.vmem %s3365_s6, %s2547_s11  ;;  %vm1524_vm6 = vsmask.f32 4368  ;;  %s2244_s15 = sshll.u32 %s3380_s23, 1 }
  0x11   : > { %2457 = vmatprep.mubr.msk.bf16.mxu1 %vm715_vm1, %v2575_v5  ;;  %2442 = vmatmul.mubr.msk.bf16.vlgmr.msra.gmra.mxu0 %vm715_vm1, %v2577_v6  ;;  %v2582_v12 = vld [vmem:[%s2694_s10 + $0x18] sm:$0xff]   ;;  %v2584_v14 = vld [vmem:[%s2694_s10 + $0x20] sm:$0xff]   ;;  %v2586_v16 = vld [vmem:[%s2694_s10 + $0x28] sm:$0xff]   ;;  %s461_s18 = scalar_lea.vmem %s3366_s7, %s2244_s15 }
  0x12   : > { %2458 = vmatmul.mubr.msk.bf16.vlgmr.msra.gmra.mxu1 %vm715_vm1, %v2578_v8  ;;  %2508 = vmatpush3.bf16.msra.mxu0 %v1123_v7  ;;  %v2583_v13 = vld [vmem:[%s2694_s10 + $0x58] sm:$0xff]   ;;  %v2585_v15 = vld [vmem:[%s2694_s10 + $0x60] sm:$0xff]   ;;  %v2587_v17 = vld [vmem:[%s2694_s10 + $0x68] sm:$0xff]  }
  0x13   : > { %2474 = vmatpush3.bf16.msra.mxu1 %v943_v9  ;;  %2445 = vmatprep.mubr.msk.bf16.mxu0 %vm715_vm1, %v2580_v10  ;;  %v2588_v18 = vld [vmem:[%s2694_s10 + $0x30] sm:$0xff]   ;;  %v2590_v20 = vld [vmem:[%s2694_s10 + $0x38] sm:$0xff]   ;;  %vm2824_vm7 = vmand %vm1846_vm4, %vm1847_vm5 }
  0x14   : > { %2461 = vmatprep.mubr.msk.bf16.mxu1 %vm715_vm1, %v2581_v11  ;;  %v2589_v19 = vld [vmem:[%s2694_s10 + $0x70] sm:$0xff]   ;;  %v2591_v21 = vld [vmem:[%s2694_s10 + $0x78] sm:$0xff]   ;;  %vm2838_vm8 = vmand %vm1424_vm2, %vm1523_vm3 }
  0x15   : > { %vm2847_vm9 = vmor %vm1523_vm3, %vm1524_vm6 }
  0x16   : > { %vm2901_vm10 = vmand %vm1424_vm2, %vm1847_vm5 }
  0x19   : > { %2446 = vmatmul.mubr.msk.bf16.gmra.mxu0 %vm715_vm1, %v2582_v12 }
  0x1a   : > { %2462 = vmatmul.mubr.msk.bf16.gmra.mxu1 %vm715_vm1, %v2583_v13  ;;  %2449 = vmatprep.mubr.msk.bf16.mxu0 %vm715_vm1, %v2584_v14 }
  0x1b   : > { %2465 = vmatprep.mubr.msk.bf16.mxu1 %vm715_vm1, %v2585_v15 }
  0x21   : > { %2450 = vmatmul.mubr.msk.bf16.gmra.mxu0 %vm715_vm1, %v2586_v16 }
  0x22   : > { %2466 = vmatmul.mubr.msk.bf16.gmra.mxu1 %vm715_vm1, %v2587_v17  ;;  %2453 = vmatprep.mubr.msk.bf16.mxu0 %vm715_vm1, %v2588_v18 }
  0x23   : > { %2469 = vmatprep.mubr.msk.bf16.mxu1 %vm715_vm1, %v2589_v19 }
  0x29   : > { %2454 = vmatmul.mubr.msk.bf16.gmra.mxu0 %vm715_vm1, %v2590_v20 }
  0x2a   : > { %2470 = vmatmul.mubr.msk.bf16.gmra.mxu1 %vm715_vm1, %v2591_v21  ;;  %2509 = vmatprep.mubr.msk.bf16.mxu0 %vm715_vm1, %v2577_v6 }
  0x2b   : > { %2475 = vmatprep.mubr.msk.bf16.mxu1 %vm715_vm1, %v2280_v23 }
  0x31   : > { %2510 = vmatmul.mubr.msk.bf16.vlgmr.msra.gmra.mxu0 %vm715_vm1, %v2580_v10 }
  0x32   : > { %2476 = vmatmul.mubr.msk.bf16.vlgmr.msra.gmra.mxu1 %vm715_vm1, %v2574_v4  ;;  %2513 = vmatprep.mubr.msk.bf16.mxu0 %vm715_vm1, %v2582_v12 }
  0x33   : > { %2479 = vmatprep.mubr.msk.bf16.mxu1 %vm715_vm1, %v2577_v6 }
  0x39   : > { %2514 = vmatmul.mubr.msk.bf16.gmra.mxu0 %vm715_vm1, %v2584_v14 }
  0x3a   : > { %2480 = vmatmul.mubr.msk.bf16.gmra.mxu1 %vm715_vm1, %v2580_v10  ;;  %2517 = vmatprep.mubr.msk.bf16.mxu0 %vm715_vm1, %v2586_v16 }
  0x3b   : > { %2483 = vmatprep.mubr.msk.bf16.mxu1 %vm715_vm1, %v2582_v12 }
  0x41   : > { %2518 = vmatmul.mubr.msk.bf16.gmra.mxu0 %vm715_vm1, %v2588_v18 }
  0x42   : > { %2484 = vmatmul.mubr.msk.bf16.gmra.mxu1 %vm715_vm1, %v2584_v14  ;;  %2521 = vmatprep.mubr.msk.bf16.mxu0 %vm715_vm1, %v2590_v20 }
  0x43   : > { %2487 = vmatprep.mubr.msk.bf16.mxu1 %vm715_vm1, %v2586_v16 }
  0x49   : > { %2522 = vmatmul.mubr.msk.bf16.gmra.mxu0 %vm715_vm1, %v2575_v5 }
  0x4a   : > { %2488 = vmatmul.mubr.msk.bf16.gmra.mxu1 %vm715_vm1, %v2588_v18  ;;  %2525 = vmatprep.mubr.msk.bf16.mxu0 %vm715_vm1, %v2578_v8 }
  0x4b   : > { %2491 = vmatprep.mubr.msk.bf16.mxu1 %vm715_vm1, %v2590_v20 }
  0x51   : > { %2526 = vmatmul.mubr.msk.bf16.gmra.mxu0 %vm715_vm1, %v2581_v11 }
  0x52   : > { %2492 = vmatmul.mubr.msk.bf16.gmra.mxu1 %vm715_vm1, %v2575_v5  ;;  %2529 = vmatprep.mubr.msk.bf16.mxu0 %vm715_vm1, %v2583_v13 }
  0x53   : > { %2495 = vmatprep.mubr.msk.bf16.mxu1 %vm715_vm1, %v2578_v8 }
  0x59   : > { %2530 = vmatmul.mubr.msk.bf16.gmra.mxu0 %vm715_vm1, %v2585_v15 }
  0x5a   : > { %2496 = vmatmul.mubr.msk.bf16.gmra.mxu1 %vm715_vm1, %v2581_v11  ;;  %2533 = vmatprep.mubr.msk.bf16.mxu0 %vm715_vm1, %v2587_v17 }
  0x5b   : > { %2499 = vmatprep.mubr.msk.bf16.mxu1 %vm715_vm1, %v2583_v13 }
  0x61   : > { %2534 = vmatmul.mubr.msk.bf16.gmra.mxu0 %vm715_vm1, %v2589_v19 }
  0x62   : > { %2500 = vmatmul.mubr.msk.bf16.gmra.mxu1 %vm715_vm1, %v2585_v15  ;;  %2537 = vmatprep.mubr.msk.bf16.mxu0 %vm715_vm1, %v2591_v21 }
  0x63   : > { %2503 = vmatprep.mubr.msk.bf16.mxu1 %vm715_vm1, %v2587_v17 }
  0x69   : > { %2538 = vmatmul.mubr.msk.bf16.gmra.mxu0 %vm715_vm1, %v2280_v23 }
  0x6a   : > { %2504 = vmatmul.mubr.msk.bf16.gmra.mxu1 %vm715_vm1, %v2589_v19  ;;  %v1858_v19 = vld [vmem:[%s2821_s14 + $0xc] sm:$0xf] }
  0xd1   : > { %v2443_v24 = vpop.f32.mrf.mxu0 }
  0xd2   : > { %v2763_v25 = vpop.f32.mrf.mxu1 }
  0xd3   : > { %v802_v26 = vpop.f32.mrf.mxu0 }
  0xd4   : > { %v2765_v27 = vpop.f32.mrf.mxu1 }
  0xd5   : > { %v2444_v28 = vpop.f32.mrf.mxu0 }
  0xd6   : > { %v2767_v29 = vpop.f32.mrf.mxu1 }
  0xd7   : > { %v805_v30 = vpop.f32.mrf.mxu0 }
  0xd8   : > { %v2769_v31 = vpop.f32.mrf.mxu1 }
  0xd9   : > { %v2447_v32 = vpop.f32.mrf.mxu0 }
  0xda   : > { %v2771_v33 = vpop.f32.mrf.mxu1 }
  0xdb   : > { %v2773_v34 = vpop.f32.mrf.mxu0 }
  0xdc   : > { %v2775_v35 = vpop.f32.mrf.mxu1 }
  0xdd   : > { %v2777_v36 = vpop.f32.mrf.mxu0 }
  0xde   : > { %v2779_v37 = vpop.f32.mrf.mxu1 }
  0xdf   : > { %v2781_v38 = vpop.f32.mrf.mxu0 }
  0xe0   : > { %v2783_v39 = vpop.f32.mrf.mxu1 }
  0xe1   : > { %v2785_v40 = vpop.f32.mrf.mxu0 }
  0xe2   : > { %v2787_v41 = vpop.f32.mrf.mxu1 }
  0xe3   : > { %v2789_v42 = vpop.f32.mrf.mxu0 }
  0xe4   : > { %v2791_v43 = vpop.f32.mrf.mxu1 }
  0xe5   : > { %v2793_v44 = vpop.f32.mrf.mxu0 }
  0xe6   : > { %v2795_v45 = vpop.f32.mrf.mxu1 }
  0xe7   : > { %v2797_v46 = vpop.f32.mrf.mxu0 }
  0xe8   : > { %v2799_v47 = vpop.f32.mrf.mxu1 }
  0xe9   : > { %v2801_v48 = vpop.f32.mrf.mxu0 }
  0xea   : > { %v2803_v49 = vpop.f32.mrf.mxu1 }
  0xeb   : > { %v2805_v50 = vpop.f32.mrf.mxu0 }
  0xec   : > { %v2807_v51 = vpop.f32.mrf.mxu1 }
  0xed   : > { %v2809_v52 = vpop.f32.mrf.mxu0 }
  0xee   : > { %v2811_v53 = vpop.f32.mrf.mxu1 }
  0xef   : > { %v2813_v54 = vpop.f32.mrf.mxu0 }
  0xf0   : > { %v2815_v55 = vpop.f32.mrf.mxu1 }
  0xf1   : > { %v2511_v56 = vpop.f32.mrf.mxu0 }
  0xf2   : > { %v2477_v57 = vpop.f32.mrf.mxu1 }
  0xf3   : > { %v988_v58 = vadd.f32 %v2477_v57, %v2443_v24  ;;  %v1159_v59 = vpop.f32.mrf.mxu0 }
  0xf4   : > { %v979_v60 = vpop.f32.mrf.mxu1 }
  0xf5   : > { %v1288_v61 = vadd.f32 %v2511_v56, %v988_v58  ;;  %v980_v62 = vadd.f32 %v979_v60, %v802_v26  ;;  %v2512_v63 = vpop.f32.mrf.mxu0  ;;  %v1849_v58 = vld [vmem:[%s2821_s14] sm:$0xf] }
  0xf6   : > { %v2478_v0 = vpop.f32.mrf.mxu1 }
  0xf7   : > { %v2358_v1 = vpack.c.bf16 %v1288_v61, %v1288_v61  ;;  %v1286_v2 = vadd.f32 %v1159_v59, %v980_v62  ;;  %v991_v3 = vadd.f32 %v2478_v0, %v2444_v28  ;;  %v1162_v4 = vpop.f32.mrf.mxu0  ;;  %v1357_v9 = vmul.f32 %v1288_v61, %v1288_v61 }
  0xf8   : > { %v982_v5 = vpop.f32.mrf.mxu1 }
  0xf9   : > { %v1544_v6 = vshrl.u32 %v2358_v1, 16  ;;  %v2356_v7 = vpack.c.bf16 %v1286_v2, %v1286_v2  ;;  %v2515_v8 = vpop.f32.mrf.mxu0  ;;  %v1289_v10 = vadd.f32 %v2512_v63, %v991_v3  ;;  %v983_v11 = vadd.f32 %v982_v5, %v805_v30 }
  0xfa   : > { %v2481_v12 = vpop.f32.mrf.mxu1  ;;  %v1547_v14 = vshll.u32 %v2358_v1, 16  ;;  %v1355_v20 = vmul.f32 %v1286_v2, %v1286_v2 }
  0xfb   : > { %v1546_v13 = vrot.slane %v1544_v6, 7  ;;  %v1527_v15 = vshrl.u32 %v2356_v7, 16  ;;  %v1004_v16 = vadd.f32 %v2481_v12, %v2447_v32  ;;  %v1175_v17 = vpop.f32.mrf.mxu0  ;;  %v1530_v21 = vshll.u32 %v2356_v7, 16 }
  0xfc   : > { %v2359_v22 = vpack.c.bf16 %v1289_v10, %v1289_v10  ;;  %v1287_v23 = vadd.f32 %v1162_v4, %v983_v11  ;;  %v995_v24 = vpop.f32.mrf.mxu1  ;;  %v1358_v30 = vmul.f32 %v1289_v10, %v1289_v10 }
  0xfd   : > { %v1549_v26 = vor.u32 %v1547_v14, %v1546_v13  ;;  %v1529_v28 = vrot.slane %v1527_v15, 7  ;;  %v2829_v56 = vadd.f32 %v2515_v8, %v1004_v16  ;;  %v2831_v57 = vpop.f32.mrf.mxu0  ;;  %v1550_v32 = vrot.slane %v1546_v13, 4  ;;  %v1862_v15 = vld [vmem:[%s2821_s14 + $0x14] sm:$0x1] }
  0xfe   : > { %v1552_v59 = vshrl.u32 %v2359_v22, 16  ;;  %v1318_v60 = vadd.f32 %v1287_v23, %v1286_v2  ;;  %v1356_v62 = vmul.f32 %v1287_v23, %v1287_v23  ;;  %v2482_v63 = vpop.f32.mrf.mxu1  ;;  %v1555_v3 = vshll.u32 %v2359_v22, 16 }
  0xff   : > { %v1859_v0 = vsel %vm2824_vm7, %v1549_v26, %v1858_v19  ;;  %v1532_v1 = vor.u32 %v1530_v21, %v1529_v28  ;;  %v2357_v4 = vpack.c.bf16 %v1287_v23, %v1287_v23  ;;  %v1178_v5 = vpop.f32.mrf.mxu0  ;;  %v1533_v7 = vrot.slane %v1529_v28, 4 }
 0x100   : > { %1860 = vst [vmem:[%s2821_s14 + $0xc] sm:$0xf] %v1859_v0  ;;  %v1554_v2 = vrot.slane %v1552_v59, 7  ;;  %v1319_v8 = vadd.f32 %v1318_v60, %v1288_v61  ;;  %v1387_v11 = vadd.f32 %v1356_v62, %v1355_v20  ;;  %v998_v12 = vpop.f32.mrf.mxu1  ;;  %v2362_v21 = vpack.c.bf16 %v2829_v56, %v2829_v56 }
 0x101   : > { %v1850_v13 = vsel %vm2824_vm7, %v1532_v1, %v1849_v58  ;;  %v1535_v16 = vshrl.u32 %v2357_v4, 16  ;;  %v1538_v19 = vshll.u32 %v2357_v4, 16  ;;  %v2854_v22 = vpop.f32.mrf.mxu0  ;;  %v996_v26 = vadd.f32 %v995_v24, %v2773_v34  ;;  %v1855_v4 = vld [vmem:[%s2821_s14 + $0x8] sm:$0x1] }
 0x102   : > { %1851 = vst [vmem:[%s2821_s14] sm:$0xf] %v1850_v13  ;;  %v1557_v61 = vor.u32 %v1555_v3, %v1554_v2  ;;  %v1559_v20 = vrot.slane %v1554_v2, 4  ;;  %v1388_v23 = vadd.f32 %v1387_v11, %v1357_v9  ;;  %v2485_v28 = vpop.f32.mrf.mxu1  ;;  %v1578_v59 = vshrl.u32 %v2362_v21, 16 }
 0x103   : > { %v1537_v58 = vrot.slane %v1535_v16, 7  ;;  %v1581_v60 = vshll.u32 %v2362_v21, 16  ;;  %v1320_v62 = vadd.f32 %v1319_v8, %v1289_v10  ;;  %v2858_v0 = vpop.f32.mrf.mxu0  ;;  %v1290_v2 = vadd.f32 %v1175_v17, %v996_v26  ;;  %v1872_v17 = vld [vmem:[%s2821_s14 + $0x24] sm:$0xf] }
 0x104   : > { %v1558_v1 = vsel %vm2847_vm9, %v1550_v32, %v1557_v61  ;;  %v1863_v3 = vsel %vm2838_vm8, %v1559_v20, %v1862_v15  ;;  %v1389_v9 = vadd.f32 %v1388_v23, %v1358_v30  ;;  %v1011_v11 = vpop.f32.mrf.mxu1  ;;  %v2867_v10 = vrot.slane %v1578_v59, 7 }
 0x105   : > { %1861 = vst [vmem:[%s2821_s14 + $0x10] sm:$0xf] %v1558_v1  ;;  %1864 = vst [vmem:[%s2821_s14 + $0x14] sm:$0x1] %v1863_v3  ;;  %v1540_v34 = vor.u32 %v1538_v19, %v1537_v58  ;;  %v1542_v24 = vrot.slane %v1537_v58, 4  ;;  %v1007_v8 = vadd.f32 %v2482_v63, %v2777_v36  ;;  %v2870_v13 = vpop.f32.mrf.mxu0  ;;  %v2874_v32 = vmul.f32 %v2829_v56, %v2829_v56 }
 0x106   : > { %v1359_v15 = vmul.f32 %v1290_v2, %v1290_v2  ;;  %v2360_v30 = vpack.c.bf16 %v1290_v2, %v1290_v2  ;;  %v999_v16 = vadd.f32 %v998_v12, %v2781_v38  ;;  %v2486_v19 = vpop.f32.mrf.mxu1  ;;  %v1583_v63 = vor.u32 %v1581_v60, %v2867_v10 }
 0x107   : > { %v1966_v21 = vld [vmem:[%s2821_s14 + $0xc] sm:$0x1]  ;;  %v1541_v61 = vsel %vm2847_vm9, %v1533_v7, %v1540_v34  ;;  %v1856_v36 = vsel %vm2838_vm8, %v1542_v24, %v1855_v4  ;;  %v1321_v20 = vadd.f32 %v1320_v62, %v1290_v2  ;;  %v1584_v38 = vrot.slane %v2867_v10, 4  ;;  %v2891_v7 = vpop.f32.mrf.mxu0 }
 0x108   : > { %v1967_v23 = vsel %vm2838_vm8, 0, %v1966_v21  ;;  %1852 = vst [vmem:[%s2821_s14 + $0x4] sm:$0xf] %v1541_v61  ;;  %1857 = vst [vmem:[%s2821_s14 + $0x8] sm:$0x1] %v1856_v36  ;;  %v1390_v12 = vadd.f32 %v1389_v9, %v1359_v15  ;;  %v1561_v26 = vshrl.u32 %v2360_v30, 16  ;;  %v2889_v58 = vpop.f32.mrf.mxu1  ;;  %v1873_v60 = vsel %vm2824_vm7, %v1583_v63, %v1872_v17 }
 0x109   : > { %1968 = vst [vmem:[%s2821_s14 + $0xc] sm:$0x1] %v1967_v23  ;;  %v1963_v59 = vld [vmem:[%s2821_s14] sm:$0x1]  ;;  %v1293_v62 = vadd.f32 %v2831_v57, %v1007_v8  ;;  %v1291_v1 = vadd.f32 %v1178_v5, %v999_v16  ;;  %v1020_v3 = vadd.f32 %v2485_v28, %v2785_v40  ;;  %1874 = vst [vmem:[%s2821_s14 + $0x24] sm:$0xf] %v1873_v60 }
 0x10a   : > { %v1964_v2 = vsel %vm2838_vm8, 0, %v1963_v59  ;;  %v1563_v9 = vrot.slane %v1561_v26, 7  ;;  %v1564_v34 = vshll.u32 %v2360_v30, 16  ;;  %v1012_v24 = vadd.f32 %v1011_v11, %v2789_v42  ;;  %v2909_v17 = vpop.f32.mrf.mxu1  ;;  %v1865_v57 = vld [vmem:[%s2821_s14 + $0x18] sm:$0xf]  ;;  %v2918_v42 = vpop.f32.mrf.mxu0 }
 0x10b   : > { %1965 = vst [vmem:[%s2821_s14] sm:$0x1] %v1964_v2  ;;  %v2363_v40 = vpack.c.bf16 %v1293_v62, %v1293_v62  ;;  %v1322_v5 = vadd.f32 %v1321_v20, %v1291_v1  ;;  %v1360_v28 = vmul.f32 %v1291_v1, %v1291_v1  ;;  %v1023_v8 = vadd.f32 %v2486_v19, %v2793_v44 }
 0x10c   : > { %v2015_v15 = vld [vmem:[%s2821_s14 + $0x14] sm:$0x1]  ;;  %v1566_v16 = vor.u32 %v1564_v34, %v1563_v9  ;;  %v1362_v21 = vmul.f32 %v1293_v62, %v1293_v62  ;;  %v2361_v61 = vpack.c.bf16 %v1291_v1, %v1291_v1  ;;  %v2916_v30 = vadd.f32 %v2854_v22, %v1020_v3  ;;  %v2920_v11 = vpop.f32.mrf.mxu1  ;;  %v1876_v34 = vld [vmem:[%s2821_s14 + $0x2c] sm:$0x1] }
 0x10d   : > { %v2016_v36 = vsel %vm2901_vm10, 0, %v2015_v15  ;;  %v1567_v63 = vrot.slane %v1563_v9, 4  ;;  %v1586_v20 = vshrl.u32 %v2363_v40, 16  ;;  %v1323_v44 = vadd.f32 %v1322_v5, %v2829_v56  ;;  %v2943_v5 = vpop.f32.mrf.mxu0 }
 0x10e   : > { %2017 = vst [vmem:[%s2821_s14 + $0x14] sm:$0x1] %v2016_v36  ;;  %v1866_v19 = vsel %vm2824_vm7, %v1566_v16, %v1865_v57  ;;  %v1589_v23 = vshll.u32 %v2363_v40, 16  ;;  %v1391_v26 = vadd.f32 %v1390_v12, %v1360_v28  ;;  %v1569_v22 = vshrl.u32 %v2361_v61, 16  ;;  %v2928_v59 = vpop.f32.mrf.mxu1  ;;  %v1869_v16 = vld [vmem:[%s2821_s14 + $0x20] sm:$0x1] }
 0x10f   : > { %v2012_v60 = vld [vmem:[%s2821_s14 + $0x8] sm:$0x1]  ;;  %1867 = vst [vmem:[%s2821_s14 + $0x18] sm:$0xf] %v1866_v19  ;;  %v1588_v1 = vrot.slane %v1586_v20, 7  ;;  %v1572_v3 = vshll.u32 %v2361_v61, 16  ;;  %v2366_v2 = vpack.c.bf16 %v2916_v30, %v2916_v30  ;;  %v1294_v56 = vadd.f32 %v2858_v0, %v1012_v24 }
 0x110   : > { %v2013_v9 = vsel %vm2901_vm10, 0, %v2012_v60  ;;  %v1392_v12 = vadd.f32 %v1391_v26, %v2874_v32  ;;  %v1571_v57 = vrot.slane %v1569_v22, 7  ;;  %v2941_v40 = vmul.f32 %v2916_v30, %v2916_v30  ;;  %v1030_v28 = vpop.f32.mrf.mxu1  ;;  %v1972_v15 = vld [vmem:[%s2821_s14 + $0x24] sm:$0x1] }
 0x111   : > { %2014 = vst [vmem:[%s2821_s14 + $0x8] sm:$0x1] %v2013_v9  ;;  %v1591_v0 = vor.u32 %v1589_v23, %v1588_v1  ;;  %v1593_v24 = vrot.slane %v1588_v1, 4  ;;  %v1612_v61 = vshrl.u32 %v2366_v2, 16  ;;  %v1324_v36 = vadd.f32 %v1323_v44, %v1293_v62  ;;  %v2966_v9 = vpop.f32.mrf.mxu0 }
 0x112   : > { %v1973_v32 = vsel %vm2838_vm8, 0, %v1972_v15  ;;  %v1574_v20 = vor.u32 %v1572_v3, %v1571_v57  ;;  %v1576_v19 = vrot.slane %v1571_v57, 4  ;;  %v1615_v26 = vshll.u32 %v2366_v2, 16  ;;  %v1886_v3 = vld [vmem:[%s2821_s14 + $0x3c] sm:$0xf] }
 0x113   : > { %1974 = vst [vmem:[%s2821_s14 + $0x24] sm:$0x1] %v1973_v32  ;;  %v1592_v22 = vsel %vm2847_vm9, %v1584_v38, %v1591_v0  ;;  %v1877_v23 = vsel %vm2838_vm8, %v1593_v24, %v1876_v34  ;;  %v2957_v60 = vrot.slane %v1612_v61, 7  ;;  %v1363_v62 = vmul.f32 %v1294_v56, %v1294_v56  ;;  %v2968_v38 = vpop.f32.mrf.mxu1 }
 0x114   : > { %1875 = vst [vmem:[%s2821_s14 + $0x28] sm:$0xf] %v1592_v22  ;;  %1878 = vst [vmem:[%s2821_s14 + $0x2c] sm:$0x1] %v1877_v23  ;;  %v1575_v44 = vsel %vm2847_vm9, %v1567_v63, %v1574_v20  ;;  %v1870_v1 = vsel %vm2838_vm8, %v1576_v19, %v1869_v16  ;;  %v1393_v10 = vadd.f32 %v1392_v12, %v1362_v21  ;;  %v1879_v20 = vld [vmem:[%s2821_s14 + $0x30] sm:$0xf] }
 0x115   : > { %v2364_v2 = vpack.c.bf16 %v1294_v56, %v1294_v56  ;;  %1868 = vst [vmem:[%s2821_s14 + $0x1c] sm:$0xf] %v1575_v44  ;;  %1871 = vst [vmem:[%s2821_s14 + $0x20] sm:$0x1] %v1870_v1  ;;  %v1617_v34 = vor.u32 %v1615_v26, %v2957_v60  ;;  %v1325_v57 = vadd.f32 %v1324_v36, %v1294_v56  ;;  %v1618_v21 = vrot.slane %v2957_v60, 4 }
 0x116   : > { %v1297_v15 = vadd.f32 %v2870_v13, %v1023_v8  ;;  %v1015_v63 = vadd.f32 %v2889_v58, %v2797_v46  ;;  %v1969_v0 = vld [vmem:[%s2821_s14 + $0x18] sm:$0x1]  ;;  %v1394_v12 = vadd.f32 %v1393_v10, %v1363_v62  ;;  %v1036_v16 = vadd.f32 %v2909_v17, %v2801_v48  ;;  %v2992_v48 = vpop.f32.mrf.mxu0  ;;  %v2994_v17 = vpop.f32.mrf.mxu1 }
 0x117   : > { %v1595_v24 = vshrl.u32 %v2364_v2, 16  ;;  %v1970_v61 = vsel %vm2838_vm8, 0, %v1969_v0  ;;  %v1887_v56 = vsel %vm2824_vm7, %v1617_v34, %v1886_v3  ;;  %v1598_v36 = vshll.u32 %v2364_v2, 16  ;;  %v1890_v2 = vld [vmem:[%s2821_s14 + $0x44] sm:$0x1] }
 0x118   : > { %v2367_v13 = vpack.c.bf16 %v1297_v15, %v1297_v15  ;;  %1971 = vst [vmem:[%s2821_s14 + $0x18] sm:$0x1] %v1970_v61  ;;  %1888 = vst [vmem:[%s2821_s14 + $0x3c] sm:$0xf] %v1887_v56  ;;  %v1366_v58 = vmul.f32 %v1297_v15, %v1297_v15  ;;  %v1295_v8 = vadd.f32 %v2891_v7, %v1015_v63  ;;  %v3016_v34 = vpop.f32.mrf.mxu0 }
 0x119   : > { %v2986_v46 = vrot.slane %v1595_v24, 7  ;;  %v2990_v32 = vadd.f32 %v2918_v42, %v1036_v16  ;;  %v1028_v22 = vadd.f32 %v2920_v11, %v2805_v50  ;;  %v1039_v23 = vadd.f32 %v2928_v59, %v2809_v52 }
 0x11a   : > { %v1620_v19 = vshrl.u32 %v2367_v13, 16  ;;  %v1623_v26 = vshll.u32 %v2367_v13, 16  ;;  %v1326_v60 = vadd.f32 %v1325_v57, %v1295_v8  ;;  %v1364_v42 = vmul.f32 %v1295_v8, %v1295_v8  ;;  %v3018_v57 = vpop.f32.mrf.mxu1 }
 0x11b   : > { %v1600_v7 = vor.u32 %v1598_v36, %v2986_v46  ;;  %v3003_v62 = vadd.f32 %v1030_v28, %v2813_v54  ;;  %v2021_v44 = vld [vmem:[%s2821_s14 + $0x2c] sm:$0x1]  ;;  %v1601_v1 = vrot.slane %v2986_v46, 4  ;;  %v2365_v10 = vpack.c.bf16 %v1295_v8, %v1295_v8 }
 0x11c   : > { %v1622_v3 = vrot.slane %v1620_v19, 7  ;;  %v2370_v50 = vpack.c.bf16 %v2990_v32, %v2990_v32  ;;  %v2022_v52 = vsel %vm2901_vm10, 0, %v2021_v44  ;;  %v2018_v11 = vld [vmem:[%s2821_s14 + $0x20] sm:$0x1]  ;;  %v1327_v54 = vadd.f32 %v1326_v60, %v2916_v30 }
 0x11d   : > { %v1880_v59 = vsel %vm2824_vm7, %v1600_v7, %v1879_v20  ;;  %v1395_v28 = vadd.f32 %v1394_v12, %v1364_v42  ;;  %2023 = vst [vmem:[%s2821_s14 + $0x2c] sm:$0x1] %v2022_v52  ;;  %v2019_v63 = vsel %vm2901_vm10, 0, %v2018_v11  ;;  %v1603_v16 = vshrl.u32 %v2365_v10, 16  ;;  %v1223_v42 = vpop.f32.mrf.mxu0 }
 0x11e   : > { %1881 = vst [vmem:[%s2821_s14 + $0x30] sm:$0xf] %v1880_v59  ;;  %v1625_v0 = vor.u32 %v1623_v26, %v1622_v3  ;;  %v1627_v24 = vrot.slane %v1622_v3, 4  ;;  %2020 = vst [vmem:[%s2821_s14 + $0x20] sm:$0x1] %v2019_v63  ;;  %v1606_v30 = vshll.u32 %v2365_v10, 16  ;;  %v1298_v20 = vadd.f32 %v2943_v5, %v1028_v22 }
 0x11f   : > { %v1396_v61 = vadd.f32 %v1395_v28, %v2941_v40  ;;  %v1646_v12 = vshrl.u32 %v2370_v50, 16  ;;  %v1649_v56 = vshll.u32 %v2370_v50, 16  ;;  %v1978_v36 = vld [vmem:[%s2821_s14 + $0x3c] sm:$0x1]  ;;  %v1605_v8 = vrot.slane %v1603_v16, 7 }
 0x120   : > { %v1626_v13 = vsel %vm2847_vm9, %v1618_v21, %v1625_v0  ;;  %v1891_v46 = vsel %vm2838_vm8, %v1627_v24, %v1890_v2  ;;  %v1979_v19 = vsel %vm2838_vm8, 0, %v1978_v36  ;;  %v1883_v40 = vld [vmem:[%s2821_s14 + $0x38] sm:$0x1]  ;;  %v1328_v7 = vadd.f32 %v1327_v54, %v1297_v15  ;;  %v3039_v21 = vpop.f32.mrf.mxu1  ;;  %v1900_v22 = vld [vmem:[%s2821_s14 + $0x54] sm:$0xf] }
 0x121   : > { %1889 = vst [vmem:[%s2821_s14 + $0x40] sm:$0xf] %v1626_v13  ;;  %1892 = vst [vmem:[%s2821_s14 + $0x44] sm:$0x1] %v1891_v46  ;;  %v3037_v26 = vrot.slane %v1646_v12, 7  ;;  %v1397_v60 = vadd.f32 %v1396_v61, %v1366_v58  ;;  %v1608_v44 = vor.u32 %v1606_v30, %v1605_v8  ;;  %v1610_v3 = vrot.slane %v1605_v8, 4 }
 0x122   : > { %1980 = vst [vmem:[%s2821_s14 + $0x3c] sm:$0x1] %v1979_v19  ;;  %v1369_v5 = vmul.f32 %v2990_v32, %v2990_v32  ;;  %v2368_v10 = vpack.c.bf16 %v1298_v20, %v1298_v20  ;;  %v1367_v15 = vmul.f32 %v1298_v20, %v1298_v20  ;;  %v1301_v58 = vadd.f32 %v2966_v9, %v1039_v23  ;;  %v2528_v23 = vpop.f32.mrf.mxu0  ;;  %v3057_v16 = vpop.f32.mrf.mxu1 }
 0x123   : > { %v1651_v50 = vor.u32 %v1649_v56, %v3037_v26  ;;  %v1652_v52 = vrot.slane %v3037_v26, 4  ;;  %v1609_v11 = vsel %vm2847_vm9, %v1601_v1, %v1608_v44  ;;  %v1884_v59 = vsel %vm2838_vm8, %v1610_v3, %v1883_v40  ;;  %v1893_v56 = vld [vmem:[%s2821_s14 + $0x48] sm:$0xf]  ;;  %v1904_v3 = vld [vmem:[%s2821_s14 + $0x5c] sm:$0x1] }
 0x124   : > { %v1329_v2 = vadd.f32 %v1328_v7, %v1298_v20  ;;  %v1629_v54 = vshrl.u32 %v2368_v10, 16  ;;  %1882 = vst [vmem:[%s2821_s14 + $0x34] sm:$0xf] %v1609_v11  ;;  %1885 = vst [vmem:[%s2821_s14 + $0x38] sm:$0x1] %v1884_v59  ;;  %v1398_v0 = vadd.f32 %v1397_v60, %v1367_v15  ;;  %v1632_v24 = vshll.u32 %v2368_v10, 16  ;;  %v1226_v60 = vpop.f32.mrf.mxu0  ;;  %v3078_v44 = vpop.f32.mrf.mxu1 }
 0x125   : > { %v1975_v28 = vld [vmem:[%s2821_s14 + $0x30] sm:$0x1]  ;;  %v1901_v63 = vsel %vm2824_vm7, %v1651_v50, %v1900_v22  ;;  %v2371_v9 = vpack.c.bf16 %v1301_v58, %v1301_v58  ;;  %v1299_v30 = vadd.f32 %v2992_v48, %v3003_v62  ;;  %v1052_v12 = vadd.f32 %v2968_v38, %v2763_v25 }
 0x126   : > { %v1976_v1 = vsel %vm2838_vm8, 0, %v1975_v28  ;;  %1902 = vst [vmem:[%s2821_s14 + $0x54] sm:$0xf] %v1901_v63  ;;  %v1631_v61 = vrot.slane %v1629_v54, 7  ;;  %v1370_v36 = vmul.f32 %v1301_v58, %v1301_v58  ;;  %v1044_v8 = vadd.f32 %v2994_v17, %v2765_v27 }
 0x127   : > { %1977 = vst [vmem:[%s2821_s14 + $0x30] sm:$0x1] %v1976_v1  ;;  %v1654_v13 = vshrl.u32 %v2371_v9, 16  ;;  %v1657_v46 = vshll.u32 %v2371_v9, 16  ;;  %v1330_v40 = vadd.f32 %v1329_v2, %v1299_v30  ;;  %v1368_v26 = vmul.f32 %v1299_v30, %v1299_v30  ;;  %v3096_v9 = vpop.f32.mrf.mxu1 }
 0x128   : > { %v2027_v20 = vld [vmem:[%s2821_s14 + $0x44] sm:$0x1]  ;;  %v1634_v19 = vor.u32 %v1632_v24, %v1631_v61  ;;  %v1055_v48 = vadd.f32 %v3018_v57, %v2767_v29  ;;  %v2369_v62 = vpack.c.bf16 %v1299_v30, %v1299_v30  ;;  %v3076_v7 = vadd.f32 %v3016_v34, %v1052_v12  ;;  %v2531_v24 = vpop.f32.mrf.mxu0 }
 0x129   : > { %v2028_v25 = vsel %vm2901_vm10, 0, %v2027_v20  ;;  %v1656_v38 = vrot.slane %v1654_v13, 7  ;;  %v1635_v27 = vrot.slane %v1631_v61, 4  ;;  %v1331_v29 = vadd.f32 %v1330_v40, %v2990_v32 }
 0x12a   : > { %2029 = vst [vmem:[%s2821_s14 + $0x44] sm:$0x1] %v2028_v25  ;;  %v1894_v17 = vsel %vm2824_vm7, %v1634_v19, %v1893_v56  ;;  %v1399_v57 = vadd.f32 %v1398_v0, %v1368_v26  ;;  %v1637_v50 = vshrl.u32 %v2369_v62, 16  ;;  %v1302_v34 = vadd.f32 %v1223_v42, %v1044_v8  ;;  %v1914_v25 = vld [vmem:[%s2821_s14 + $0x6c] sm:$0xf] }
 0x12b   : > { %1895 = vst [vmem:[%s2821_s14 + $0x48] sm:$0xf] %v1894_v17  ;;  %v1659_v22 = vor.u32 %v1657_v46, %v1656_v38  ;;  %v1661_v10 = vrot.slane %v1656_v38, 4  ;;  %v2024_v15 = vld [vmem:[%s2821_s14 + $0x38] sm:$0x1]  ;;  %v1640_v59 = vshll.u32 %v2369_v62, 16  ;;  %v2374_v2 = vpack.c.bf16 %v3076_v7, %v3076_v7  ;;  %v1239_v62 = vpop.f32.mrf.mxu0  ;;  %v3120_v17 = vpop.f32.mrf.mxu1 }
 0x12c   : > { %v1400_v11 = vadd.f32 %v1399_v57, %v1369_v5  ;;  %v1332_v54 = vadd.f32 %v1331_v29, %v1301_v58  ;;  %v2025_v32 = vsel %vm2901_vm10, 0, %v2024_v15  ;;  %v1639_v0 = vrot.slane %v1637_v50, 7  ;;  %v1897_v58 = vld [vmem:[%s2821_s14 + $0x50] sm:$0x1]  ;;  %v1907_v15 = vld [vmem:[%s2821_s14 + $0x60] sm:$0xf] }
 0x12d   : > { %v1984_v28 = vld [vmem:[%s2821_s14 + $0x54] sm:$0x1]  ;;  %v1660_v63 = vsel %vm2847_vm9, %v1652_v52, %v1659_v22  ;;  %v1905_v42 = vsel %vm2838_vm8, %v1661_v10, %v1904_v3  ;;  %2026 = vst [vmem:[%s2821_s14 + $0x38] sm:$0x1] %v2025_v32  ;;  %v1373_v1 = vmul.f32 %v3076_v7, %v3076_v7  ;;  %v1680_v61 = vshrl.u32 %v2374_v2, 16  ;;  %v2501_v32 = vpop.f32.mrf.mxu1 }
 0x12e   : > { %v1985_v5 = vsel %vm2838_vm8, 0, %v1984_v28  ;;  %1903 = vst [vmem:[%s2821_s14 + $0x58] sm:$0xf] %v1660_v63  ;;  %1906 = vst [vmem:[%s2821_s14 + $0x5c] sm:$0x1] %v1905_v42  ;;  %v1683_v52 = vshll.u32 %v2374_v2, 16  ;;  %v1642_v30 = vor.u32 %v1640_v59, %v1639_v0  ;;  %v1371_v56 = vmul.f32 %v1302_v34, %v1302_v34 }
 0x12f   : > { %1986 = vst [vmem:[%s2821_s14 + $0x54] sm:$0x1] %v1985_v5  ;;  %v1644_v12 = vrot.slane %v1639_v0, 4  ;;  %v1401_v13 = vadd.f32 %v1400_v11, %v1370_v36  ;;  %v3107_v46 = vrot.slane %v1680_v61, 7  ;;  %v2372_v8 = vpack.c.bf16 %v1302_v34, %v1302_v34 }
 0x130   : > { %v3109_v20 = vadd.f32 %v2528_v23, %v1055_v48  ;;  %v1047_v19 = vadd.f32 %v3039_v21, %v2769_v31  ;;  %v1643_v40 = vsel %vm2847_vm9, %v1635_v27, %v1642_v30  ;;  %v1333_v38 = vadd.f32 %v1332_v54, %v1302_v34  ;;  %v2532_v54 = vpop.f32.mrf.mxu0 }
 0x131   : > { %v1898_v26 = vsel %vm2838_vm8, %v1644_v12, %v1897_v58  ;;  %v1068_v36 = vadd.f32 %v3057_v16, %v2771_v33  ;;  %1896 = vst [vmem:[%s2821_s14 + $0x4c] sm:$0xf] %v1643_v40  ;;  %v1685_v31 = vor.u32 %v1683_v52, %v3107_v46  ;;  %v1686_v21 = vrot.slane %v3107_v46, 4  ;;  %v1075_v40 = vpop.f32.mrf.mxu1 }
 0x132   : > { %v1981_v23 = vld [vmem:[%s2821_s14 + $0x48] sm:$0x1]  ;;  %1899 = vst [vmem:[%s2821_s14 + $0x50] sm:$0x1] %v1898_v26  ;;  %v1402_v48 = vadd.f32 %v1401_v13, %v1371_v56  ;;  %v1663_v27 = vshrl.u32 %v2372_v8, 16  ;;  %v1666_v29 = vshll.u32 %v2372_v8, 16  ;;  %v2375_v33 = vpack.c.bf16 %v3109_v20, %v3109_v20 }
 0x133   : > { %v1982_v3 = vsel %vm2838_vm8, 0, %v1981_v23  ;;  %v1303_v16 = vadd.f32 %v1226_v60, %v1047_v19  ;;  %v1915_v57 = vsel %vm2824_vm7, %v1685_v31, %v1914_v25  ;;  %v1374_v10 = vmul.f32 %v3109_v20, %v3109_v20  ;;  %v1242_v19 = vpop.f32.mrf.mxu0 }
 0x134   : > { %1983 = vst [vmem:[%s2821_s14 + $0x48] sm:$0x1] %v1982_v3  ;;  %v1665_v22 = vrot.slane %v1663_v27, 7  ;;  %v3136_v50 = vadd.f32 %v2531_v24, %v1068_v36  ;;  %1916 = vst [vmem:[%s2821_s14 + $0x6c] sm:$0xf] %v1915_v57  ;;  %v1688_v11 = vshrl.u32 %v2375_v33, 16  ;;  %v1060_v60 = vadd.f32 %v3078_v44, %v2775_v35 }
 0x135   : > { %v2033_v34 = vld [vmem:[%s2821_s14 + $0x5c] sm:$0x1]  ;;  %v1334_v59 = vadd.f32 %v1333_v38, %v1303_v16  ;;  %v1372_v2 = vmul.f32 %v1303_v16, %v1303_v16  ;;  %v1691_v42 = vshll.u32 %v2375_v33, 16  ;;  %v2373_v0 = vpack.c.bf16 %v1303_v16, %v1303_v16  ;;  %v1918_v35 = vld [vmem:[%s2821_s14 + $0x74] sm:$0x1] }
 0x136   : > { %v2034_v28 = vsel %vm2901_vm10, 0, %v2033_v34  ;;  %v1668_v63 = vor.u32 %v1666_v29, %v1665_v22  ;;  %v1669_v24 = vrot.slane %v1665_v22, 4  ;;  %v1690_v5 = vrot.slane %v1688_v11, 7  ;;  %v1928_v57 = vld [vmem:[%s2821_s14 + $0x84] sm:$0xf]  ;;  %v2502_v11 = vpop.f32.mrf.mxu1 }
 0x137   : > { %2035 = vst [vmem:[%s2821_s14 + $0x5c] sm:$0x1] %v2034_v28  ;;  %v1335_v58 = vadd.f32 %v1334_v59, %v3076_v7  ;;  %v1403_v61 = vadd.f32 %v1402_v48, %v1372_v2  ;;  %v1671_v44 = vshrl.u32 %v2373_v0, 16  ;;  %v3152_v30 = vmul.f32 %v3136_v50, %v3136_v50  ;;  %v1911_v48 = vld [vmem:[%s2821_s14 + $0x68] sm:$0x1] }
 0x138   : > { %v1908_v52 = vsel %vm2824_vm7, %v1668_v63, %v1907_v15  ;;  %v2378_v12 = vpack.c.bf16 %v3136_v50, %v3136_v50  ;;  %v1693_v13 = vor.u32 %v1691_v42, %v1690_v5  ;;  %v1695_v7 = vrot.slane %v1690_v5, 4  ;;  %v2535_v15 = vpop.f32.mrf.mxu0 }
 0x139   : > { %v2030_v56 = vld [vmem:[%s2821_s14 + $0x50] sm:$0x1]  ;;  %1909 = vst [vmem:[%s2821_s14 + $0x60] sm:$0xf] %v1908_v52  ;;  %v1404_v46 = vadd.f32 %v1403_v61, %v1373_v1  ;;  %v1306_v8 = vadd.f32 %v1239_v62, %v1060_v60  ;;  %v1673_v25 = vrot.slane %v1671_v44, 7  ;;  %v1674_v38 = vshll.u32 %v2373_v0, 16 }
 0x13a   : > { %v2031_v26 = vsel %vm2901_vm10, 0, %v2030_v56  ;;  %v1714_v36 = vshrl.u32 %v2378_v12, 16  ;;  %v1694_v23 = vsel %vm2847_vm9, %v1686_v21, %v1693_v13  ;;  %v1919_v31 = vsel %vm2838_vm8, %v1695_v7, %v1918_v35  ;;  %v1255_v44 = vpop.f32.mrf.mxu0  ;;  %v1921_v56 = vld [vmem:[%s2821_s14 + $0x78] sm:$0xf] }
 0x13b   : > { %2032 = vst [vmem:[%s2821_s14 + $0x50] sm:$0x1] %v2031_v26  ;;  %v1717_v1 = vshll.u32 %v2378_v12, 16  ;;  %v1336_v62 = vadd.f32 %v1335_v58, %v3109_v20  ;;  %v1990_v27 = vld [vmem:[%s2821_s14 + $0x6c] sm:$0x1]  ;;  %v1676_v3 = vor.u32 %v1674_v38, %v1673_v25  ;;  %v1678_v29 = vrot.slane %v1673_v25, 4  ;;  %v1078_v12 = vpop.f32.mrf.mxu1 }
 0x13c   : > { %1917 = vst [vmem:[%s2821_s14 + $0x70] sm:$0xf] %v1694_v23  ;;  %1920 = vst [vmem:[%s2821_s14 + $0x74] sm:$0x1] %v1919_v31  ;;  %v3170_v33 = vrot.slane %v1714_v36, 7  ;;  %v1405_v16 = vadd.f32 %v1404_v46, %v1374_v10  ;;  %v1991_v21 = vsel %vm2838_vm8, 0, %v1990_v27  ;;  %v1375_v22 = vmul.f32 %v1306_v8, %v1306_v8 }
 0x13d   : > { %v2376_v34 = vpack.c.bf16 %v1306_v8, %v1306_v8  ;;  %v1071_v20 = vadd.f32 %v3096_v9, %v2779_v37  ;;  %1992 = vst [vmem:[%s2821_s14 + $0x6c] sm:$0x1] %v1991_v21  ;;  %v1677_v59 = vsel %vm2847_vm9, %v1669_v24, %v1676_v3  ;;  %v1912_v10 = vsel %vm2838_vm8, %v1678_v29, %v1911_v48  ;;  %v2505_v48 = vpop.f32.mrf.mxu1 }
 0x13e   : > { %v1719_v2 = vor.u32 %v1717_v1, %v3170_v33  ;;  %v1337_v60 = vadd.f32 %v1336_v62, %v1306_v8  ;;  %1910 = vst [vmem:[%s2821_s14 + $0x64] sm:$0xf] %v1677_v59  ;;  %1913 = vst [vmem:[%s2821_s14 + $0x68] sm:$0x1] %v1912_v10  ;;  %v1720_v28 = vrot.slane %v3170_v33, 4  ;;  %v1406_v63 = vadd.f32 %v1405_v16, %v1375_v22  ;;  %v2536_v33 = vpop.f32.mrf.mxu0 }
 0x13f   : > { %v1697_v37 = vshrl.u32 %v2376_v34, 16  ;;  %v1309_v9 = vadd.f32 %v2532_v54, %v1071_v20  ;;  %v1063_v24 = vadd.f32 %v3120_v17, %v2783_v39  ;;  %v1084_v5 = vadd.f32 %v2501_v32, %v2787_v41 }
 0x140   : > { %v1987_v42 = vld [vmem:[%s2821_s14 + $0x60] sm:$0x1]  ;;  %v1929_v0 = vsel %vm2824_vm7, %v1719_v2, %v1928_v57  ;;  %v1076_v58 = vadd.f32 %v1075_v40, %v2791_v43  ;;  %v1700_v35 = vshll.u32 %v2376_v34, 16  ;;  %v1087_v8 = vadd.f32 %v2502_v11, %v2795_v45  ;;  %v1932_v45 = vld [vmem:[%s2821_s14 + $0x8c] sm:$0x1] }
 0x141   : > { %v1988_v61 = vsel %vm2838_vm8, 0, %v1987_v42  ;;  %1930 = vst [vmem:[%s2821_s14 + $0x84] sm:$0xf] %v1929_v0  ;;  %v3196_v52 = vrot.slane %v1697_v37, 7  ;;  %v2379_v54 = vpack.c.bf16 %v1309_v9, %v1309_v9  ;;  %v1378_v13 = vmul.f32 %v1309_v9, %v1309_v9  ;;  %v1091_v37 = vpop.f32.mrf.mxu1  ;;  %v1942_v0 = vld [vmem:[%s2821_s14 + $0x9c] sm:$0xf] }
 0x142   : > { %1989 = vst [vmem:[%s2821_s14 + $0x60] sm:$0x1] %v1988_v61  ;;  %v1307_v39 = vadd.f32 %v1242_v19, %v1063_v24  ;;  %v3200_v17 = vadd.f32 %v2535_v15, %v1084_v5  ;;  %v1310_v41 = vadd.f32 %v1255_v44, %v1076_v58  ;;  %v1258_v24 = vpop.f32.mrf.mxu0  ;;  %v1313_v44 = vadd.f32 %v2536_v33, %v1087_v8 }
 0x143   : > { %v2039_v43 = vld [vmem:[%s2821_s14 + $0x74] sm:$0x1]  ;;  %v1702_v32 = vor.u32 %v1700_v35, %v3196_v52  ;;  %v1703_v7 = vrot.slane %v3196_v52, 4  ;;  %v1722_v46 = vshrl.u32 %v2379_v54, 16  ;;  %v1725_v23 = vshll.u32 %v2379_v54, 16 }
 0x144   : > { %v2040_v40 = vsel %vm2901_vm10, 0, %v2039_v43  ;;  %v1338_v26 = vadd.f32 %v1337_v60, %v1307_v39  ;;  %v1376_v25 = vmul.f32 %v1307_v39, %v1307_v39  ;;  %v2377_v19 = vpack.c.bf16 %v1307_v39, %v1307_v39  ;;  %v1925_v60 = vld [vmem:[%s2821_s14 + $0x80] sm:$0x1] }
 0x145   : > { %2041 = vst [vmem:[%s2821_s14 + $0x74] sm:$0x1] %v2040_v40  ;;  %v1922_v38 = vsel %vm2824_vm7, %v1702_v32, %v1921_v56  ;;  %v1724_v36 = vrot.slane %v1722_v46, 7  ;;  %v2382_v31 = vpack.c.bf16 %v3200_v17, %v3200_v17  ;;  %v2036_v1 = vld [vmem:[%s2821_s14 + $0x68] sm:$0x1]  ;;  %v1381_v42 = vmul.f32 %v3200_v17, %v3200_v17  ;;  %v2506_v46 = vpop.f32.mrf.mxu1 }
 0x146   : > { %1923 = vst [vmem:[%s2821_s14 + $0x78] sm:$0xf] %v1922_v38  ;;  %v1339_v62 = vadd.f32 %v1338_v26, %v3136_v50  ;;  %v1407_v27 = vadd.f32 %v1406_v63, %v1376_v25  ;;  %v1705_v3 = vshrl.u32 %v2377_v19, 16  ;;  %v1708_v29 = vshll.u32 %v2377_v19, 16 }
 0x147   : > { %v2037_v16 = vsel %vm2901_vm10, 0, %v2036_v1  ;;  %v1727_v21 = vor.u32 %v1725_v23, %v1724_v36  ;;  %v1729_v57 = vrot.slane %v1724_v36, 4  ;;  %v1748_v22 = vshrl.u32 %v2382_v31, 16  ;;  %v1935_v36 = vld [vmem:[%s2821_s14 + $0x90] sm:$0xf] }
 0x148   : > { %2038 = vst [vmem:[%s2821_s14 + $0x68] sm:$0x1] %v2037_v16  ;;  %v1996_v34 = vld [vmem:[%s2821_s14 + $0x84] sm:$0x1]  ;;  %v1408_v20 = vadd.f32 %v1407_v27, %v3152_v30  ;;  %v1707_v50 = vrot.slane %v1705_v3, 7  ;;  %v1751_v15 = vshll.u32 %v2382_v31, 16  ;;  %v1340_v11 = vadd.f32 %v1339_v62, %v1309_v9 }
 0x149   : > { %v1997_v59 = vsel %vm2838_vm8, 0, %v1996_v34  ;;  %v1728_v10 = vsel %vm2847_vm9, %v1720_v28, %v1727_v21  ;;  %v1933_v2 = vsel %vm2838_vm8, %v1729_v57, %v1932_v45  ;;  %v3229_v63 = vrot.slane %v1748_v22, 7  ;;  %v1946_v22 = vld [vmem:[%s2821_s14 + $0xa4] sm:$0x1] }
 0x14a   : > { %1998 = vst [vmem:[%s2821_s14 + $0x84] sm:$0x1] %v1997_v59  ;;  %1931 = vst [vmem:[%s2821_s14 + $0x88] sm:$0xf] %v1728_v10  ;;  %v1710_v30 = vor.u32 %v1708_v29, %v1707_v50  ;;  %v1712_v9 = vrot.slane %v1707_v50, 4  ;;  %v1341_v28 = vadd.f32 %v1340_v11, %v1310_v41  ;;  %v1379_v58 = vmul.f32 %v1310_v41, %v1310_v41 }
 0x14b   : > { %1934 = vst [vmem:[%s2821_s14 + $0x8c] sm:$0x1] %v1933_v2  ;;  %v1753_v5 = vor.u32 %v1751_v15, %v3229_v63  ;;  %v1409_v61 = vadd.f32 %v1408_v20, %v1378_v13  ;;  %v2380_v52 = vpack.c.bf16 %v1310_v41, %v1310_v41  ;;  %v1079_v56 = vadd.f32 %v1078_v12, %v2799_v47  ;;  %v2539_v12 = vpop.f32.mrf.mxu0 }
 0x14c   : > { %v1711_v35 = vsel %vm2847_vm9, %v1703_v7, %v1710_v30  ;;  %v1926_v54 = vsel %vm2838_vm8, %v1712_v9, %v1925_v60  ;;  %v1754_v43 = vrot.slane %v3229_v63, 4  ;;  %v2383_v40 = vpack.c.bf16 %v1313_v44, %v1313_v44 }
 0x14d   : > { %v1993_v39 = vld [vmem:[%s2821_s14 + $0x78] sm:$0x1]  ;;  %1924 = vst [vmem:[%s2821_s14 + $0x7c] sm:$0xf] %v1711_v35  ;;  %1927 = vst [vmem:[%s2821_s14 + $0x80] sm:$0x1] %v1926_v54  ;;  %v1943_v13 = vsel %vm2824_vm7, %v1753_v5, %v1942_v0  ;;  %v1410_v41 = vadd.f32 %v1409_v61, %v1379_v58  ;;  %v1311_v47 = vadd.f32 %v1258_v24, %v1079_v56  ;;  %v1271_v21 = vpop.f32.mrf.mxu0  ;;  %v1094_v5 = vpop.f32.mrf.mxu1 }
 0x14e   : > { %v1731_v32 = vshrl.u32 %v2380_v52, 16  ;;  %v1994_v7 = vsel %vm2838_vm8, 0, %v1993_v39  ;;  %1944 = vst [vmem:[%s2821_s14 + $0x9c] sm:$0xf] %v1943_v13  ;;  %v1734_v8 = vshll.u32 %v2380_v52, 16  ;;  %v1382_v25 = vmul.f32 %v1313_v44, %v1313_v44 }
 0x14f   : > { %1995 = vst [vmem:[%s2821_s14 + $0x78] sm:$0x1] %v1994_v7  ;;  %v1100_v19 = vadd.f32 %v2505_v48, %v2803_v49  ;;  %v1092_v38 = vadd.f32 %v1091_v37, %v2807_v51  ;;  %v1756_v23 = vshrl.u32 %v2383_v40, 16  ;;  %v1342_v31 = vadd.f32 %v1341_v28, %v1311_v47  ;;  %v1939_v0 = vld [vmem:[%s2821_s14 + $0x98] sm:$0x1]  ;;  %v2540_v24 = vpop.f32.mrf.mxu0 }
 0x150   : > { %v1733_v26 = vrot.slane %v1731_v32, 7  ;;  %v1380_v1 = vmul.f32 %v1311_v47, %v1311_v47  ;;  %v1103_v45 = vadd.f32 %v2506_v46, %v2811_v53  ;;  %v1759_v3 = vshll.u32 %v2383_v40, 16 }
 0x151   : > { %v2381_v29 = vpack.c.bf16 %v1311_v47, %v1311_v47  ;;  %v3258_v33 = vadd.f32 %v2539_v12, %v1100_v19  ;;  %v1758_v51 = vrot.slane %v1756_v23, 7  ;;  %v1343_v48 = vadd.f32 %v1342_v31, %v3200_v17  ;;  %v1274_v40 = vpop.f32.mrf.mxu0 }
 0x152   : > { %v2045_v62 = vld [vmem:[%s2821_s14 + $0x8c] sm:$0x1]  ;;  %v1736_v27 = vor.u32 %v1734_v8, %v1733_v26  ;;  %v1411_v16 = vadd.f32 %v1410_v41, %v1380_v1  ;;  %v1737_v57 = vrot.slane %v1733_v26, 4  ;;  %v1314_v63 = vadd.f32 %v1271_v21, %v1092_v38  ;;  %v1956_v41 = vld [vmem:[%s2821_s14 + $0xb4] sm:$0xf] }
 0x153   : > { %v2046_v49 = vsel %vm2901_vm10, 0, %v2045_v62  ;;  %v1739_v34 = vshrl.u32 %v2381_v29, 16  ;;  %v1742_v20 = vshll.u32 %v2381_v29, 16  ;;  %v1761_v15 = vor.u32 %v1759_v3, %v1758_v51 }
 0x154   : > { %2047 = vst [vmem:[%s2821_s14 + $0x8c] sm:$0x1] %v2046_v49  ;;  %v1936_v53 = vsel %vm2824_vm7, %v1736_v27, %v1935_v36  ;;  %v2042_v50 = vld [vmem:[%s2821_s14 + $0x80] sm:$0x1]  ;;  %v1763_v11 = vrot.slane %v1758_v51, 4  ;;  %v1412_v59 = vadd.f32 %v1411_v16, %v1381_v42  ;;  %v2386_v17 = vpack.c.bf16 %v3258_v33, %v3258_v33 }
 0x155   : > { %1937 = vst [vmem:[%s2821_s14 + $0x90] sm:$0xf] %v1936_v53  ;;  %v2043_v10 = vsel %vm2901_vm10, 0, %v2042_v50  ;;  %v2002_v2 = vld [vmem:[%s2821_s14 + $0x9c] sm:$0x1]  ;;  %v1741_v60 = vrot.slane %v1739_v34, 7  ;;  %v1344_v37 = vadd.f32 %v1343_v48, %v1313_v44  ;;  %v1762_v9 = vsel %vm2847_vm9, %v1754_v43, %v1761_v15 }
 0x156   : > { %2044 = vst [vmem:[%s2821_s14 + $0x80] sm:$0x1] %v2043_v10  ;;  %v2003_v30 = vsel %vm2838_vm8, 0, %v2002_v2  ;;  %v1947_v42 = vsel %vm2838_vm8, %v1763_v11, %v1946_v22  ;;  %v1782_v28 = vshrl.u32 %v2386_v17, 16  ;;  %1945 = vst [vmem:[%s2821_s14 + $0xa0] sm:$0xf] %v1762_v9  ;;  %v1383_v44 = vmul.f32 %v1314_v63, %v1314_v63 }
 0x157   : > { %2004 = vst [vmem:[%s2821_s14 + $0x9c] sm:$0x1] %v2003_v30  ;;  %1948 = vst [vmem:[%s2821_s14 + $0xa4] sm:$0x1] %v1947_v42  ;;  %v1744_v58 = vor.u32 %v1742_v20, %v1741_v60  ;;  %v1746_v61 = vrot.slane %v1741_v60, 4  ;;  %v1785_v52 = vshll.u32 %v2386_v17, 16  ;;  %v1345_v35 = vadd.f32 %v1344_v37, %v1314_v63 }
 0x158   : > { %v1784_v54 = vrot.slane %v1782_v28, 7  ;;  %v1413_v56 = vadd.f32 %v1412_v59, %v1382_v25  ;;  %v2384_v39 = vpack.c.bf16 %v1314_v63, %v1314_v63  ;;  %v1317_v32 = vadd.f32 %v2540_v24, %v1103_v45  ;;  %v1960_v34 = vld [vmem:[%s2821_s14 + $0xbc] sm:$0x1]  ;;  %v1953_v30 = vld [vmem:[%s2821_s14 + $0xb0] sm:$0x1] }
 0x159   : > { %v1745_v43 = vsel %vm2847_vm9, %v1737_v57, %v1744_v58  ;;  %v1940_v13 = vsel %vm2838_vm8, %v1746_v61, %v1939_v0  ;;  %v1095_v46 = vadd.f32 %v1094_v5, %v2815_v55  ;;  %v1949_v55 = vld [vmem:[%s2821_s14 + $0xa8] sm:$0xf]  ;;  %v1385_v27 = vmul.f32 %v3258_v33, %v3258_v33 }
 0x15a   : > { %1938 = vst [vmem:[%s2821_s14 + $0x94] sm:$0xf] %v1745_v43  ;;  %1941 = vst [vmem:[%s2821_s14 + $0x98] sm:$0x1] %v1940_v13  ;;  %v1787_v7 = vor.u32 %v1785_v52, %v1784_v54  ;;  %v1765_v8 = vshrl.u32 %v2384_v39, 16  ;;  %v1414_v12 = vadd.f32 %v1413_v56, %v1383_v44  ;;  %v2387_v26 = vpack.c.bf16 %v1317_v32, %v1317_v32 }
 0x15b   : > { %v1315_v25 = vadd.f32 %v1274_v40, %v1095_v46  ;;  %v1768_v23 = vshll.u32 %v2384_v39, 16  ;;  %v1788_v57 = vrot.slane %v1784_v54, 4  ;;  %v1386_v22 = vmul.f32 %v1317_v32, %v1317_v32 }
 0x15c   : > { %v1999_v47 = vld [vmem:[%s2821_s14 + $0x90] sm:$0x1]  ;;  %v1957_v38 = vsel %vm2824_vm7, %v1787_v7, %v1956_v41  ;;  %v1767_v36 = vrot.slane %v1765_v8, 7  ;;  %v1790_v31 = vshrl.u32 %v2387_v26, 16  ;;  %v1793_v29 = vshll.u32 %v2387_v26, 16 }
 0x15d   : > { %v2000_v19 = vsel %vm2838_vm8, 0, %v1999_v47  ;;  %1958 = vst [vmem:[%s2821_s14 + $0xb4] sm:$0xf] %v1957_v38  ;;  %v1346_v1 = vadd.f32 %v1345_v35, %v1315_v25  ;;  %v1384_v45 = vmul.f32 %v1315_v25, %v1315_v25  ;;  %v2385_v49 = vpack.c.bf16 %v1315_v25, %v1315_v25 }
 0x15e   : > { %2001 = vst [vmem:[%s2821_s14 + $0x90] sm:$0x1] %v2000_v19  ;;  %v2051_v62 = vld [vmem:[%s2821_s14 + $0xa4] sm:$0x1]  ;;  %v1770_v3 = vor.u32 %v1768_v23, %v1767_v36  ;;  %v1792_v48 = vrot.slane %v1790_v31, 7  ;;  %v1771_v42 = vrot.slane %v1767_v36, 4 }
 0x15f   : > { %v2052_v51 = vsel %vm2901_vm10, 0, %v2051_v62  ;;  %v1347_v16 = vadd.f32 %v1346_v1, %v3258_v33  ;;  %v1415_v21 = vadd.f32 %v1414_v12, %v1384_v45  ;;  %v1773_v20 = vshrl.u32 %v2385_v49, 16 }
 0x160   : > { %2053 = vst [vmem:[%s2821_s14 + $0xa4] sm:$0x1] %v2052_v51  ;;  %v1950_v53 = vsel %vm2824_vm7, %v1770_v3, %v1949_v55  ;;  %v1795_v15 = vor.u32 %v1793_v29, %v1792_v48  ;;  %v1797_v11 = vrot.slane %v1792_v48, 4  ;;  %v1776_v2 = vshll.u32 %v2385_v49, 16 }
 0x161   : > { %v2048_v50 = vld [vmem:[%s2821_s14 + $0x98] sm:$0x1]  ;;  %1951 = vst [vmem:[%s2821_s14 + $0xa8] sm:$0xf] %v1950_v53  ;;  %v1348_v59 = vadd.f32 %v1347_v16, %v1317_v32  ;;  %v1416_v33 = vadd.f32 %v1415_v21, %v1385_v27  ;;  %v1775_v10 = vrot.slane %v1773_v20, 7 }
 0x162   : > { %v2049_v17 = vsel %vm2901_vm10, 0, %v2048_v50  ;;  %v1796_v18 = vsel %vm2847_vm9, %v1788_v57, %v1795_v15  ;;  %v1961_v60 = vsel %vm2838_vm8, %v1797_v11, %v1960_v34 }
 0x163   : > { %2050 = vst [vmem:[%s2821_s14 + $0x98] sm:$0x1] %v2049_v17  ;;  %v1349_v63 = vrot.slane %v1348_v59, 4  ;;  %v1417_v37 = vadd.f32 %v1416_v33, %v1386_v22  ;;  %1959 = vst [vmem:[%s2821_s14 + $0xb8] sm:$0xf] %v1796_v18  ;;  %v1778_v0 = vor.u32 %v1776_v2, %v1775_v10  ;;  %v1780_v28 = vrot.slane %v1775_v10, 4 }
 0x164   : > { %v2008_v9 = vld [vmem:[%s2821_s14 + $0xb4] sm:$0x1]  ;;  %1962 = vst [vmem:[%s2821_s14 + $0xbc] sm:$0x1] %v1961_v60 }
 0x165   : > { %v2009_v24 = vsel %vm2838_vm8, 0, %v2008_v9  ;;  %v1350_v5 = vadd.f32 %v1349_v63, %v1348_v59  ;;  %v1418_v58 = vrot.slane %v1417_v37, 4  ;;  %v1779_v61 = vsel %vm2847_vm9, %v1771_v42, %v1778_v0 }
 0x166   : > { %2010 = vst [vmem:[%s2821_s14 + $0xb4] sm:$0x1] %v2009_v24  ;;  %v1954_v52 = vsel %vm2838_vm8, %v1780_v28, %v1953_v30  ;;  %1952 = vst [vmem:[%s2821_s14 + $0xac] sm:$0xf] %v1779_v61 }
 0x167   : > { %v1351_v35 = vrot.slane %v1350_v5, 2  ;;  %v1419_v54 = vadd.f32 %v1418_v58, %v1417_v37  ;;  %1955 = vst [vmem:[%s2821_s14 + $0xb0] sm:$0x1] %v1954_v52 }
 0x168   : > { %v2005_v44 = vld [vmem:[%s2821_s14 + $0xa8] sm:$0x1] }
 0x169   : > { %v2006_v56 = vsel %vm2838_vm8, 0, %v2005_v44  ;;  %v1352_v39 = vadd.f32 %v1351_v35, %v1350_v5  ;;  %v1420_v43 = vrot.slane %v1419_v54, 2 }
 0x16a   : > { %2007 = vst [vmem:[%s2821_s14 + $0xa8] sm:$0x1] %v2006_v56 }
 0x16b   : > { %v2057_v14 = vld [vmem:[%s2821_s14 + $0xbc] sm:$0x1]  ;;  %v1353_v13 = vrot.slane %v1352_v39, 1  ;;  %v1421_v41 = vadd.f32 %v1420_v43, %v1419_v54 }
 0x16c   : > { %v2058_v32 = vsel %vm2901_vm10, 0, %v2057_v14 }
 0x16d   : > { %2059 = vst [vmem:[%s2821_s14 + $0xbc] sm:$0x1] %v2058_v32  ;;  %v1422_v46 = vrot.slane %v1421_v41, 1  ;;  %v1354_v6 = vadd.f32 %v1353_v13, %v1352_v39 }
 0x16e   : > { %v2054_v7 = vld [vmem:[%s2821_s14 + $0xb0] sm:$0x1] }
 0x16f   : > { %v1423_v8 = vadd.f32 %v1422_v46, %v1421_v41  ;;  %v2055_v40 = vsel %vm2901_vm10, 0, %v2054_v7 }
 0x170   : > { %2056 = vst [vmem:[%s2821_s14 + $0xb0] sm:$0x1] %v2055_v40 }
 0x171   : > { %v1425_v47 = vsel %vm1424_vm2, %v1354_v6, %v1423_v8 }
 0x172   : > { %1426 = vst [vmem:[%s461_s18] sm:$0x3] %v1425_v47 }
 0x173 PF: > { %s18_s2 = sadd.s32 1, %s2614_s2   ;;  %s3375_s23 = smov %s2610_s24 }
 0x174   : > { %p15_p5 = scmp.ge.s32.totalorder %s18_s2, 4   ;;  %s3376_s24 = smov %s3378_s4 }
 0x176   :  { %17 = sbr.rel (!%p15_p5) target bundleno = 2 (0x2), region = 94 }

// kernel: double_conv.3
= control target key start
LH: loop header
LB: loop body
LE: loop exit
PB: predicated region body
PF: predicated region fallthrough
CT: control target
= control target key end

     0   :  { %s5041_s23 = smov 0   ;;  %s5043_s24 = smov 0   ;;  %s6999_s0 = inlined_call_operand.vmem [shape: bf16[2,16,18,128], index: 0, kind: input, shape index: {}, may-alias: {0,1,2}]   ;;  %s7000_s1 = inlined_call_operand.vmem [shape: bf16[2,16,18,128], index: 1, kind: input, shape index: {}, may-alias: {0,1,2}]   ;;  %s7001_s2 = inlined_call_operand.vmem [shape: bf16[2,16,18,128], index: 2, kind: input, shape index: {}, may-alias: {0,1,2}]   ;;  %s7002_s3 = inlined_call_operand.vmem [shape: bf16[3,384,128], index: 3, kind: input, shape index: {}]   ;;  %s7003_s4 = inlined_call_operand.vmem [shape: f32[1,128], index: 4, kind: input, shape index: {}]   ;;  %s7004_s5 = inlined_call_operand.vmem [shape: f32[1,128], index: 5, kind: input, shape index: {}]   ;;  %s7005_s6 = inlined_call_operand.vmem [shape: bf16[2,16,18,128], index: 6, kind: output, shape index: {0}]   ;;  %s7006_s7 = inlined_call_operand.vmem [shape: f32[2,2,128], index: 7, kind: output, shape index: {1}]  }
   0x1   :  { %s5045_s2 = smov 0  }
   0x2 LB: > { %s30_s25 = sadd.s32 1, %s4992_s24  ;;  %p3883_p0 = scmp.ge.s32.totalorder %s4996_s2, 1  ;;  %s4996_s2 = sphi %s5045_s2, %s18_s2   ;;  %s4992_s24 = sphi %s5043_s24, %s7096_s24   ;;  %s4988_s23 = sphi %s5041_s23, %s7095_s23  }
   0x3   : > { %p32_p1 = scmp.ge.s32.totalorder %s30_s25, 2  ;;  %p328_p2 = scmp.lt.s32.totalorder %s4996_s2, 3 }
   0x5   : > { %s7098_s25 = smov (%p32_p1, %s30_s25), 0  ;;  %p329_p3 = pnand %p3883_p0, %p328_p2 }
   0x7   : > { %332 = sbr.rel (%p329_p3) target bundleno = 607 (0x25f), region = 44 }
   0xc   : > { %v4900_v0 = vld [vmem:[%s7002_s3 + $0x138] sm:$0xff]   ;;  %p419_p4 = scmp.lt.s32.totalorder %s4988_s23, 1  ;;  %v4902_v2 = vld [vmem:[%s7002_s3 + $0x130] sm:$0xff]   ;;  %v4904_v4 = vld [vmem:[%s7002_s3 + $0x128] sm:$0xff]   ;;  %v607_v7 = vlaneseq  ;;  %vm1045_vm2 = vsmask.f32 7424 }
   0xd   : > { %v4901_v1 = vld [vmem:[%s7002_s3 + $0xf8] sm:$0xff]   ;;  %4304 = vmatprep.subr.bf16.mxu0 %v4900_v0  ;;  %4856 = vmatprep.subr.bf16.mxu1 %v4900_v0  ;;  %v4903_v3 = vld [vmem:[%s7002_s3 + $0xf0] sm:$0xff]   ;;  %v4905_v5 = vld [vmem:[%s7002_s3 + $0xe8] sm:$0xff]   ;;  %vm4998_vm3 = vmmov 1   ;;  %vm1286_vm5 = vcmask 1046528   ;;  %vm3493_vm6 = vcmask 1043456  }
   0xe   : > { %4305 = vmatpush3.bf16.msra.mxu0 %v4901_v1  ;;  %4864 = vmatpush3.bf16.msra.mxu1 %v4901_v1  ;;  %s7100_s23 = smov (!%p419_p4, %s4988_s23), 1  ;;  %v4906_v6 = vld [vmem:[%s7002_s3 + $0x120] sm:$0xff]   ;;  %v4908_v9 = vld [vmem:[%s7002_s3 + $0x118] sm:$0xff]   ;;  %v5089_v10 = vshrl.u32 %v607_v7, 7  ;;  %v4910_v12 = vld [vmem:[%s7002_s3 + $0x110] sm:$0xff]   ;;  %vm3071_vm8 = vcmask 1040384  }
   0xf   : > { %4306 = vmatprep.subr.bf16.mxu0 %v4902_v2  ;;  %4857 = vmatprep.subr.bf16.mxu1 %v4902_v2  ;;  %s4872_s17 = smul.u32 192, %s7100_s23  ;;  %v4907_v8 = vld [vmem:[%s7002_s3 + $0xe0] sm:$0xff]   ;;  %v4909_v11 = vld [vmem:[%s7002_s3 + $0xd8] sm:$0xff]   ;;  %v4911_v25 = vld [vmem:[%s7002_s3 + $0xd0] sm:$0xff]   ;;  %vm3494_vm7 = vsmask.f32 7938 }
  0x10   : > { %v5107_v15 = vadd.s32 16, %v5089_v10  ;;  %v5112_v16 = vld [vmem:[%s7003_s4] ss:$0 sm:$0xff]  ;;  %vm611_vm0 = vcmp.ge.s32.totalorder %v5089_v10, 1  ;;  %v4912_v30 = vld [vmem:[%s7002_s3 + $0x108] sm:$0xff]   ;;  %v5174_v0 = vld [vmem:[%s7002_s3 + $0x178] sm:$0xff]  }
  0x11   : > { %s5096_s26 = scalar_lea.vmem %s7000_s1, %s4872_s17  ;;  %v5118_v20 = vld [vmem:[%s7004_s5] ss:$0 sm:$0xff]  ;;  %v4913_v39 = vld [vmem:[%s7002_s3 + $0xc8] sm:$0xff]   ;;  %v4917_v1 = vld [vmem:[%s7002_s3 + $0xb8] sm:$0xff]   ;;  %vm3170_vm9 = vsmask.f32 256  ;;  %s6351_s27 = scalar_lea.vmem %s7005_s6, %s4872_s17 }
  0x12   : > { %4307 = vmatpush3.bf16.msra.mxu0 %v4903_v3  ;;  %4865 = vmatpush3.bf16.msra.mxu1 %v4903_v3  ;;  %v4266_v13 = vld [vmem:[%s5096_s26] sm:$0xff]   ;;  %v469_v14 = vld [vmem:[%s5096_s26 + $0x8] sm:$0x1]  ;;  %v4302_v21 = vld [vmem:[%s5096_s26 + $0x90] sm:$0xff]   ;;  %vm670_vm1 = vcmp.le.s32.totalorder %v5107_v15, 16  ;;  %s3888_s17 = sshll.u32 %s7100_s23, 1 }
  0x13   : > { %4308 = vmatprep.subr.bf16.mxu0 %v4904_v4  ;;  %4858 = vmatprep.subr.bf16.mxu1 %v4904_v4  ;;  %v4267_v17 = vunpack.c.l.bf16 %v4266_v13  ;;  %v4268_v18 = vunpack.c.h.bf16 %v4266_v13  ;;  %v730_v19 = vunpack.c.l.bf16 %v469_v14  ;;  %v4291_v22 = vunpack.c.l.bf16 %v4302_v21  ;;  %v505_v24 = vld [vmem:[%s5096_s26 + $0x98] sm:$0x1]  ;;  %v470_v37 = vld [vmem:[%s5096_s26 + $0xc] sm:$0xff]   ;;  %v472_v38 = vld [vmem:[%s5096_s26 + $0x14] sm:$0x1]  ;;  %s461_s30 = scalar_lea.vmem %s7006_s7, %s3888_s17 }
  0x14   : > { %v4292_v23 = vunpack.c.h.bf16 %v4302_v21  ;;  %v766_v29 = vunpack.c.l.bf16 %v505_v24  ;;  %v731_v42 = vunpack.c.l.bf16 %v470_v37  ;;  %v732_v43 = vunpack.c.h.bf16 %v470_v37  ;;  %v4914_v44 = vld [vmem:[%s7002_s3 + $0x100] sm:$0xff]   ;;  %vm5196_vm4 = vmpackc.low %vm4998_vm3, %vm611_vm0 }
  0x15   : > { %v789_v26 = vmul.f32 %v4267_v17, %v5112_v16  ;;  %v790_v27 = vmul.f32 %v4268_v18, %v5112_v16  ;;  %v791_v28 = vmul.f32 %v5112_v16, %v730_v19  ;;  %v825_v31 = vmul.f32 %v4291_v22, %v5112_v16  ;;  %v4915_v61 = vld [vmem:[%s7002_s3 + $0xc0] sm:$0xff]   ;;  %vm6369_vm11 = vmand %vm3493_vm6, %vm3494_vm7 }
  0x16   : > { %4309 = vmatpush3.bf16.msra.mxu0 %v4905_v5  ;;  %4866 = vmatpush3.bf16.msra.mxu1 %v4905_v5  ;;  %v826_v32 = vmul.f32 %v4292_v23, %v5112_v16  ;;  %v827_v36 = vmul.f32 %v5112_v16, %v766_v29  ;;  %v733_v51 = vunpack.c.l.bf16 %v472_v38  ;;  %v792_v52 = vmul.f32 %v5112_v16, %v731_v42  ;;  %vm6387_vm12 = vmand %vm3071_vm8, %vm3170_vm9 }
  0x17   : > { %4310 = vmatprep.subr.bf16.mxu0 %v4906_v6  ;;  %4859 = vmatprep.subr.bf16.mxu1 %v4906_v6  ;;  %v850_v33 = vadd.f32 %v5118_v20, %v789_v26  ;;  %v851_v34 = vadd.f32 %v5118_v20, %v790_v27  ;;  %v852_v35 = vadd.f32 %v5118_v20, %v791_v28  ;;  %vm3171_vm10 = vsmask.f32 4368  ;;  %vm6456_vm14 = vmand %vm3071_vm8, %vm3494_vm7 }
  0x18   : > { %v886_v40 = vadd.f32 %v5118_v20, %v825_v31  ;;  %v887_v41 = vadd.f32 %v5118_v20, %v826_v32  ;;  %v888_v48 = vadd.f32 %v5118_v20, %v827_v36  ;;  %v793_v2 = vmul.f32 %v5112_v16, %v732_v43  ;;  %v4918_v32 = vld [vmem:[%s7002_s3 + $0x170] sm:$0xff]   ;;  %vm6397_vm13 = vmor %vm3170_vm9, %vm3171_vm10 }
  0x19   : > { %v904_v45 = vmax.f32 %v850_v33, 0.0  ;;  %v905_v46 = vmax.f32 %v851_v34, 0.0  ;;  %v906_v47 = vmax.f32 %v852_v35, 0.0  ;;  %v794_v3 = vmul.f32 %v5112_v16, %v733_v51  ;;  %v4921_v36 = vld [vmem:[%s7002_s3 + $0xb0] sm:$0xff]  }
  0x1a   : > { %4311 = vmatpush3.bf16.msra.mxu0 %v4907_v8  ;;  %4867 = vmatpush3.bf16.msra.mxu1 %v4907_v8  ;;  %v940_v49 = vmax.f32 %v886_v40, 0.0  ;;  %v941_v50 = vmax.f32 %v887_v41, 0.0  ;;  %v942_v55 = vmax.f32 %v888_v48, 0.0  ;;  %v506_v8 = vld [vmem:[%s5096_s26 + $0x9c] sm:$0xff]   ;;  %v853_v13 = vadd.f32 %v5118_v20, %v792_v52 }
  0x1b   : > { %4312 = vmatprep.subr.bf16.mxu0 %v4908_v9  ;;  %4860 = vmatprep.subr.bf16.mxu1 %v4908_v9  ;;  %v958_v53 = vsel %vm611_vm0, %v904_v45, 0.0  ;;  %v960_v54 = vsel %vm670_vm1, %v906_v47, 0.0  ;;  %v5154_v56 = vpack.c.bf16 %v905_v46, %v904_v45  ;;  %v508_v9 = vld [vmem:[%s5096_s26 + $0xa4] sm:$0x1]  ;;  %v854_v14 = vadd.f32 %v5118_v20, %v793_v2  ;;  %v4297_v41 = vld [vmem:[%s5096_s26 + $0x18] sm:$0xff]  }
  0x1c   : > { %v5156_v57 = vpack.c.bf16 %v905_v46, %v958_v53  ;;  %v5158_v58 = vpack.c.bf16 %v960_v54, %v960_v54  ;;  %v994_v59 = vsel %vm611_vm0, %v940_v49, 0.0  ;;  %v5162_v60 = vpack.c.bf16 %v941_v50, %v940_v49  ;;  %v475_v46 = vld [vmem:[%s5096_s26 + $0x20] sm:$0x1] }
  0x1d   : > { %v996_v62 = vsel %vm670_vm1, %v942_v55, 0.0  ;;  %v5169_v63 = vpack.c.bf16 %v941_v50, %v994_v59  ;;  %v855_v21 = vadd.f32 %v5118_v20, %v794_v3  ;;  %v907_v23 = vmax.f32 %v853_v13, 0.0  ;;  %v4303_v55 = vld [vmem:[%s5096_s26 + $0xa8] sm:$0xff]   ;;  %v511_v13 = vld [vmem:[%s5096_s26 + $0xb0] sm:$0x1] }
  0x1e   : > { %4313 = vmatpush3.bf16.msra.mxu0 %v4909_v11  ;;  %4868 = vmatpush3.bf16.msra.mxu1 %v4909_v11  ;;  %7025 = vst [vmem:[#allocation2_spill] sm:$0xff] %v5162_v60  ;;  %v1059_v4 = vshrl.u32 %v5156_v57, 16  ;;  %v1061_v5 = vshll.u32 %v5156_v57, 16  ;;  %v1066_v6 = vshll.u32 %v5158_v58, 16  ;;  %v5184_v7 = vpack.c.bf16 %v996_v62, %v996_v62  ;;  %v4925_v59 = vld [vmem:[%s7002_s3 + $0xa8] sm:$0xff]  }
  0x1f   : > { %4314 = vmatprep.subr.bf16.mxu0 %v4910_v12  ;;  %4861 = vmatprep.subr.bf16.mxu1 %v4910_v12  ;;  %v1203_v11 = vshrl.u32 %v5169_v63, 16  ;;  %v1205_v12 = vshll.u32 %v5169_v63, 16  ;;  %v908_v24 = vmax.f32 %v854_v14, 0.0  ;;  %v909_v29 = vmax.f32 %v855_v21, 0.0  ;;  %v4929_v21 = vld [vmem:[%s7002_s3 + $0xa0] sm:$0xff]  }
  0x20   : > { %v1063_v17 = vrot.slane %v1061_v5, 1  ;;  %v1068_v18 = vrot.slane %v1066_v6, 1  ;;  %v1210_v19 = vshll.u32 %v5184_v7, 16  ;;  %v961_v33 = vsel %vm611_vm0, %v907_v23, 0.0  ;;  %v4919_v6 = vld [vmem:[%s7002_s3 + $0x168] sm:$0xff]  }
  0x21   : > { %v1207_v22 = vrot.slane %v1205_v12, 1  ;;  %v769_v34 = vunpack.c.l.bf16 %v508_v9  ;;  %v963_v38 = vsel %vm670_vm1, %v909_v29, 0.0  ;;  %v5235_v50 = vpack.c.bf16 %v908_v24, %v907_v23 }
  0x22   : > { %4315 = vmatpush3.bf16.msra.mxu0 %v4911_v25  ;;  %4869 = vmatpush3.bf16.msra.mxu1 %v4911_v25  ;;  %v767_v25 = vunpack.c.l.bf16 %v506_v8  ;;  %v1064_v26 = vor.u32 %v1063_v17, %v1059_v4  ;;  %v1212_v28 = vrot.slane %v1210_v19, 1  ;;  %v5223_v43 = vpack.c.bf16 %v963_v38, %v963_v38 }
  0x23   : > { %4316 = vmatprep.subr.bf16.mxu0 %v4912_v30  ;;  %4862 = vmatprep.subr.bf16.mxu1 %v4912_v30  ;;  %v768_v30 = vunpack.c.h.bf16 %v506_v8  ;;  %v1208_v31 = vor.u32 %v1207_v22, %v1203_v11  ;;  %v4271_v54 = vunpack.c.l.bf16 %v4297_v41  ;;  %v4272_v2 = vunpack.c.h.bf16 %v4297_v41 }
  0x24   : > { %v828_v35 = vmul.f32 %v5112_v16, %v767_v25  ;;  %v5211_v37 = vsel %vm1045_vm2, %v1064_v26, %v1068_v18  ;;  %v1078_v51 = vshll.u32 %v5223_v43, 16  ;;  %v736_v3 = vunpack.c.l.bf16 %v475_v46  ;;  %v4920_v26 = vld [vmem:[%s7002_s3 + $0x160] sm:$0xff]  }
  0x25   : > { %v829_v40 = vmul.f32 %v5112_v16, %v768_v30  ;;  %1643 = vmatprep.mubr.bf16.mxu0 %v5211_v37  ;;  %v5221_v42 = vsel %vm1045_vm2, %v1208_v31, %v1212_v28  ;;  %v795_v8 = vmul.f32 %v4271_v54, %v5112_v16  ;;  %v796_v12 = vmul.f32 %v4272_v2, %v5112_v16  ;;  %v4934_v54 = vld [vmem:[%s7002_s3 + $0x98] sm:$0xff]  }
  0x26   : > { %4317 = vmatpush3.bf16.msra.mxu0 %v4913_v39  ;;  %4870 = vmatpush3.bf16.msra.mxu1 %v4913_v39  ;;  %v5215_v39 = vpack.c.bf16 %v908_v24, %v961_v33  ;;  %7028 = vst [vmem:[#allocation3_spill] sm:$0xff] %v5221_v42  ;;  %v889_v45 = vadd.f32 %v5118_v20, %v828_v35  ;;  %v4295_v19 = vunpack.c.l.bf16 %v4303_v55  ;;  %v4296_v31 = vunpack.c.h.bf16 %v4303_v55  ;;  %v4922_v2 = vld [vmem:[%s7002_s3 + $0x158] sm:$0xff]  }
  0x27   : > { %4318 = vmatprep.subr.bf16.mxu0 %v4914_v44  ;;  %4863 = vmatprep.subr.bf16.mxu1 %v4914_v44  ;;  %v830_v44 = vmul.f32 %v5112_v16, %v769_v34  ;;  %v890_v49 = vadd.f32 %v5118_v20, %v829_v40  ;;  %v797_v17 = vmul.f32 %v5112_v16, %v736_v3  ;;  %v772_v34 = vunpack.c.l.bf16 %v511_v13  ;;  %v478_v3 = vld [vmem:[%s5096_s26 + $0x2c] sm:$0x1] }
  0x28   : > { %1739 = vmatprep.mubr.bf16.mxu1 %v5221_v42  ;;  %v1071_v47 = vshrl.u32 %v5215_v39, 16  ;;  %v1073_v48 = vshll.u32 %v5215_v39, 16  ;;  %v943_v53 = vmax.f32 %v889_v45, 0.0  ;;  %v856_v18 = vadd.f32 %v5118_v20, %v795_v8 }
  0x29   : > { %v891_v52 = vadd.f32 %v5118_v20, %v830_v44  ;;  %v944_v62 = vmax.f32 %v890_v49, 0.0  ;;  %v857_v28 = vadd.f32 %v5118_v20, %v796_v12  ;;  %v858_v29 = vadd.f32 %v5118_v20, %v797_v17 }
  0x2a   : > { %4319 = vmatpush3.bf16.msra.mxu0 %v4915_v61  ;;  %4871 = vmatpush3.bf16.msra.mxu1 %v4915_v61  ;;  %v1075_v61 = vrot.slane %v1073_v48, 1  ;;  %v997_v5 = vsel %vm611_vm0, %v943_v53, 0.0  ;;  %v910_v30 = vmax.f32 %v856_v18, 0.0  ;;  %v831_v35 = vmul.f32 %v4295_v19, %v5112_v16  ;;  %v476_v48 = vld [vmem:[%s5096_s26 + $0x24] sm:$0xff]  }
  0x2b   : > { %4712 = vmatprep.subr.bf16.mxu1 %v5174_v0  ;;  %4760 = vmatprep.subr.bf16.mxu0 %v4917_v1  ;;  %v945_v4 = vmax.f32 %v891_v52, 0.0  ;;  %v5255_v11 = vpack.c.bf16 %v944_v62, %v943_v53  ;;  %v912_v38 = vmax.f32 %v858_v29, 0.0  ;;  %v832_v41 = vmul.f32 %v4296_v31, %v5112_v16  ;;  %v4923_v29 = vld [vmem:[%s7002_s3 + $0x150] sm:$0xff]  }
  0x2c   : > { %v1076_v9 = vor.u32 %v1075_v61, %v1071_v47  ;;  %v964_v40 = vsel %vm611_vm0, %v910_v30, 0.0  ;;  %v833_v46 = vmul.f32 %v5112_v16, %v772_v34  ;;  %v892_v47 = vadd.f32 %v5118_v20, %v831_v35  ;;  %v514_v35 = vld [vmem:[%s5096_s26 + $0xbc] sm:$0x1] }
  0x2d   : > { %3965 = vmatmul.mubr.msk.bf16.vlgmr.msra.gmra.mxu0 %vm5196_vm4, %v5154_v56  ;;  %4001 = vmatmul.mubr.msk.bf16.vlgmr.msra.gmra.mxu1 %vm5196_vm4, %v5162_v60  ;;  %7029 = vst [vmem:[#allocation4_spill] sm:$0xff] %v5255_v11  ;;  %v999_v14 = vsel %vm670_vm1, %v945_v4, 0.0  ;;  %v966_v49 = vsel %vm670_vm1, %v912_v38, 0.0  ;;  %v893_v52 = vadd.f32 %v5118_v20, %v832_v41  ;;  %v738_v13 = vunpack.c.h.bf16 %v476_v48 }
  0x2e   : > { %4761 = vmatpush3.bf16.msra.mxu0 %v4917_v1  ;;  %4713 = vmatpush3.bf16.msra.mxu1 %v5174_v0  ;;  %v1080_v1 = vrot.slane %v1078_v51, 1  ;;  %v5253_v0 = vpack.c.bf16 %v944_v62, %v997_v5  ;;  %v5269_v23 = vpack.c.bf16 %v999_v14, %v999_v14  ;;  %v894_v61 = vadd.f32 %v5118_v20, %v833_v46  ;;  %v4937_v14 = vld [vmem:[%s7002_s3 + $0x90] sm:$0xff]  }
  0x2f   : > { %4762 = vmatprep.subr.bf16.mxu0 %v4921_v36  ;;  %4714 = vmatprep.subr.bf16.mxu1 %v4918_v32  ;;  %v946_v62 = vmax.f32 %v892_v47, 0.0  ;;  %v947_v5 = vmax.f32 %v893_v52, 0.0 }
  0x30   : > { %v5267_v22 = vsel %vm1045_vm2, %v1076_v9, %v1080_v1  ;;  %v1215_v24 = vshrl.u32 %v5253_v0, 16  ;;  %v1217_v25 = vshll.u32 %v5253_v0, 16  ;;  %v1222_v33 = vshll.u32 %v5269_v23, 16 }
  0x31   : > { %1651 = vmatprep.mubr.bf16.mxu0 %v5267_v22  ;;  %v948_v9 = vmax.f32 %v894_v61, 0.0  ;;  %v1000_v12 = vsel %vm611_vm0, %v946_v62, 0.0  ;;  %v5324_v19 = vpack.c.bf16 %v947_v5, %v946_v62  ;;  %v4924_v61 = vld [vmem:[%s7002_s3 + $0x148] sm:$0xff]  }
  0x32   : > { %4763 = vmatpush3.bf16.msra.mxu0 %v4921_v36  ;;  %4715 = vmatpush3.bf16.msra.mxu1 %v4918_v32  ;;  %v1219_v32 = vrot.slane %v1217_v25, 1  ;;  %v911_v36 = vmax.f32 %v857_v28, 0.0  ;;  %v1224_v45 = vrot.slane %v1222_v33, 1  ;;  %v5322_v18 = vpack.c.bf16 %v947_v5, %v1000_v12  ;;  %v481_v5 = vld [vmem:[%s5096_s26 + $0x38] sm:$0x1]  ;;  %v4926_v12 = vld [vmem:[%s7002_s3 + $0x140] sm:$0xff]  }
  0x33   : > { %4764 = vmatprep.subr.bf16.mxu0 %v4925_v59  ;;  %4716 = vmatprep.subr.bf16.mxu1 %v4919_v6  ;;  %7031 = vst [vmem:[#allocation6_spill] sm:$0xff] %v5324_v19  ;;  %v1002_v28 = vsel %vm670_vm1, %v948_v9, 0.0 }
  0x34   : > { %v1220_v44 = vor.u32 %v1219_v32, %v1215_v24  ;;  %v5292_v51 = vpack.c.bf16 %v911_v36, %v964_v40  ;;  %v5295_v53 = vpack.c.bf16 %v911_v36, %v910_v30  ;;  %v512_v24 = vld [vmem:[%s5096_s26 + $0xb4] sm:$0xff]   ;;  %v5334_v32 = vpack.c.bf16 %v1002_v28, %v1002_v28 }
  0x35   : > { %3968 = vmatmul.mubr.msk.bf16.gmra.mxu0 %vm5196_vm4, %v5235_v50  ;;  %v1227_v33 = vshrl.u32 %v5322_v18, 16  ;;  %v1229_v34 = vshll.u32 %v5322_v18, 16  ;;  %v773_v41 = vunpack.c.l.bf16 %v512_v24  ;;  %v774_v47 = vunpack.c.h.bf16 %v512_v24 }
  0x36   : > { %4765 = vmatpush3.bf16.msra.mxu0 %v4925_v59  ;;  %4717 = vmatpush3.bf16.msra.mxu1 %v4919_v6  ;;  %v5301_v55 = vsel %vm1045_vm2, %v1220_v44, %v1224_v45  ;;  %v5303_v59 = vpack.c.bf16 %v966_v49, %v966_v49  ;;  %v1083_v1 = vshrl.u32 %v5292_v51, 16  ;;  %v1085_v4 = vshll.u32 %v5292_v51, 16 }
  0x37   : > { %4766 = vmatprep.subr.bf16.mxu0 %v4929_v21  ;;  %4718 = vmatprep.subr.bf16.mxu1 %v4920_v26  ;;  %7030 = vst [vmem:[#allocation5_spill] sm:$0xff] %v5301_v55  ;;  %v737_v6 = vunpack.c.l.bf16 %v476_v48  ;;  %v1231_v45 = vrot.slane %v1229_v34, 1  ;;  %v1234_v46 = vshll.u32 %v5334_v32, 16 }
  0x38   : > { %1747 = vmatprep.mubr.bf16.mxu1 %v5301_v55  ;;  %v1090_v8 = vshll.u32 %v5303_v59, 16  ;;  %v1087_v17 = vrot.slane %v1085_v4, 1  ;;  %v4298_v4 = vld [vmem:[%s5096_s26 + $0x30] sm:$0xff]  }
  0x39   : > { %4004 = vmatmul.mubr.msk.bf16.gmra.mxu1 %vm5196_vm4, %v5255_v11  ;;  %v798_v30 = vmul.f32 %v5112_v16, %v737_v6  ;;  %v1232_v62 = vor.u32 %v1231_v45, %v1227_v33  ;;  %v500_v11 = vld [vmem:[%s5096_s26 + $0x84] sm:$0xff]  }
  0x3a   : > { %4767 = vmatpush3.bf16.msra.mxu0 %v4929_v21  ;;  %4719 = vmatpush3.bf16.msra.mxu1 %v4920_v26  ;;  %v739_v21 = vunpack.c.l.bf16 %v478_v3  ;;  %v1092_v25 = vrot.slane %v1090_v8, 1  ;;  %v799_v26 = vmul.f32 %v5112_v16, %v738_v13  ;;  %v1088_v31 = vor.u32 %v1087_v17, %v1083_v1 }
  0x3b   : > { %4768 = vmatprep.subr.bf16.mxu0 %v4934_v54  ;;  %4720 = vmatprep.subr.bf16.mxu1 %v4922_v2  ;;  %v859_v38 = vadd.f32 %v5118_v20, %v798_v30  ;;  %v1236_v3 = vrot.slane %v1234_v46, 1  ;;  %v835_v1 = vmul.f32 %v5112_v16, %v774_v47  ;;  %v4275_v30 = vunpack.c.l.bf16 %v4298_v4 }
  0x3c   : > { %v800_v36 = vmul.f32 %v5112_v16, %v739_v21  ;;  %v860_v40 = vadd.f32 %v5118_v20, %v799_v26  ;;  %v5343_v44 = vsel %vm1045_vm2, %v1088_v31, %v1092_v25 }
  0x3d   : > { %1659 = vmatprep.mubr.bf16.mxu0 %v5343_v44  ;;  %v913_v49 = vmax.f32 %v859_v38, 0.0  ;;  %v5365_v13 = vsel %vm1045_vm2, %v1232_v62, %v1236_v3  ;;  %v896_v24 = vadd.f32 %v5118_v20, %v835_v1  ;;  %v742_v38 = vunpack.c.l.bf16 %v481_v5  ;;  %v4927_v1 = vld [vmem:[%s7002_s3 + $0x78] sm:$0xff]  }
  0x3e   : > { %4769 = vmatpush3.bf16.msra.mxu0 %v4934_v54  ;;  %4721 = vmatpush3.bf16.msra.mxu1 %v4922_v2  ;;  %v861_v48 = vadd.f32 %v5118_v20, %v800_v36  ;;  %v914_v52 = vmax.f32 %v860_v40, 0.0  ;;  %v775_v54 = vunpack.c.l.bf16 %v514_v35  ;;  %v834_v2 = vmul.f32 %v5112_v16, %v773_v41  ;;  %7032 = vst [vmem:[#allocation7_spill] sm:$0xff] %v5365_v13  ;;  %v4945_v41 = vld [vmem:[%s7002_s3 + $0x80] sm:$0xff]  }
  0x3f   : > { %4770 = vmatprep.subr.bf16.mxu0 %v4937_v14  ;;  %4722 = vmatprep.subr.bf16.mxu1 %v4923_v29  ;;  %v967_v8 = vsel %vm611_vm0, %v913_v49, 0.0  ;;  %v950_v35 = vmax.f32 %v896_v24, 0.0  ;;  %v801_v40 = vmul.f32 %v4275_v30, %v5112_v16  ;;  %v1290_v30 = vrot.slane %v5156_v57, 1 }
  0x40   : > { %3971 = vmatmul.mubr.msk.bf16.gmra.mxu0 %vm5196_vm4, %v5295_v53  ;;  %v915_v6 = vmax.f32 %v861_v48, 0.0  ;;  %v836_v9 = vmul.f32 %v5112_v16, %v775_v54  ;;  %v5367_v17 = vpack.c.bf16 %v914_v52, %v967_v8  ;;  %v895_v21 = vadd.f32 %v5118_v20, %v834_v2  ;;  %1755 = vmatprep.mubr.bf16.mxu1 %v5365_v13 }
  0x41   : > { %4007 = vmatmul.mubr.msk.bf16.gmra.mxu1 %vm5196_vm4, %v5324_v19  ;;  %v5397_v3 = vpack.c.bf16 %v914_v52, %v913_v49  ;;  %v803_v2 = vmul.f32 %v5112_v16, %v742_v38  ;;  %v484_v38 = vld [vmem:[%s5096_s26 + $0x44] sm:$0x1]  ;;  %v499_v19 = vld [vmem:[%s5096_s26 + $0x80] sm:$0x1] }
  0x42   : > { %4771 = vmatpush3.bf16.msra.mxu0 %v4937_v14  ;;  %4723 = vmatpush3.bf16.msra.mxu1 %v4923_v29  ;;  %v969_v25 = vsel %vm670_vm1, %v915_v6, 0.0  ;;  %v897_v28 = vadd.f32 %v5118_v20, %v836_v9  ;;  %v4276_v14 = vunpack.c.h.bf16 %v4298_v4  ;;  %v4942_v29 = vld [vmem:[%s7002_s3 + $0x88] sm:$0xff]   ;;  %v1095_v31 = vshrl.u32 %v5367_v17, 16 }
  0x43   : > { %4724 = vmatprep.subr.bf16.mxu1 %v4924_v61  ;;  %v5381_v26 = vpack.c.bf16 %v969_v25, %v969_v25  ;;  %v1097_v33 = vshll.u32 %v5367_v17, 16  ;;  %v949_v34 = vmax.f32 %v895_v21, 0.0  ;;  %4772 = vmatprep.subr.bf16.mxu0 %v4942_v29  ;;  %v862_v6 = vadd.f32 %v5118_v20, %v801_v40  ;;  %v482_v21 = vld [vmem:[%s5096_s26 + $0x3c] sm:$0xff]  }
  0x44   : > { %v951_v36 = vmax.f32 %v897_v28, 0.0  ;;  %v802_v48 = vmul.f32 %v4276_v14, %v5112_v16  ;;  %v864_v52 = vadd.f32 %v5118_v20, %v803_v2  ;;  %v4949_v14 = vld [vmem:[%s7002_s3 + $0x1f8] sm:$0xff]  }
  0x45   : > { %v1099_v45 = vrot.slane %v1097_v33, 1  ;;  %v1102_v46 = vshll.u32 %v5381_v26, 16  ;;  %v1003_v47 = vsel %vm611_vm0, %v949_v34, 0.0  ;;  %v916_v28 = vmax.f32 %v862_v6, 0.0 }
  0x46   : > { %4725 = vmatpush3.bf16.msra.mxu1 %v4924_v61  ;;  %4773 = vmatpush3.bf16.msra.mxu0 %v4942_v29  ;;  %v1005_v54 = vsel %vm670_vm1, %v951_v36, 0.0  ;;  %v5395_v62 = vpack.c.bf16 %v950_v35, %v1003_v47  ;;  %v863_v49 = vadd.f32 %v5118_v20, %v802_v48  ;;  %v918_v33 = vmax.f32 %v864_v52, 0.0 }
  0x47   : > { %4726 = vmatprep.subr.bf16.mxu1 %v4926_v12  ;;  %4774 = vmatprep.subr.bf16.mxu0 %v4945_v41  ;;  %v1100_v61 = vor.u32 %v1099_v45, %v1095_v31  ;;  %v1104_v4 = vrot.slane %v1102_v46, 1  ;;  %v5403_v5 = vpack.c.bf16 %v1005_v54, %v1005_v54  ;;  %v1291_v36 = vrot.slane %v5158_v58, 1 }
  0x48   : > { %v1400_v8 = vshrl.u32 %v5395_v62, 16  ;;  %v1402_v9 = vshll.u32 %v5395_v62, 16  ;;  %v917_v31 = vmax.f32 %v863_v49, 0.0  ;;  %v5425_v57 = vpack.c.bf16 %v950_v35, %v949_v34 }
  0x49   : > { %v5412_v24 = vsel %vm1045_vm2, %v1100_v61, %v1104_v4  ;;  %v1407_v25 = vshll.u32 %v5403_v5, 16  ;;  %v972_v46 = vsel %vm670_vm1, %v918_v33, 0.0  ;;  %v1294_v47 = vrot.slane %v5223_v43, 1 }
  0x4a   : > { %4727 = vmatpush3.bf16.msra.mxu1 %v4926_v12  ;;  %4775 = vmatpush3.bf16.msra.mxu0 %v4945_v41  ;;  %v1404_v29 = vrot.slane %v1402_v9, 1  ;;  %7033 = vst [vmem:[#allocation8_spill] sm:$0xff] %v5425_v57  ;;  %v970_v12 = vsel %vm611_vm0, %v916_v28, 0.0  ;;  %v1293_v41 = vrot.slane %v5215_v39, 1  ;;  %v5435_v48 = vpack.c.bf16 %v972_v46, %v972_v46  ;;  %v4299_v9 = vld [vmem:[%s5096_s26 + $0x48] sm:$0xff]  }
  0x4b   : > { %1667 = vmatprep.mubr.bf16.mxu0 %v5412_v24  ;;  %4440 = vmatprep.subr.bf16.mxu1 %v4927_v1  ;;  %v1409_v40 = vrot.slane %v1407_v25, 1  ;;  %v5432_v58 = vpack.c.bf16 %v917_v31, %v970_v12  ;;  %v5438_v34 = vsel %vm1286_vm5, %v1290_v30, %v1291_v36  ;;  %v5440_v35 = vpack.c.bf16 %v917_v31, %v916_v28  ;;  %v487_v28 = vld [vmem:[%s5096_s26 + $0x50] sm:$0x1] }
  0x4c   : > { %3974 = vmatmul.mubr.msk.bf16.gmra.mxu0 %vm5196_vm4, %v5397_v3  ;;  %4576 = vmatprep.subr.bf16.mxu0 %v4949_v14  ;;  %v1405_v45 = vor.u32 %v1404_v29, %v1400_v8  ;;  %v743_v54 = vunpack.c.l.bf16 %v482_v21  ;;  %v744_v61 = vunpack.c.h.bf16 %v482_v21  ;;  %v1114_v43 = vshll.u32 %v5435_v48, 16 }
  0x4d   : > { %v1107_v2 = vshrl.u32 %v5432_v58, 16  ;;  %v1109_v1 = vshll.u32 %v5432_v58, 16  ;;  %v745_v4 = vunpack.c.l.bf16 %v484_v38  ;;  %v1296_v8 = vrot.slane %v5292_v51, 1 }
  0x4e   : > { %v5443_v39 = vsel %vm1045_vm2, %v1405_v45, %v1409_v40  ;;  %v804_v6 = vmul.f32 %v5112_v16, %v743_v54  ;;  %v5456_v52 = vsel %vm1286_vm5, %v1293_v41, %v1294_v47  ;;  %v805_v21 = vmul.f32 %v5112_v16, %v744_v61 }
  0x4f   : > { %7034 = vst [vmem:[#allocation9_spill] sm:$0xff] %v5443_v39  ;;  %1763 = vmatprep.mubr.bf16.mxu1 %v5443_v39  ;;  %v1111_v49 = vrot.slane %v1109_v1, 1  ;;  %v1297_v25 = vrot.slane %v5303_v59, 1  ;;  %v1116_v30 = vrot.slane %v1114_v43, 1  ;;  %v806_v14 = vmul.f32 %v5112_v16, %v745_v4  ;;  %v4928_v59 = vld [vmem:[%s7002_s3 + $0x38] sm:$0xff]  }
  0x50   : > { %4010 = vmatmul.mubr.msk.bf16.gmra.mxu1 %vm5196_vm4, %v5425_v57  ;;  %v865_v51 = vadd.f32 %v5118_v20, %v804_v6  ;;  %v1299_v29 = vrot.slane %v5367_v17, 1  ;;  %v866_v33 = vadd.f32 %v5118_v20, %v805_v21  ;;  %v1300_v36 = vrot.slane %v5381_v26, 1  ;;  %v4930_v26 = vld [vmem:[%s7002_s3 + $0x70] sm:$0xff]  }
  0x51   : > { %4728 = vmatprep.mubr.bf16.mxu1 %v5438_v34  ;;  %v1112_v31 = vor.u32 %v1111_v49, %v1107_v2  ;;  %v4279_v38 = vunpack.c.l.bf16 %v4299_v9  ;;  %v867_v40 = vadd.f32 %v5118_v20, %v806_v14  ;;  %v5472_v41 = vsel %vm1286_vm5, %v1296_v8, %v1297_v25  ;;  %v488_v4 = vld [vmem:[%s5096_s26 + $0x54] sm:$0xff]  }
  0x52   : > { %v919_v12 = vmax.f32 %v865_v51, 0.0  ;;  %v4280_v45 = vunpack.c.h.bf16 %v4299_v9  ;;  %v920_v46 = vmax.f32 %v866_v33, 0.0  ;;  %v748_v47 = vunpack.c.l.bf16 %v487_v28  ;;  %v4931_v33 = vld [vmem:[%s7002_s3 + $0x30] sm:$0xff]  }
  0x53   : > { %v5475_v17 = vsel %vm1045_vm2, %v1112_v31, %v1116_v30  ;;  %v807_v54 = vmul.f32 %v4279_v38, %v5112_v16  ;;  %v921_v2 = vmax.f32 %v867_v40, 0.0  ;;  %v1302_v43 = vrot.slane %v5432_v58, 1  ;;  %v490_v30 = vld [vmem:[%s5096_s26 + $0x5c] sm:$0x1]  ;;  %v4932_v40 = vld [vmem:[%s7002_s3 + $0x68] sm:$0xff]  }
  0x54   : > { %1675 = vmatprep.mubr.bf16.mxu0 %v5475_v17  ;;  %v973_v1 = vsel %vm611_vm0, %v919_v12, 0.0  ;;  %v808_v61 = vmul.f32 %v4280_v45, %v5112_v16  ;;  %v5493_v8 = vsel %vm1286_vm5, %v1299_v29, %v1300_v36  ;;  %v809_v9 = vmul.f32 %v5112_v16, %v748_v47 }
  0x55   : > { %3977 = vmatmul.mubr.msk.bf16.gmra.mxu0 %vm5196_vm4, %v5440_v35  ;;  %v5490_v6 = vpack.c.bf16 %v920_v46, %v973_v1  ;;  %v868_v49 = vadd.f32 %v5118_v20, %v807_v54  ;;  %v975_v21 = vsel %vm670_vm1, %v921_v2, 0.0  ;;  %v5499_v25 = vpack.c.bf16 %v920_v46, %v919_v12  ;;  %v4933_v2 = vld [vmem:[%s7002_s3 + $0x28] sm:$0xff]  }
  0x56   : > { %v869_v58 = vadd.f32 %v5118_v20, %v808_v61  ;;  %v1303_v28 = vrot.slane %v5435_v48, 1  ;;  %v5505_v14 = vpack.c.bf16 %v975_v21, %v975_v21  ;;  %v870_v31 = vadd.f32 %v5118_v20, %v809_v9  ;;  %v4300_v21 = vld [vmem:[%s5096_s26 + $0x60] sm:$0xff]  }
  0x57   : > { %v1119_v51 = vshrl.u32 %v5490_v6, 16  ;;  %v1121_v29 = vshll.u32 %v5490_v6, 16  ;;  %v922_v36 = vmax.f32 %v868_v49, 0.0  ;;  %v749_v12 = vunpack.c.l.bf16 %v488_v4 }
  0x58   : > { %4729 = vmatmul.mubr.bf16.vlgmr.msra.gmra.mxu1 %v5456_v52  ;;  %v923_v48 = vmax.f32 %v869_v58, 0.0  ;;  %v5515_v38 = vsel %vm1286_vm5, %v1302_v43, %v1303_v28  ;;  %v1126_v20 = vshll.u32 %v5505_v14, 16  ;;  %v1305_v46 = vrot.slane %v5490_v6, 1  ;;  %v4935_v6 = vld [vmem:[%s7002_s3 + $0x60] sm:$0xff]  }
  0x59   : > { %4441 = vmatpush3.bf16.msra.mxu1 %v4928_v59  ;;  %4732 = vmatprep.mubr.bf16.mxu1 %v5472_v41  ;;  %v1123_v45 = vrot.slane %v1121_v29, 1  ;;  %v924_v59 = vmax.f32 %v870_v31, 0.0  ;;  %v976_v47 = vsel %vm611_vm0, %v922_v36, 0.0  ;;  %v1306_v54 = vrot.slane %v5505_v14, 1  ;;  %v5544_v31 = vld [vmem:[%s7003_s4] ss:$0 sm:$0xff] }
  0x5a   : > { %4442 = vmatprep.subr.bf16.mxu1 %v4930_v26  ;;  %v750_v1 = vunpack.c.h.bf16 %v488_v4  ;;  %v751_v61 = vunpack.c.l.bf16 %v490_v30  ;;  %v1128_v9 = vrot.slane %v1126_v20, 1  ;;  %v1023_v49 = vpack.c.bf16 %v923_v48, %v976_v47  ;;  %v4936_v20 = vld [vmem:[%s7002_s3 + $0x20] sm:$0xff]  }
  0x5b   : > { %v1124_v43 = vor.u32 %v1123_v45, %v1119_v51  ;;  %v978_v26 = vsel %vm670_vm1, %v924_v59, 0.0  ;;  %v5534_v28 = vpack.c.bf16 %v923_v48, %v922_v36  ;;  %v810_v14 = vmul.f32 %v5112_v16, %v749_v12  ;;  %v493_v45 = vld [vmem:[%s5096_s26 + $0x68] sm:$0x1] }
  0x5c   : > { %v1024_v58 = vpack.c.bf16 %v978_v26, %v978_v26  ;;  %v811_v4 = vmul.f32 %v5112_v16, %v750_v1  ;;  %v1131_v51 = vshrl.u32 %v1023_v49, 16  ;;  %v1133_v29 = vshll.u32 %v1023_v49, 16  ;;  %v5552_v16 = vld [vmem:[%s7004_s5] ss:$0 sm:$0xff] }
  0x5d   : > { %4443 = vmatpush3.bf16.msra.mxu1 %v4931_v33  ;;  %v5539_v30 = vsel %vm1045_vm2, %v1124_v43, %v1128_v9  ;;  %v812_v33 = vmul.f32 %v5544_v31, %v751_v61  ;;  %v871_v48 = vadd.f32 %v5552_v16, %v810_v14  ;;  %v1308_v12 = vrot.slane %v1023_v49, 1  ;;  %v494_v14 = vld [vmem:[%s5096_s26 + $0x6c] sm:$0xff]  }
  0x5e   : > { %4444 = vmatprep.subr.bf16.mxu1 %v4932_v40  ;;  %1683 = vmatprep.mubr.bf16.mxu0 %v5539_v30  ;;  %v1138_v36 = vshll.u32 %v1024_v58, 16  ;;  %v872_v40 = vadd.f32 %v5552_v16, %v811_v4  ;;  %v1135_v59 = vrot.slane %v1133_v29, 1  ;;  %v1309_v1 = vrot.slane %v1024_v58, 1  ;;  %v4938_v58 = vld [vmem:[%s7002_s3 + $0x58] sm:$0xff]  }
  0x5f   : > { %3980 = vmatmul.mubr.msk.bf16.gmra.mxu0 %vm5196_vm4, %v5499_v25  ;;  %v873_v47 = vadd.f32 %v5552_v16, %v812_v33  ;;  %v4283_v61 = vunpack.c.l.bf16 %v4300_v21  ;;  %v925_v9 = vmax.f32 %v871_v48, 0.0  ;;  %v4284_v49 = vunpack.c.h.bf16 %v4300_v21 }
  0x60   : > { %4733 = vmatmul.mubr.bf16.gmra.mxu1 %v5493_v8  ;;  %v1140_v43 = vrot.slane %v1138_v36, 1  ;;  %v926_v26 = vmax.f32 %v872_v40, 0.0  ;;  %v1136_v4 = vor.u32 %v1135_v59, %v1131_v51  ;;  %v5567_v57 = vsel %vm1286_vm5, %v1305_v46, %v1306_v54 }
  0x61   : > { %4736 = vmatprep.mubr.bf16.mxu1 %v5515_v38  ;;  %4445 = vmatpush3.bf16.msra.mxu1 %v4933_v2  ;;  %v927_v39 = vmax.f32 %v873_v47, 0.0  ;;  %v754_v29 = vunpack.c.l.bf16 %v493_v45  ;;  %v979_v33 = vsel %vm611_vm0, %v925_v9, 0.0  ;;  %v5575_v2 = vsel %vm1286_vm5, %v1308_v12, %v1309_v1  ;;  %v496_v12 = vld [vmem:[%s5096_s26 + $0x74] sm:$0x1]  ;;  %v4939_v47 = vld [vmem:[%s7002_s3 + $0x18] sm:$0xff]  }
  0x62   : > { %4446 = vmatprep.subr.bf16.mxu1 %v4935_v6  ;;  %v813_v21 = vmul.f32 %v5544_v31, %v4283_v61  ;;  %v814_v51 = vmul.f32 %v5544_v31, %v4284_v49  ;;  %v5580_v46 = vsel %vm1045_vm2, %v1136_v4, %v1140_v43  ;;  %v1025_v6 = vpack.c.bf16 %v926_v26, %v979_v33 }
  0x63   : > { %v981_v54 = vsel %vm670_vm1, %v927_v39, 0.0  ;;  %v815_v45 = vmul.f32 %v5544_v31, %v754_v29  ;;  %1691 = vmatprep.mubr.bf16.mxu0 %v5580_v46  ;;  %v755_v59 = vunpack.c.l.bf16 %v494_v14  ;;  %v1414_v15 = vrot.slane %v5395_v62, 1 }
  0x64   : > { %v1026_v36 = vpack.c.bf16 %v981_v54, %v981_v54  ;;  %v5587_v48 = vadd.f32 %v5552_v16, %v813_v21  ;;  %v5590_v40 = vadd.f32 %v5552_v16, %v814_v51  ;;  %v1143_v39 = vshrl.u32 %v1025_v6, 16 }
  0x65   : > { %4447 = vmatpush3.bf16.msra.mxu1 %v4936_v20  ;;  %v1145_v1 = vshll.u32 %v1025_v6, 16  ;;  %v1311_v61 = vrot.slane %v1025_v6, 1  ;;  %v876_v43 = vadd.f32 %v5552_v16, %v815_v45  ;;  %v4940_v20 = vld [vmem:[%s7002_s3 + $0x50] sm:$0xff]   ;;  %v756_v54 = vunpack.c.h.bf16 %v494_v14  ;;  %v4301_v6 = vld [vmem:[%s5096_s26 + $0x78] sm:$0xff]  }
  0x66   : > { %4448 = vmatprep.subr.bf16.mxu1 %v4938_v58  ;;  %v1150_v49 = vshll.u32 %v1026_v36, 16  ;;  %v1312_v4 = vrot.slane %v1026_v36, 1  ;;  %v928_v29 = vmax.f32 %v5587_v48, 0.0  ;;  %v929_v33 = vmax.f32 %v5590_v40, 0.0 }
  0x67   : > { %3983 = vmatmul.mubr.msk.bf16.gmra.mxu0 %vm5196_vm4, %v5534_v28  ;;  %v1147_v21 = vrot.slane %v1145_v1, 1  ;;  %v930_v51 = vmax.f32 %v876_v43, 0.0  ;;  %v757_v58 = vunpack.c.l.bf16 %v496_v12  ;;  %v5608_v36 = vpack.c.bf16 %v926_v26, %v925_v9  ;;  %v4941_v1 = vld [vmem:[%s7002_s3 + $0x10] sm:$0xff]   ;;  %v4943_v9 = vld [vmem:[%s7002_s3 + $0x48] sm:$0xff]  }
  0x68   : > { %4737 = vmatmul.mubr.bf16.gmra.mxu1 %v5567_v57  ;;  %v1152_v45 = vrot.slane %v1150_v49, 1  ;;  %v5611_v48 = vsel %vm1286_vm5, %v1311_v61, %v1312_v4  ;;  %v982_v40 = vsel %vm611_vm0, %v928_v29, 0.0  ;;  %v816_v49 = vmul.f32 %v5544_v31, %v755_v59 }
  0x69   : > { %4740 = vmatprep.mubr.bf16.mxu1 %v5575_v2  ;;  %4449 = vmatpush3.bf16.msra.mxu1 %v4939_v47  ;;  %v1148_v14 = vor.u32 %v1147_v21, %v1143_v39  ;;  %v984_v12 = vsel %vm670_vm1, %v930_v51, 0.0  ;;  %v1027_v43 = vpack.c.bf16 %v929_v33, %v982_v40  ;;  %v817_v61 = vmul.f32 %v5544_v31, %v756_v54 }
  0x6a   : > { %4450 = vmatprep.subr.bf16.mxu1 %v4940_v20  ;;  %v1028_v26 = vpack.c.bf16 %v984_v12, %v984_v12  ;;  %v818_v47 = vmul.f32 %v5544_v31, %v757_v58  ;;  %v4287_v4 = vunpack.c.l.bf16 %v4301_v6  ;;  %v5632_v13 = vadd.f32 %v5552_v16, %v816_v49  ;;  %v4944_v58 = vld [vmem:[%s7002_s3 + $0x8] sm:$0xff]   ;;  %v4946_v49 = vld [vmem:[%s7002_s3 + $0x40] sm:$0xff]  }
  0x6b   : > { %v5628_v39 = vsel %vm1045_vm2, %v1148_v14, %v1152_v45  ;;  %v1155_v21 = vshrl.u32 %v1027_v43, 16  ;;  %v1157_v51 = vshll.u32 %v1027_v43, 16  ;;  %v1314_v40 = vrot.slane %v1027_v43, 1 }
  0x6c   : > { %1699 = vmatprep.mubr.bf16.mxu0 %v5628_v39  ;;  %v1162_v59 = vshll.u32 %v1028_v26, 16  ;;  %v1315_v20 = vrot.slane %v1028_v26, 1  ;;  %v5635_v54 = vadd.f32 %v5552_v16, %v817_v61  ;;  %v879_v14 = vadd.f32 %v5552_v16, %v818_v47 }
  0x6d   : > { %4451 = vmatpush3.bf16.msra.mxu1 %v4941_v1  ;;  %v1159_v45 = vrot.slane %v1157_v51, 1  ;;  %v4288_v12 = vunpack.c.h.bf16 %v4301_v6  ;;  %v760_v43 = vunpack.c.l.bf16 %v499_v19  ;;  %v7018_v1 = vmax.f32 %v5632_v13, 0.0 }
  0x6e   : > { %4452 = vmatprep.subr.bf16.mxu1 %v4943_v9  ;;  %v1164_v26 = vrot.slane %v1162_v59, 1  ;;  %v5646_v61 = vsel %vm1286_vm5, %v1314_v40, %v1315_v20  ;;  %v7017_v55 = vmax.f32 %v5635_v54, 0.0  ;;  %v933_v6 = vmax.f32 %v879_v14, 0.0 }
  0x6f   : > { %3986 = vmatmul.mubr.msk.bf16.gmra.mxu0 %vm5196_vm4, %v5608_v36  ;;  %v1160_v19 = vor.u32 %v1159_v45, %v1155_v21  ;;  %v819_v9 = vmul.f32 %v5544_v31, %v4287_v4  ;;  %v820_v47 = vmul.f32 %v5544_v31, %v4288_v12  ;;  %v5657_v51 = vpack.c.bf16 %v929_v33, %v928_v29  ;;  %v4947_v4 = vld [vmem:[%s7002_s3] sm:$0xff]  }
  0x70   : > { %4741 = vmatmul.mubr.bf16.gmra.mxu1 %v5611_v48  ;;  %v985_v40 = vsel %vm611_vm0, %v7018_v1, 0.0  ;;  %v821_v59 = vmul.f32 %v5544_v31, %v760_v43  ;;  %v761_v20 = vunpack.c.l.bf16 %v500_v11  ;;  %v987_v29 = vsel %vm670_vm1, %v933_v6, 0.0 }
  0x71   : > { %4744 = vmatprep.mubr.bf16.mxu1 %v5646_v61  ;;  %4453 = vmatpush3.bf16.msra.mxu1 %v4944_v58  ;;  %v5668_v21 = vsel %vm1045_vm2, %v1160_v19, %v1164_v26  ;;  %v1029_v33 = vpack.c.bf16 %v7017_v55, %v985_v40  ;;  %v5675_v45 = vadd.f32 %v5552_v16, %v819_v9  ;;  %v5680_v58 = vld [vmem:[%s7002_s3 + $0x238] sm:$0xff]   ;;  %v502_v26 = vld [vmem:[%s5096_s26 + $0x8c] sm:$0x1]  ;;  %v762_v19 = vunpack.c.h.bf16 %v500_v11 }
  0x72   : > { %7035 = vst [vmem:[#allocation10_spill] sm:$0xff] %v5668_v21  ;;  %4454 = vmatprep.subr.bf16.mxu1 %v4946_v49  ;;  %1707 = vmatprep.mubr.bf16.mxu0 %v5668_v21  ;;  %v1030_v14 = vpack.c.bf16 %v987_v29, %v987_v29  ;;  %v5684_v12 = vadd.f32 %v5552_v16, %v820_v47  ;;  %v763_v29 = vunpack.c.l.bf16 %v502_v26 }
  0x73   : > { %v882_v43 = vadd.f32 %v5552_v16, %v821_v59  ;;  %v1317_v6 = vrot.slane %v1029_v33, 1  ;;  %v1167_v40 = vshrl.u32 %v1029_v33, 16  ;;  %v1169_v9 = vshll.u32 %v1029_v33, 16 }
  0x74   : > { %v934_v49 = vmax.f32 %v5675_v45, 0.0  ;;  %v1318_v55 = vrot.slane %v1030_v14, 1  ;;  %v1174_v1 = vshll.u32 %v1030_v14, 16  ;;  %v935_v60 = vmax.f32 %v5684_v12, 0.0 }
  0x75   : > { %v936_v42 = vmax.f32 %v882_v43, 0.0  ;;  %4455 = vmatpush3.bf16.msra.mxu1 %v4947_v4  ;;  %v1171_v21 = vrot.slane %v1169_v9, 1  ;;  %v822_v59 = vmul.f32 %v5544_v31, %v761_v20  ;;  %v823_v20 = vmul.f32 %v5544_v31, %v762_v19 }
  0x76   : > { %v988_v47 = vsel %vm611_vm0, %v934_v49, 0.0  ;;  %4808 = vmatprep.subr.bf16.mxu1 %v5680_v58  ;;  %v5695_v11 = vsel %vm1286_vm5, %v1317_v6, %v1318_v55  ;;  %v1176_v33 = vrot.slane %v1174_v1, 1  ;;  %v824_v26 = vmul.f32 %v5544_v31, %v763_v29 }
  0x77   : > { %v990_v45 = vsel %vm670_vm1, %v936_v42, 0.0  ;;  %v1031_v14 = vpack.c.bf16 %v935_v60, %v988_v47  ;;  %3989 = vmatmul.mubr.msk.bf16.gmra.mxu0 %vm5196_vm4, %v5657_v51  ;;  %v1172_v4 = vor.u32 %v1171_v21, %v1167_v40  ;;  %v883_v55 = vadd.f32 %v5552_v16, %v822_v59 }
  0x78   : > { %4745 = vmatmul.mubr.bf16.gmra.mxu1 %v5695_v11  ;;  %v1032_v12 = vpack.c.bf16 %v990_v45, %v990_v45  ;;  %v884_v9 = vadd.f32 %v5552_v16, %v823_v20  ;;  %v885_v21 = vadd.f32 %v5552_v16, %v824_v26  ;;  %v7036_v31 = vmax.f32 %v5632_v13, 0.0 }
  0x79   : > { %v1320_v43 = vrot.slane %v1031_v14, 1  ;;  %v1179_v1 = vshrl.u32 %v1031_v14, 16  ;;  %v5707_v6 = vsel %vm1045_vm2, %v1172_v4, %v1176_v33  ;;  %v1181_v47 = vshll.u32 %v1031_v14, 16 }
  0x7a   : > { %v1321_v42 = vrot.slane %v1032_v12, 1  ;;  %1715 = vmatprep.mubr.bf16.mxu0 %v5707_v6  ;;  %v937_v40 = vmax.f32 %v883_v55, 0.0  ;;  %v1186_v45 = vshll.u32 %v1032_v12, 16  ;;  %v7037_v29 = vmax.f32 %v5635_v54, 0.0 }
  0x7b   : > { %v938_v33 = vmax.f32 %v884_v9, 0.0  ;;  %v1183_v4 = vrot.slane %v1181_v47, 1  ;;  %v939_v14 = vmax.f32 %v885_v21, 0.0  ;;  %v1326_v13 = vrot.slane %v5169_v63, 1 }
  0x7c   : > { %v5713_v19 = vsel %vm1286_vm5, %v1320_v43, %v1321_v42  ;;  %v5719_v59 = vpack.c.bf16 %v7037_v29, %v7036_v31  ;;  %v991_v20 = vsel %vm611_vm0, %v937_v40, 0.0  ;;  %v1188_v16 = vrot.slane %v1186_v45, 1 }
  0x7d   : > { %4748 = vmatprep.mubr.bf16.mxu1 %v5713_v19  ;;  %v1033_v26 = vpack.c.bf16 %v938_v33, %v991_v20  ;;  %v1184_v12 = vor.u32 %v1183_v4, %v1179_v1  ;;  %v993_v43 = vsel %vm670_vm1, %v939_v14, 0.0  ;;  %v1327_v54 = vrot.slane %v5184_v7, 1 }
  0x7e   : > { %v1034_v55 = vpack.c.bf16 %v993_v43, %v993_v43  ;;  %v1415_v63 = vrot.slane %v5403_v5, 1  ;;  %v5743_v29 = vpack.c.bf16 %v935_v60, %v934_v49  ;;  %v1329_v5 = vrot.slane %v5253_v0, 1 }
  0x7f   : > { %3992 = vmatmul.mubr.msk.bf16.gmra.mxu0 %vm5196_vm4, %v5719_v59  ;;  %v1323_v42 = vrot.slane %v1033_v26, 1  ;;  %v5732_v9 = vsel %vm1045_vm2, %v1184_v12, %v1188_v16  ;;  %v1191_v10 = vshrl.u32 %v1033_v26, 16  ;;  %v1193_v1 = vshll.u32 %v1033_v26, 16 }
  0x80   : > { %1723 = vmatprep.mubr.bf16.mxu0 %v5732_v9  ;;  %v1324_v47 = vrot.slane %v1034_v55, 1  ;;  %v1198_v21 = vshll.u32 %v1034_v55, 16  ;;  %v5738_v7 = vsel %vm1286_vm5, %v1326_v13, %v1327_v54  ;;  %v5746_v14 = vsel %vm1286_vm5, %v1414_v15, %v1415_v63  ;;  %v4952_v13 = vld [vmem:[%s7002_s3 + $0x1b0] sm:$0xff]   ;;  %v4954_v55 = vld [vmem:[%s7002_s3 + $0x1e8] sm:$0xff]   ;;  %v4960_v15 = vld [vmem:[%s7002_s3 + $0x198] sm:$0xff]  }
  0x81   : > { %v1195_v45 = vrot.slane %v1193_v1, 1  ;;  %v1330_v20 = vrot.slane %v5269_v23, 1  ;;  %v1332_v26 = vrot.slane %v5322_v18, 1  ;;  %v1333_v60 = vrot.slane %v5334_v32, 1  ;;  %v4953_v54 = vld [vmem:[%s7002_s3 + $0x230] sm:$0xff]   ;;  %v4963_v1 = vld [vmem:[%s7002_s3 + $0x220] sm:$0xff]  }
  0x82   : > { %v5741_v31 = vsel %vm1286_vm5, %v1323_v42, %v1324_v47  ;;  %v1200_v4 = vrot.slane %v1198_v21, 1  ;;  %v5767_v23 = vpack.c.bf16 %v938_v33, %v937_v40  ;;  %v4999_v12 = vmov 0.0|0.0   ;;  %v4950_v40 = vld [vmem:[%s7002_s3 + $0x1b8] sm:$0xff]   ;;  %v4951_v33 = vld [vmem:[%s7002_s3 + $0x1f0] sm:$0xff]   ;;  %v4956_v42 = vld [vmem:[%s7002_s3 + $0x1e0] sm:$0xff]  }
  0x83   : > { %4749 = vmatmul.mubr.bf16.gmra.mxu1 %v5741_v31  ;;  %v1196_v62 = vor.u32 %v1195_v45, %v1191_v10  ;;  %v5762_v49 = vsel %vm1286_vm5, %v1329_v5, %v1330_v20  ;;  %v5765_v0 = vsel %vm1286_vm5, %v1332_v26, %v1333_v60  ;;  %v5771_v18 = vrot.slane %v4999_v12, 1  ;;  %v4958_v10 = vld [vmem:[%s7002_s3 + $0x228] sm:$0xff]   ;;  %v4961_v47 = vld [vmem:[%s7002_s3 + $0x1d0] sm:$0xff]   ;;  %v4967_v20 = vld [vmem:[%s7002_s3 + $0x180] sm:$0xff]  }
  0x84   : > { %4752 = vmatprep.mubr.bf16.mxu1 %v5738_v7  ;;  %v5000_v32 = vmov 0   ;;  %v4962_v21 = vld [vmem:[%s7002_s3 + $0x190] sm:$0xff]   ;;  %v4964_v63 = vld [vmem:[%s7002_s3 + $0x1c8] sm:$0xff]   ;;  %v4971_v26 = vld [vmem:[%s7002_s3 + $0x200] sm:$0xff]  }
  0x85   : > { %v5753_v16 = vsel %vm1045_vm2, %v1196_v62, %v1200_v4  ;;  %v5778_v43 = vrot.slane %v5000_v32, 1  ;;  %v4969_v45 = vld [vmem:[%s7002_s3 + $0x210] sm:$0xff]   ;;  %v4965_v4 = vld [vmem:[%s7002_s3 + $0x188] sm:$0xff]   ;;  %v4966_v62 = vld [vmem:[%s7002_s3 + $0x1c0] sm:$0xff]  }
  0x86   : > { %v4970_v5 = vld [vmem:[%s7002_s3 + $0x208] sm:$0xff]   ;;  %v7038_v60 = vld [vmem:[#allocation10_spill] sm:$0xff] }
  0x87   : > { %3995 = vmatmul.mubr.msk.bf16.gmra.mxu0 %vm5196_vm4, %v5743_v29 }
  0x88   : > { %1731 = vmatprep.mubr.bf16.mxu0 %v5753_v16 }
  0x8b   : > { %4753 = vmatmul.mubr.bf16.gmra.mxu1 %v5762_v49 }
  0x8c   : > { %4756 = vmatprep.mubr.bf16.mxu1 %v5765_v0 }
  0x8f   : > { %3998 = vmatmul.mubr.msk.bf16.gmra.mxu0 %vm5196_vm4, %v5767_v23 }
  0x90   : > { %4776 = vmatprep.mubr.bf16.mxu0 %v5771_v18 }
  0x93   : > { %4757 = vmatmul.mubr.bf16.gmra.mxu1 %v5746_v14 }
  0x94   : > { %2109 = vmatprep.mubr.bf16.mxu1 %v5778_v43 }
  0x97   : > { %4777 = vmatmul.mubr.bf16.vlgmr.msra.gmra.mxu0 %v5438_v34  ;;  %v4955_v34 = vld [vmem:[%s7002_s3 + $0x1a8] sm:$0xff]  }
  0x98   : > { %4577 = vmatpush3.bf16.msra.mxu0 %v4950_v40  ;;  %4780 = vmatprep.mubr.bf16.mxu0 %v5456_v52 }
  0x99   : > { %4578 = vmatprep.subr.bf16.mxu0 %v4951_v33 }
  0x9b   : > { %2110 = vmatmul.mubr.bf16.vlgmr.msra.gmra.mxu1 %v4999_v12 }
  0x9c   : > { %4579 = vmatpush3.bf16.msra.mxu0 %v4952_v13  ;;  %4809 = vmatpush3.bf16.msra.mxu1 %v5680_v58  ;;  %v4957_v58 = vld [vmem:[%s7002_s3 + $0x1a0] sm:$0xff]  }
  0x9d   : > { %2117 = vmatprep.mubr.bf16.mxu1 %v5211_v37  ;;  %4810 = vmatprep.subr.bf16.mxu1 %v4953_v54  ;;  %v4959_v37 = vld [vmem:[%s7002_s3 + $0x1d8] sm:$0xff]  }
  0x9e   : > { %4580 = vmatprep.subr.bf16.mxu0 %v4954_v55 }
  0x9f   : > { %4781 = vmatmul.mubr.bf16.gmra.mxu0 %v5472_v41 }
  0xa0   : > { %4784 = vmatprep.mubr.bf16.mxu0 %v5493_v8  ;;  %4581 = vmatpush3.bf16.msra.mxu0 %v4955_v34 }
  0xa1   : > { %4811 = vmatpush3.bf16.msra.mxu1 %v4953_v54  ;;  %4582 = vmatprep.subr.bf16.mxu0 %v4956_v42 }
  0xa2   : > { %4812 = vmatprep.subr.bf16.mxu1 %v4958_v10 }
  0xa3   : > { %4037 = vmatmul.mubr.msk.bf16.gmra.mxu1 %vm5196_vm4, %v5154_v56  ;;  %v4968_v56 = vld [vmem:[%s7002_s3 + $0x218] sm:$0xff]  }
  0xa4   : > { %4583 = vmatpush3.bf16.msra.mxu0 %v4957_v58  ;;  %2125 = vmatprep.mubr.bf16.mxu1 %v5267_v22 }
  0xa5   : > { %4584 = vmatprep.subr.bf16.mxu0 %v4959_v37  ;;  %4813 = vmatpush3.bf16.msra.mxu1 %v4958_v10 }
  0xa6   : > { %4814 = vmatprep.subr.bf16.mxu1 %v4963_v1 }
  0xa7   : > { %4785 = vmatmul.mubr.bf16.gmra.mxu0 %v5515_v38 }
  0xa8   : > { %4788 = vmatprep.mubr.bf16.mxu0 %v5567_v57  ;;  %4585 = vmatpush3.bf16.msra.mxu0 %v4960_v15 }
  0xa9   : > { %4586 = vmatprep.subr.bf16.mxu0 %v4961_v47  ;;  %4815 = vmatpush3.bf16.msra.mxu1 %v4963_v1  ;;  %v7039_v47 = vld [vmem:[#allocation3_spill] sm:$0xff] }
  0xaa   : > { %4816 = vmatprep.subr.bf16.mxu1 %v4968_v56 }
  0xab   : > { %4040 = vmatmul.mubr.msk.bf16.gmra.mxu1 %vm5196_vm4, %v5235_v50 }
  0xac   : > { %4587 = vmatpush3.bf16.msra.mxu0 %v4962_v21  ;;  %2133 = vmatprep.mubr.bf16.mxu1 %v5343_v44 }
  0xad   : > { %4588 = vmatprep.subr.bf16.mxu0 %v4964_v63  ;;  %4817 = vmatpush3.bf16.msra.mxu1 %v4968_v56 }
  0xae   : > { %4818 = vmatprep.subr.bf16.mxu1 %v4969_v45 }
  0xaf   : > { %4789 = vmatmul.mubr.bf16.gmra.mxu0 %v5575_v2 }
  0xb0   : > { %4792 = vmatprep.mubr.bf16.mxu0 %v5611_v48  ;;  %4589 = vmatpush3.bf16.msra.mxu0 %v4965_v4 }
  0xb1   : > { %4590 = vmatprep.subr.bf16.mxu0 %v4966_v62  ;;  %4819 = vmatpush3.bf16.msra.mxu1 %v4969_v45  ;;  %v7040_v62 = vld [vmem:[#allocation2_spill] sm:$0xff] }
  0xb2   : > { %4820 = vmatprep.subr.bf16.mxu1 %v4970_v5 }
  0xb3   : > { %4043 = vmatmul.mubr.msk.bf16.gmra.mxu1 %vm5196_vm4, %v5295_v53 }
  0xb4   : > { %4591 = vmatpush3.bf16.msra.mxu0 %v4967_v20  ;;  %2141 = vmatprep.mubr.bf16.mxu1 %v5412_v24 }
  0xb5   : > { %4821 = vmatpush3.bf16.msra.mxu1 %v4970_v5 }
  0xb6   : > { %4822 = vmatprep.subr.bf16.mxu1 %v4971_v26 }
  0xb7   : > { %4793 = vmatmul.mubr.bf16.gmra.mxu0 %v5646_v61 }
  0xb8   : > { %4796 = vmatprep.mubr.bf16.mxu0 %v5695_v11 }
  0xb9   : > { %4823 = vmatpush3.bf16.msra.mxu1 %v4971_v26  ;;  %v7041_v26 = vld [vmem:[#allocation5_spill] sm:$0xff] }
  0xbb   : > { %4046 = vmatmul.mubr.msk.bf16.gmra.mxu1 %vm5196_vm4, %v5397_v3 }
  0xbc   : > { %2149 = vmatprep.mubr.bf16.mxu1 %v5475_v17 }
  0xbf   : > { %4797 = vmatmul.mubr.bf16.gmra.mxu0 %v5713_v19 }
  0xc0   : > { %4800 = vmatprep.mubr.bf16.mxu0 %v5741_v31 }
  0xc3   : > { %4049 = vmatmul.mubr.msk.bf16.gmra.mxu1 %vm5196_vm4, %v5440_v35 }
  0xc4   : > { %2157 = vmatprep.mubr.bf16.mxu1 %v5539_v30 }
  0xc7   : > { %4801 = vmatmul.mubr.bf16.gmra.mxu0 %v5738_v7 }
  0xc8   : > { %4804 = vmatprep.mubr.bf16.mxu0 %v5762_v49 }
  0xcb   : > { %4052 = vmatmul.mubr.msk.bf16.gmra.mxu1 %vm5196_vm4, %v5499_v25 }
  0xcc   : > { %2165 = vmatprep.mubr.bf16.mxu1 %v5580_v46 }
  0xcf   : > { %4805 = vmatmul.mubr.bf16.gmra.mxu0 %v5765_v0 }
  0xd0   : > { %2643 = vmatprep.mubr.bf16.mxu0 %v5267_v22 }
  0xd3   : > { %4055 = vmatmul.mubr.msk.bf16.gmra.mxu1 %vm5196_vm4, %v5534_v28 }
  0xd4   : > { %2173 = vmatprep.mubr.bf16.mxu1 %v5628_v39 }
  0xd7   : > { %4154 = vmatmul.mubr.msk.bf16.vlgmr.msra.gmra.mxu0 %vm5196_vm4, %v5235_v50 }
  0xd8   : > { %2651 = vmatprep.mubr.bf16.mxu0 %v5343_v44 }
  0xdb   : > { %4058 = vmatmul.mubr.msk.bf16.gmra.mxu1 %vm5196_vm4, %v5608_v36 }
  0xdc   : > { %2181 = vmatprep.mubr.bf16.mxu1 %v7038_v60 }
  0xdf   : > { %4157 = vmatmul.mubr.msk.bf16.gmra.mxu0 %vm5196_vm4, %v5295_v53 }
  0xe0   : > { %2659 = vmatprep.mubr.bf16.mxu0 %v5412_v24 }
  0xe3   : > { %4061 = vmatmul.mubr.msk.bf16.gmra.mxu1 %vm5196_vm4, %v5657_v51 }
  0xe4   : > { %2189 = vmatprep.mubr.bf16.mxu1 %v5707_v6 }
  0xe7   : > { %4160 = vmatmul.mubr.msk.bf16.gmra.mxu0 %vm5196_vm4, %v5397_v3 }
  0xe8   : > { %2667 = vmatprep.mubr.bf16.mxu0 %v5475_v17 }
  0xeb   : > { %4064 = vmatmul.mubr.msk.bf16.gmra.mxu1 %vm5196_vm4, %v5719_v59 }
  0xec   : > { %2197 = vmatprep.mubr.bf16.mxu1 %v5732_v9 }
  0xed   : > { %v4320_v50 = vpop.f32.mrf.mxu0  ;;  %v4392_v22 = vpop.f32.mrf.mxu1 }
  0xef   : > { %v4321_v44 = vpop.f32.mrf.mxu0  ;;  %v4393_v24 = vpop.f32.mrf.mxu1  ;;  %4163 = vmatmul.mubr.msk.bf16.gmra.mxu0 %vm5196_vm4, %v5440_v35 }
  0xf0   : > { %v5918_v53 = vadd.f32 %v4321_v44, %v4320_v50  ;;  %v5921_v32 = vadd.f32 %v4393_v24, %v4392_v22  ;;  %2675 = vmatprep.mubr.bf16.mxu0 %v5539_v30 }
  0xf1   : > { %v4323_v40 = vpop.f32.mrf.mxu0  ;;  %v4395_v33 = vpop.f32.mrf.mxu1 }
  0xf3   : > { %v4324_v3 = vpop.f32.mrf.mxu0  ;;  %v4396_v13 = vpop.f32.mrf.mxu1  ;;  %4067 = vmatmul.mubr.msk.bf16.gmra.mxu1 %vm5196_vm4, %v5743_v29 }
  0xf4   : > { %v5927_v17 = vadd.f32 %v4324_v3, %v4323_v40  ;;  %v5929_v54 = vadd.f32 %v4396_v13, %v4395_v33  ;;  %2205 = vmatprep.mubr.bf16.mxu1 %v5753_v16  ;;  %v7042_v40 = vld [vmem:[#allocation4_spill] sm:$0xff]  ;;  %v7043_v3 = vld [vmem:[#allocation7_spill] sm:$0xff] }
  0xf5   : > { %v4326_v55 = vpop.f32.mrf.mxu0 }
  0xf7   : > { %v4327_v34 = vpop.f32.mrf.mxu0  ;;  %4166 = vmatmul.mubr.msk.bf16.gmra.mxu0 %vm5196_vm4, %v5499_v25 }
  0xf8   : > { %v4328_v42 = vadd.f32 %v4327_v34, %v4326_v55  ;;  %2683 = vmatprep.mubr.bf16.mxu0 %v5580_v46 }
  0xf9   : > { %v4329_v10 = vpop.f32.mrf.mxu0  ;;  %v4398_v35 = vpop.f32.mrf.mxu1 }
  0xfb   : > { %v4330_v30 = vpop.f32.mrf.mxu0  ;;  %v4399_v37 = vpop.f32.mrf.mxu1  ;;  %4070 = vmatmul.mubr.msk.bf16.gmra.mxu1 %vm5196_vm4, %v5767_v23 }
  0xfc   : > { %v4331_v58 = vadd.f32 %v4330_v30, %v4329_v10  ;;  %v5939_v1 = vadd.f32 %v4399_v37, %v4398_v35  ;;  %2213 = vmatprep.mubr.bf16.mxu1 %v7039_v47  ;;  %v7044_v37 = vld [vmem:[#allocation6_spill] sm:$0xff] }
  0xfd   : > { %v4401_v15 = vpop.f32.mrf.mxu1 }
  0xff   : > { %v4402_v56 = vpop.f32.mrf.mxu1  ;;  %4169 = vmatmul.mubr.msk.bf16.gmra.mxu0 %vm5196_vm4, %v5534_v28 }
 0x100   : > { %v5945_v21 = vadd.f32 %v4402_v56, %v4401_v15  ;;  %v4332_v63 = vpop.f32.mrf.mxu0  ;;  %2691 = vmatprep.mubr.bf16.mxu0 %v5628_v39 }
 0x101   : > { %v4404_v45 = vpop.f32.mrf.mxu1 }
 0x102   : > { %v4333_v25 = vpop.f32.mrf.mxu0 }
 0x103   : > { %v4334_v46 = vadd.f32 %v4333_v25, %v4332_v63  ;;  %4073 = vmatmul.mubr.msk.bf16.gmra.mxu1 %vm5196_vm4, %v7040_v62  ;;  %v4405_v5 = vpop.f32.mrf.mxu1 }
 0x104   : > { %v4335_v4 = vpop.f32.mrf.mxu0  ;;  %2221 = vmatprep.mubr.bf16.mxu1 %v7041_v26  ;;  %v5955_v50 = vadd.f32 %v4405_v5, %v4404_v45 }
 0x105   : > { %v4407_v44 = vpop.f32.mrf.mxu1 }
 0x106   : > { %v4336_v20 = vpop.f32.mrf.mxu0 }
 0x107   : > { %v4337_v22 = vadd.f32 %v4336_v20, %v4335_v4  ;;  %4172 = vmatmul.mubr.msk.bf16.gmra.mxu0 %vm5196_vm4, %v5608_v36  ;;  %v4408_v28 = vpop.f32.mrf.mxu1 }
 0x108   : > { %2699 = vmatprep.mubr.bf16.mxu0 %v7038_v60  ;;  %v5961_v39 = vadd.f32 %v4408_v28, %v4407_v44 }
 0x10b   : > { %4076 = vmatmul.mubr.msk.bf16.gmra.mxu1 %vm5196_vm4, %v7042_v40 }
 0x10c   : > { %v4338_v24 = vpop.f32.mrf.mxu0  ;;  %2229 = vmatprep.mubr.bf16.mxu1 %v7043_v3 }
 0x10e   : > { %v4339_v33 = vpop.f32.mrf.mxu0 }
 0x10f   : > { %v4340_v13 = vadd.f32 %v4339_v33, %v4338_v24  ;;  %4175 = vmatmul.mubr.msk.bf16.gmra.mxu0 %vm5196_vm4, %v5657_v51 }
 0x110   : > { %v4341_v55 = vpop.f32.mrf.mxu0  ;;  %v4410_v34 = vpop.f32.mrf.mxu1  ;;  %2707 = vmatprep.mubr.bf16.mxu0 %v5707_v6 }
 0x112   : > { %v4342_v36 = vpop.f32.mrf.mxu0  ;;  %v4411_v60 = vpop.f32.mrf.mxu1 }
 0x113   : > { %v4343_v10 = vadd.f32 %v4342_v36, %v4341_v55  ;;  %v5971_v35 = vadd.f32 %v4411_v60, %v4410_v34  ;;  %4079 = vmatmul.mubr.msk.bf16.gmra.mxu1 %vm5196_vm4, %v7044_v37 }
 0x114   : > { %v4413_v30 = vpop.f32.mrf.mxu1  ;;  %4824 = vmatprep.mubr.bf16.mxu1 %v5456_v52 }
 0x115   : > { %v4344_v56 = vpop.f32.mrf.mxu0 }
 0x116   : > { %v4414_v15 = vpop.f32.mrf.mxu1 }
 0x117   : > { %v5977_v63 = vadd.f32 %v4414_v15, %v4413_v30  ;;  %4178 = vmatmul.mubr.msk.bf16.gmra.mxu0 %vm5196_vm4, %v5719_v59  ;;  %v4345_v51 = vpop.f32.mrf.mxu0 }
 0x118   : > { %v4730_v25 = vpop.f32.mrf.mxu1  ;;  %v4346_v45 = vadd.f32 %v4345_v51, %v4344_v56  ;;  %2715 = vmatprep.mubr.bf16.mxu0 %v5732_v9 }
 0x119   : > { %v5982_v6 = vadd.f32 %v4730_v25, %v4328_v42  ;;  %v4347_v5 = vpop.f32.mrf.mxu0 }
 0x11a   : > { %v1806_v4 = vpop.f32.mrf.mxu1 }
 0x11b   : > { %v5986_v20 = vadd.f32 %v5918_v53, %v1806_v4  ;;  %v4348_v44 = vpop.f32.mrf.mxu0  ;;  %4825 = vmatmul.mubr.bf16.vlgmr.msra.gmra.mxu1 %v5472_v41 }
 0x11c   : > { %v4731_v52 = vpop.f32.mrf.mxu1  ;;  %v4349_v24 = vadd.f32 %v4348_v44, %v4347_v5  ;;  %4828 = vmatprep.mubr.bf16.mxu1 %v5493_v8 }
 0x11d   : > { %v5989_v28 = vadd.f32 %v4731_v52, %v4331_v58 }
 0x11e   : > { %v1809_v33 = vpop.f32.mrf.mxu1 }
 0x11f   : > { %v5993_v59 = vadd.f32 %v5927_v17, %v1809_v33  ;;  %v4350_v42 = vpop.f32.mrf.mxu0  ;;  %4181 = vmatmul.mubr.msk.bf16.gmra.mxu0 %vm5196_vm4, %v5743_v29 }
 0x120   : > { %v4734_v9 = vpop.f32.mrf.mxu1  ;;  %2723 = vmatprep.mubr.bf16.mxu0 %v5753_v16 }
 0x121   : > { %v5998_v53 = vadd.f32 %v4734_v9, %v4340_v13  ;;  %v4351_v41 = vpop.f32.mrf.mxu0 }
 0x122   : > { %v1822_v58 = vpop.f32.mrf.mxu1  ;;  %v4352_v55 = vadd.f32 %v4351_v41, %v4350_v42 }
 0x123   : > { %v6001_v34 = vadd.f32 %v4334_v46, %v1822_v58  ;;  %v4353_v36 = vpop.f32.mrf.mxu0  ;;  %4829 = vmatmul.mubr.bf16.gmra.mxu1 %v5515_v38 }
 0x124   : > { %v4735_v8 = vpop.f32.mrf.mxu1  ;;  %4832 = vmatprep.mubr.bf16.mxu1 %v5567_v57 }
 0x125   : > { %v6004_v17 = vadd.f32 %v4735_v8, %v4343_v10  ;;  %v4354_v60 = vpop.f32.mrf.mxu0 }
 0x126   : > { %v1825_v30 = vpop.f32.mrf.mxu1  ;;  %v4355_v29 = vadd.f32 %v4354_v60, %v4353_v36 }
 0x127   : > { %v6007_v13 = vadd.f32 %v4337_v22, %v1825_v30  ;;  %v4356_v15 = vpop.f32.mrf.mxu0  ;;  %4184 = vmatmul.mubr.msk.bf16.gmra.mxu0 %vm5196_vm4, %v5767_v23 }
 0x128   : > { %v4738_v16 = vpop.f32.mrf.mxu1  ;;  %2731 = vmatprep.mubr.bf16.mxu0 %v7039_v47 }
 0x129   : > { %v6012_v46 = vadd.f32 %v4738_v16, %v4352_v55  ;;  %v4357_v38 = vpop.f32.mrf.mxu0 }
 0x12a   : > { %v1838_v10 = vpop.f32.mrf.mxu1  ;;  %v4358_v56 = vadd.f32 %v4357_v38, %v4356_v15 }
 0x12b   : > { %v6015_v25 = vadd.f32 %v4346_v45, %v1838_v10  ;;  %v4359_v51 = vpop.f32.mrf.mxu0  ;;  %4833 = vmatmul.mubr.bf16.gmra.mxu1 %v5575_v2 }
 0x12c   : > { %v4739_v57 = vpop.f32.mrf.mxu1  ;;  %4836 = vmatprep.mubr.bf16.mxu1 %v5611_v48 }
 0x12d   : > { %v6018_v22 = vadd.f32 %v4739_v57, %v4355_v29  ;;  %v4360_v4 = vpop.f32.mrf.mxu0 }
 0x12e   : > { %v1841_v5 = vpop.f32.mrf.mxu1  ;;  %v4361_v23 = vadd.f32 %v4360_v4, %v4359_v51 }
 0x12f   : > { %v6021_v52 = vadd.f32 %v4349_v24, %v1841_v5  ;;  %v4362_v44 = vpop.f32.mrf.mxu0  ;;  %4187 = vmatmul.mubr.msk.bf16.gmra.mxu0 %vm5196_vm4, %v7040_v62 }
 0x130   : > { %v4742_v47 = vpop.f32.mrf.mxu1  ;;  %2739 = vmatprep.mubr.bf16.mxu0 %v7041_v26 }
 0x131   : > { %v4363_v45 = vpop.f32.mrf.mxu0 }
 0x132   : > { %v1854_v33 = vpop.f32.mrf.mxu1  ;;  %v4364_v2 = vadd.f32 %v4363_v45, %v4362_v44  ;;  %v7046_v45 = vld [vmem:[#allocation8_spill] sm:$0xff] }
 0x133   : > { %v6027_v42 = vadd.f32 %v4358_v56, %v1854_v33  ;;  %v4365_v9 = vpop.f32.mrf.mxu0  ;;  %4837 = vmatmul.mubr.bf16.gmra.mxu1 %v5646_v61 }
 0x134   : > { %v4743_v41 = vpop.f32.mrf.mxu1  ;;  %v6030_v48 = vadd.f32 %v4742_v47, %v4364_v2  ;;  %4840 = vmatprep.mubr.bf16.mxu1 %v5695_v11 }
 0x135   : > { %v4366_v24 = vpop.f32.mrf.mxu0 }
 0x136   : > { %v1857_v58 = vpop.f32.mrf.mxu1  ;;  %v4367_v55 = vadd.f32 %v4366_v24, %v4365_v9 }
 0x137   : > { %v6033_v36 = vadd.f32 %v4361_v23, %v1857_v58  ;;  %v4368_v62 = vpop.f32.mrf.mxu0  ;;  %4190 = vmatmul.mubr.msk.bf16.gmra.mxu0 %vm5196_vm4, %v7042_v40 }
 0x138   : > { %v4746_v26 = vpop.f32.mrf.mxu1  ;;  %v6038_v8 = vadd.f32 %v4743_v41, %v4367_v55  ;;  %2747 = vmatprep.mubr.bf16.mxu0 %v7043_v3  ;;  %v7045_v3 = vld [vmem:[#allocation9_spill] sm:$0xff] }
 0x139   : > { %v4369_v61 = vpop.f32.mrf.mxu0 }
 0x13a   : > { %v1870_v60 = vpop.f32.mrf.mxu1  ;;  %v4370_v30 = vadd.f32 %v4369_v61, %v4368_v62 }
 0x13b   : > { %v4371_v29 = vpop.f32.mrf.mxu0  ;;  %4841 = vmatmul.mubr.bf16.gmra.mxu1 %v5713_v19 }
 0x13c   : > { %v4747_v15 = vpop.f32.mrf.mxu1  ;;  %v6042_v11 = vadd.f32 %v4370_v30, %v1870_v60  ;;  %4844 = vmatprep.mubr.bf16.mxu1 %v5741_v31 }
 0x13d   : > { %v4372_v16 = vpop.f32.mrf.mxu0 }
 0x13e   : > { %v4373_v38 = vadd.f32 %v4372_v16, %v4371_v29  ;;  %v1873_v10 = vpop.f32.mrf.mxu1 }
 0x13f   : > { %v4374_v56 = vpop.f32.mrf.mxu0  ;;  %4193 = vmatmul.mubr.msk.bf16.gmra.mxu0 %vm5196_vm4, %v7044_v37 }
 0x140   : > { %v6048_v40 = vadd.f32 %v4373_v38, %v1873_v10  ;;  %2755 = vmatprep.mubr.bf16.mxu0 %v7045_v3 }
 0x141   : > { %v4375_v51 = vpop.f32.mrf.mxu0 }
 0x142   : > { %v4376_v57 = vadd.f32 %v4375_v51, %v4374_v56 }
 0x143   : > { %v4377_v4 = vpop.f32.mrf.mxu0  ;;  %v4750_v19 = vpop.f32.mrf.mxu1  ;;  %4845 = vmatmul.mubr.bf16.gmra.mxu1 %v5738_v7 }
 0x144   : > { %v6052_v5 = vadd.f32 %v4746_v26, %v4376_v57  ;;  %4848 = vmatprep.mubr.bf16.mxu1 %v5762_v49 }
 0x145   : > { %v4378_v31 = vpop.f32.mrf.mxu0  ;;  %v1886_v23 = vpop.f32.mrf.mxu1 }
 0x146   : > { %v4379_v44 = vadd.f32 %v4378_v31, %v4377_v4 }
 0x147   : > { %v4380_v47 = vpop.f32.mrf.mxu0  ;;  %4196 = vmatmul.mubr.msk.bf16.gmra.mxu0 %vm5196_vm4, %v7046_v45  ;;  %v4751_v37 = vpop.f32.mrf.mxu1 }
 0x148   : > { %v6058_v33 = vadd.f32 %v4747_v15, %v4379_v44  ;;  %2763 = vmatprep.mubr.bf16.mxu0 %v5778_v43 }
 0x149   : > { %v4381_v2 = vpop.f32.mrf.mxu0  ;;  %v1889_v9 = vpop.f32.mrf.mxu1 }
 0x14a   : > { %v4382_v7 = vadd.f32 %v4381_v2, %v4380_v47 }
 0x14b   : > { %v4383_v41 = vpop.f32.mrf.mxu0  ;;  %v4754_v24 = vpop.f32.mrf.mxu1  ;;  %4849 = vmatmul.mubr.bf16.gmra.mxu1 %v5765_v0 }
 0x14c   : > { %v6062_v49 = vadd.f32 %v4382_v7, %v1886_v23  ;;  %v6065_v58 = vadd.f32 %v4754_v24, %v5939_v1  ;;  %4852 = vmatprep.mubr.bf16.mxu1 %v5746_v14 }
 0x14d   : > { %v4384_v55 = vpop.f32.mrf.mxu0  ;;  %v1902_v27 = vpop.f32.mrf.mxu1 }
 0x14e   : > { %v4385_v62 = vadd.f32 %v4384_v55, %v4383_v41  ;;  %v6069_v26 = vadd.f32 %v5921_v32, %v1902_v27 }
 0x14f   : > { %v4386_v43 = vpop.f32.mrf.mxu0  ;;  %2764 = vmatmul.mubr.bf16.gmra.mxu0 %v4999_v12  ;;  %v4755_v61 = vpop.f32.mrf.mxu1 }
 0x150   : > { %v6072_v60 = vadd.f32 %v4385_v62, %v1889_v9  ;;  %v6075_v0 = vadd.f32 %v4755_v61, %v5945_v21 }
 0x151   : > { %v4387_v30 = vpop.f32.mrf.mxu0  ;;  %v1905_v1 = vpop.f32.mrf.mxu1 }
 0x152   : > { %v4388_v29 = vadd.f32 %v4387_v30, %v4386_v43  ;;  %v6078_v15 = vadd.f32 %v5929_v54, %v1905_v1 }
 0x153   : > { %v4389_v14 = vpop.f32.mrf.mxu0  ;;  %v4758_v16 = vpop.f32.mrf.mxu1  ;;  %4853 = vmatmul.mubr.bf16.gmra.mxu1 %v5771_v18 }
 0x154   : > { %v6081_v32 = vadd.f32 %v4750_v19, %v4388_v29  ;;  %v6084_v12 = vadd.f32 %v4758_v16, %v5971_v35 }
 0x155   : > { %v4390_v38 = vpop.f32.mrf.mxu0  ;;  %v1918_v10 = vpop.f32.mrf.mxu1 }
 0x156   : > { %v4391_v56 = vadd.f32 %v4390_v38, %v4389_v14  ;;  %v6087_v21 = vadd.f32 %v5955_v50, %v1918_v10 }
 0x157   : > { %v4778_v3 = vpop.f32.mrf.mxu0  ;;  %v4759_v51 = vpop.f32.mrf.mxu1 }
 0x158   : > { %v6089_v57 = vadd.f32 %v4751_v37, %v4391_v56  ;;  %v6092_v54 = vadd.f32 %v4759_v51, %v5977_v63 }
 0x159   : > { %v2272_v4 = vpop.f32.mrf.mxu0  ;;  %v1921_v18 = vpop.f32.mrf.mxu1 }
 0x15a   : > { %v6095_v19 = vadd.f32 %v5961_v39, %v1921_v18 }
 0x15b   : > { %v4779_v35 = vpop.f32.mrf.mxu0  ;;  %v4456_v31 = vpop.f32.mrf.mxu1 }
 0x15d   : > { %v2275_v23 = vpop.f32.mrf.mxu0  ;;  %v4457_v44 = vpop.f32.mrf.mxu1 }
 0x15e   : > { %v4458_v47 = vadd.f32 %v4457_v44, %v4456_v31 }
 0x15f   : > { %v4782_v45 = vpop.f32.mrf.mxu0  ;;  %v4459_v50 = vpop.f32.mrf.mxu1 }
 0x160   : > { %v2112_v2 = vadd.f32 %v4458_v47, %v5986_v20 }
 0x161   : > { %v2288_v9 = vpop.f32.mrf.mxu0  ;;  %v4460_v37 = vpop.f32.mrf.mxu1 }
 0x162   : > { %v6098_v7 = vadd.f32 %v2272_v4, %v2112_v2  ;;  %v4461_v63 = vadd.f32 %v4460_v37, %v4459_v50 }
 0x163   : > { %v4783_v41 = vpop.f32.mrf.mxu0  ;;  %v4462_v24 = vpop.f32.mrf.mxu1 }
 0x164   : > { %v2115_v55 = vadd.f32 %v4461_v63, %v5993_v59 }
 0x165   : > { %v2291_v39 = vpop.f32.mrf.mxu0  ;;  %v4463_v27 = vpop.f32.mrf.mxu1 }
 0x166   : > { %v6101_v62 = vadd.f32 %v2275_v23, %v2115_v55  ;;  %v4464_v43 = vadd.f32 %v4463_v27, %v4462_v24 }
 0x167   : > { %v6103_v61 = vpop.f32.mrf.mxu0  ;;  %v4465_v30 = vpop.f32.mrf.mxu1 }
 0x168   : > { %v2120_v1 = vadd.f32 %v4464_v43, %v5982_v6 }
 0x169   : > { %v2304_v20 = vpop.f32.mrf.mxu0  ;;  %v4466_v29 = vpop.f32.mrf.mxu1 }
 0x16a   : > { %v4467_v14 = vadd.f32 %v4466_v29, %v4465_v30  ;;  %v6108_v38 = vadd.f32 %v4778_v3, %v2120_v1 }
 0x16b   : > { %v6106_v16 = vpop.f32.mrf.mxu0  ;;  %v4468_v10 = vpop.f32.mrf.mxu1 }
 0x16c   : > { %v2123_v59 = vadd.f32 %v4467_v14, %v5989_v28 }
 0x16d   : > { %v2307_v56 = vpop.f32.mrf.mxu0  ;;  %v4469_v51 = vpop.f32.mrf.mxu1 }
 0x16e   : > { %v4470_v4 = vadd.f32 %v4469_v51, %v4468_v10  ;;  %v6113_v31 = vadd.f32 %v4779_v35, %v2123_v59 }
 0x16f   : > { %v6111_v18 = vpop.f32.mrf.mxu0  ;;  %v4471_v23 = vpop.f32.mrf.mxu1 }
 0x170   : > { %v2128_v6 = vadd.f32 %v4470_v4, %v6001_v34 }
 0x171   : > { %v2320_v44 = vpop.f32.mrf.mxu0  ;;  %v4472_v47 = vpop.f32.mrf.mxu1 }
 0x172   : > { %v4473_v50 = vadd.f32 %v4472_v47, %v4471_v23  ;;  %v6118_v3 = vadd.f32 %v2288_v9, %v2128_v6 }
 0x173   : > { %v6116_v2 = vpop.f32.mrf.mxu0  ;;  %v4474_v37 = vpop.f32.mrf.mxu1 }
 0x174   : > { %v2131_v28 = vadd.f32 %v4473_v50, %v6007_v13 }
 0x175   : > { %v2323_v63 = vpop.f32.mrf.mxu0  ;;  %v4475_v24 = vpop.f32.mrf.mxu1 }
 0x176   : > { %v4476_v55 = vadd.f32 %v4475_v24, %v4474_v37  ;;  %v6123_v35 = vadd.f32 %v2291_v39, %v2131_v28 }
 0x177   : > { %v6121_v27 = vpop.f32.mrf.mxu0  ;;  %v4477_v43 = vpop.f32.mrf.mxu1 }
 0x178   : > { %7047 = vst [vmem:[#allocation10_spill] sm:$0xff] %v6123_v35  ;;  %v2136_v34 = vadd.f32 %v4476_v55, %v5998_v53 }
 0x179   : > { %v6126_v30 = vpop.f32.mrf.mxu0  ;;  %v4478_v1 = vpop.f32.mrf.mxu1 }
 0x17a   : > { %v4479_v29 = vadd.f32 %v4478_v1, %v4477_v43  ;;  %v6130_v9 = vadd.f32 %v4782_v45, %v2136_v34 }
 0x17b   : > { %v6128_v14 = vpop.f32.mrf.mxu0  ;;  %v4480_v10 = vpop.f32.mrf.mxu1 }
 0x17c   : > { %v2139_v13 = vadd.f32 %v4479_v29, %v6004_v17 }
 0x17d   : > { %v6133_v59 = vpop.f32.mrf.mxu0  ;;  %v4481_v51 = vpop.f32.mrf.mxu1 }
 0x17e   : > { %v4482_v4 = vadd.f32 %v4481_v51, %v4480_v10  ;;  %v6137_v23 = vadd.f32 %v4783_v41, %v2139_v13 }
 0x17f   : > { %v6135_v39 = vpop.f32.mrf.mxu0  ;;  %v4483_v53 = vpop.f32.mrf.mxu1 }
 0x180   : > { %7048 = vst [vmem:[#allocation3_spill] sm:$0xff] %v6137_v23  ;;  %v2144_v6 = vadd.f32 %v4482_v4, %v6015_v25 }
 0x181   : > { %v6140_v47 = vpop.f32.mrf.mxu0  ;;  %v4484_v50 = vpop.f32.mrf.mxu1 }
 0x182   : > { %v4485_v37 = vadd.f32 %v4484_v50, %v4483_v53  ;;  %v6144_v28 = vadd.f32 %v2304_v20, %v2144_v6 }
 0x183   : > { %v6142_v45 = vpop.f32.mrf.mxu0  ;;  %v4486_v17 = vpop.f32.mrf.mxu1 }
 0x184   : > { %7049 = vst [vmem:[#allocation2_spill] sm:$0xff] %v6144_v28  ;;  %v2147_v24 = vadd.f32 %v4485_v37, %v6021_v52 }
 0x185   : > { %v6147_v55 = vpop.f32.mrf.mxu0  ;;  %v4487_v43 = vpop.f32.mrf.mxu1 }
 0x186   : > { %v4488_v34 = vadd.f32 %v4487_v43, %v4486_v17  ;;  %v6151_v1 = vadd.f32 %v2307_v56, %v2147_v24 }
 0x187   : > { %v6149_v41 = vpop.f32.mrf.mxu0  ;;  %v4489_v25 = vpop.f32.mrf.mxu1 }
 0x188   : > { %7050 = vst [vmem:[#allocation5_spill] sm:$0xff] %v6151_v1  ;;  %v2152_v29 = vadd.f32 %v4488_v34, %v6012_v46 }
 0x189   : > { %v6154_v10 = vpop.f32.mrf.mxu0  ;;  %v4490_v13 = vpop.f32.mrf.mxu1 }
 0x18a   : > { %v4491_v51 = vadd.f32 %v4490_v13, %v4489_v25  ;;  %v6159_v4 = vadd.f32 %v6103_v61, %v2152_v29 }
 0x18b   : > { %v6156_v20 = vpop.f32.mrf.mxu0  ;;  %v4492_v52 = vpop.f32.mrf.mxu1 }
 0x18c   : > { %7051 = vst [vmem:[#allocation4_spill] sm:$0xff] %v6159_v4  ;;  %v2155_v53 = vadd.f32 %v4491_v51, %v6018_v22 }
 0x18d   : > { %v6162_v6 = vpop.f32.mrf.mxu0  ;;  %v4493_v50 = vpop.f32.mrf.mxu1 }
 0x18e   : > { %v4494_v56 = vadd.f32 %v4493_v50, %v4492_v52  ;;  %v6167_v46 = vadd.f32 %v6106_v16, %v2155_v53 }
 0x18f   : > { %v6164_v37 = vpop.f32.mrf.mxu0  ;;  %v4495_v17 = vpop.f32.mrf.mxu1 }
 0x190   : > { %7052 = vst [vmem:[#allocation7_spill] sm:$0xff] %v6167_v46  ;;  %v2160_v24 = vadd.f32 %v4494_v56, %v6027_v42 }
 0x191   : > { %v6170_v43 = vpop.f32.mrf.mxu0  ;;  %v4496_v34 = vpop.f32.mrf.mxu1 }
 0x192   : > { %v4497_v61 = vadd.f32 %v4496_v34, %v4495_v17  ;;  %v6174_v29 = vadd.f32 %v2320_v44, %v2160_v24 }
 0x193   : > { %v6172_v25 = vpop.f32.mrf.mxu0  ;;  %v4498_v22 = vpop.f32.mrf.mxu1 }
 0x194   : > { %7053 = vst [vmem:[#allocation6_spill] sm:$0xff] %v6174_v29  ;;  %v2163_v13 = vadd.f32 %v4497_v61, %v6033_v36 }
 0x195   : > { %v6177_v51 = vpop.f32.mrf.mxu0  ;;  %v4499_v52 = vpop.f32.mrf.mxu1 }
 0x196   : > { %v4500_v50 = vadd.f32 %v4499_v52, %v4498_v22  ;;  %v6181_v53 = vadd.f32 %v2323_v63, %v2163_v13 }
 0x197   : > { %v6179_v16 = vpop.f32.mrf.mxu0  ;;  %v4501_v42 = vpop.f32.mrf.mxu1 }
 0x198   : > { %7054 = vst [vmem:[#allocation9_spill] sm:$0xff] %v6181_v53  ;;  %v2168_v56 = vadd.f32 %v4500_v50, %v6030_v48 }
 0x199   : > { %v6184_v1 = vpop.f32.mrf.mxu0  ;;  %v4502_v17 = vpop.f32.mrf.mxu1 }
 0x19a   : > { %v4503_v34 = vadd.f32 %v4502_v17, %v4501_v42  ;;  %v6189_v24 = vadd.f32 %v6111_v18, %v2168_v56 }
 0x19b   : > { %v6186_v44 = vpop.f32.mrf.mxu0  ;;  %v4504_v36 = vpop.f32.mrf.mxu1 }
 0x19c   : > { %7055 = vst [vmem:[#allocation8_spill] sm:$0xff] %v6189_v24  ;;  %v2171_v61 = vadd.f32 %v4503_v34, %v6038_v8 }
 0x19d   : > { %v6192_v22 = vpop.f32.mrf.mxu0  ;;  %v4505_v52 = vpop.f32.mrf.mxu1 }
 0x19e   : > { %v4506_v63 = vadd.f32 %v4505_v52, %v4504_v36  ;;  %v6197_v48 = vadd.f32 %v6116_v2, %v2171_v61 }
 0x19f   : > { %v6194_v13 = vpop.f32.mrf.mxu0  ;;  %v4507_v50 = vpop.f32.mrf.mxu1 }
 0x1a0   : > { %7056 = vst [vmem:[#allocation11_spill] sm:$0xff] %v6197_v48  ;;  %v2176_v42 = vadd.f32 %v4506_v63, %v6042_v11 }
 0x1a1   : > { %v6200_v17 = vpop.f32.mrf.mxu0  ;;  %v4508_v53 = vpop.f32.mrf.mxu1 }
 0x1a2   : > { %v4509_v18 = vadd.f32 %v4508_v53, %v4507_v50  ;;  %v6205_v8 = vadd.f32 %v6126_v30, %v2176_v42 }
 0x1a3   : > { %v6202_v56 = vpop.f32.mrf.mxu0  ;;  %v4510_v34 = vpop.f32.mrf.mxu1 }
 0x1a4   : > { %7057 = vst [vmem:[#allocation12_spill] sm:$0xff] %v6205_v8  ;;  %v2179_v36 = vadd.f32 %v4509_v18, %v6048_v40 }
 0x1a5   : > { %v6208_v52 = vpop.f32.mrf.mxu0  ;;  %v4511_v29 = vpop.f32.mrf.mxu1 }
 0x1a6   : > { %v4512_v2 = vadd.f32 %v4511_v29, %v4510_v34  ;;  %v6213_v11 = vadd.f32 %v6133_v59, %v2179_v36 }
 0x1a7   : > { %v6210_v61 = vpop.f32.mrf.mxu0  ;;  %v4513_v63 = vpop.f32.mrf.mxu1 }
 0x1a8   : > { %7058 = vst [vmem:[#allocation13_spill] sm:$0xff] %v6213_v11  ;;  %v2184_v53 = vadd.f32 %v4512_v2, %v6052_v5 }
 0x1a9   : > { %v6216_v50 = vpop.f32.mrf.mxu0  ;;  %v4514_v48 = vpop.f32.mrf.mxu1 }
 0x1aa   : > { %v4515_v30 = vadd.f32 %v4514_v48, %v4513_v63  ;;  %v6221_v40 = vadd.f32 %v6121_v27, %v2184_v53 }
 0x1ab   : > { %v6218_v42 = vpop.f32.mrf.mxu0  ;;  %v4516_v18 = vpop.f32.mrf.mxu1 }
 0x1ac   : > { %7059 = vst [vmem:[#allocation14_spill] sm:$0xff] %v6221_v40  ;;  %v2187_v29 = vadd.f32 %v4515_v30, %v6058_v33 }
 0x1ad   : > { %v6224_v34 = vpop.f32.mrf.mxu0  ;;  %v4517_v8 = vpop.f32.mrf.mxu1 }
 0x1ae   : > { %v4518_v59 = vadd.f32 %v4517_v8, %v4516_v18  ;;  %v6229_v5 = vadd.f32 %v6128_v14, %v2187_v29 }
 0x1af   : > { %v6226_v36 = vpop.f32.mrf.mxu0  ;;  %v4519_v2 = vpop.f32.mrf.mxu1 }
 0x1b0   : > { %7060 = vst [vmem:[#allocation15_spill] sm:$0xff] %v6229_v5  ;;  %v2192_v48 = vadd.f32 %v4518_v59, %v6062_v49 }
 0x1b1   : > { %v6232_v63 = vpop.f32.mrf.mxu0  ;;  %v4520_v11 = vpop.f32.mrf.mxu1 }
 0x1b2   : > { %v4521_v27 = vadd.f32 %v4520_v11, %v4519_v2  ;;  %v6237_v33 = vadd.f32 %v6140_v47, %v2192_v48 }
 0x1b3   : > { %v6234_v53 = vpop.f32.mrf.mxu0  ;;  %v4522_v30 = vpop.f32.mrf.mxu1 }
 0x1b4   : > { %7061 = vst [vmem:[#allocation16_spill] sm:$0xff] %v6237_v33  ;;  %v2195_v8 = vadd.f32 %v4521_v27, %v6072_v60 }
 0x1b5   : > { %v6240_v18 = vpop.f32.mrf.mxu0  ;;  %v4523_v40 = vpop.f32.mrf.mxu1 }
 0x1b6   : > { %v4524_v14 = vadd.f32 %v4523_v40, %v4522_v30  ;;  %v6245_v49 = vadd.f32 %v6147_v55, %v2195_v8 }
 0x1b7   : > { %v6242_v29 = vpop.f32.mrf.mxu0  ;;  %v4525_v59 = vpop.f32.mrf.mxu1 }
 0x1b8   : > { %7062 = vst [vmem:[#allocation17_spill] sm:$0xff] %v6245_v49  ;;  %v2200_v11 = vadd.f32 %v4524_v14, %v6081_v32 }
 0x1b9   : > { %v6248_v2 = vpop.f32.mrf.mxu0  ;;  %v4526_v5 = vpop.f32.mrf.mxu1 }
 0x1ba   : > { %v4527_v47 = vadd.f32 %v4526_v5, %v4525_v59  ;;  %v6253_v60 = vadd.f32 %v6135_v39, %v2200_v11 }
 0x1bb   : > { %v6250_v48 = vpop.f32.mrf.mxu0  ;;  %v4528_v27 = vpop.f32.mrf.mxu1 }
 0x1bc   : > { %7063 = vst [vmem:[#allocation18_spill] sm:$0xff] %v6253_v60  ;;  %v2203_v40 = vadd.f32 %v4527_v47, %v6089_v57 }
 0x1bd   : > { %v6256_v30 = vpop.f32.mrf.mxu0  ;;  %v4529_v33 = vpop.f32.mrf.mxu1 }
 0x1be   : > { %v4530_v55 = vadd.f32 %v4529_v33, %v4528_v27  ;;  %v6261_v32 = vadd.f32 %v6142_v45, %v2203_v40 }
 0x1bf   : > { %v6258_v8 = vpop.f32.mrf.mxu0  ;;  %v4531_v14 = vpop.f32.mrf.mxu1 }
 0x1c0   : > { %7064 = vst [vmem:[#allocation19_spill] sm:$0xff] %v6261_v32  ;;  %v2208_v5 = vadd.f32 %v4530_v55, %v6069_v26 }
 0x1c1   : > { %v4623_v59 = vpop.f32.mrf.mxu0  ;;  %v4532_v49 = vpop.f32.mrf.mxu1 }
 0x1c2   : > { %v4533_v24 = vadd.f32 %v4532_v49, %v4531_v14  ;;  %v6267_v11 = vadd.f32 %v6154_v10, %v2208_v5 }
 0x1c3   : > { %v6264_v39 = vpop.f32.mrf.mxu0  ;;  %v4534_v57 = vpop.f32.mrf.mxu1 }
 0x1c4   : > { %7065 = vst [vmem:[#allocation20_spill] sm:$0xff] %v6267_v11  ;;  %v2211_v47 = vadd.f32 %v4533_v24, %v6078_v15 }
 0x1c5   : > { %v4626_v33 = vpop.f32.mrf.mxu0  ;;  %v4535_v27 = vpop.f32.mrf.mxu1 }
 0x1c6   : > { %v4536_v60 = vadd.f32 %v4535_v27, %v4534_v57  ;;  %v6271_v45 = vadd.f32 %v6162_v6, %v2211_v47 }
 0x1c7   : > { %v4628_v46 = vpop.f32.mrf.mxu0  ;;  %v4537_v40 = vpop.f32.mrf.mxu1 }
 0x1c8   : > { %7066 = vst [vmem:[#allocation21_spill] sm:$0xff] %v6271_v45  ;;  %v2216_v26 = vadd.f32 %v4536_v60, %v6065_v58 }
 0x1c9   : > { %v4629_v55 = vpop.f32.mrf.mxu0  ;;  %v4538_v49 = vpop.f32.mrf.mxu1 }
 0x1ca   : > { %v4539_v14 = vadd.f32 %v4538_v49, %v4537_v40 }
 0x1cb   : > { %v4631_v32 = vpop.f32.mrf.mxu0  ;;  %v4540_v28 = vpop.f32.mrf.mxu1 }
 0x1cc   : > { %v2219_v10 = vadd.f32 %v4539_v14, %v6075_v0 }
 0x1cd   : > { %v4632_v5 = vpop.f32.mrf.mxu0  ;;  %v4541_v11 = vpop.f32.mrf.mxu1 }
 0x1ce   : > { %v4542_v15 = vadd.f32 %v4541_v11, %v4540_v28 }
 0x1cf   : > { %v4634_v24 = vpop.f32.mrf.mxu0  ;;  %v4543_v4 = vpop.f32.mrf.mxu1 }
 0x1d0   : > { %v2224_v57 = vadd.f32 %v4542_v15, %v6087_v21 }
 0x1d1   : > { %v4635_v27 = vpop.f32.mrf.mxu0  ;;  %v4544_v6 = vpop.f32.mrf.mxu1 }
 0x1d2   : > { %v4545_v47 = vadd.f32 %v4544_v6, %v4543_v4  ;;  %v6277_v58 = vadd.f32 %v6170_v43, %v2224_v57  ;;  %v4600_v4 = vadd.f32 %v6200_v17, %v6194_v13 }
 0x1d3   : > { %v4637_v45 = vpop.f32.mrf.mxu0  ;;  %v4546_v60 = vpop.f32.mrf.mxu1 }
 0x1d4   : > { %v2227_v40 = vadd.f32 %v4545_v47, %v6095_v19  ;;  %v4594_v19 = vadd.f32 %v6184_v1, %v6179_v16  ;;  %v6299_v1 = vadd.f32 %v6224_v34, %v6218_v42  ;;  %v4612_v16 = vadd.f32 %v6232_v63, %v6226_v36 }
 0x1d5   : > { %v4638_v49 = vpop.f32.mrf.mxu0  ;;  %v4547_v35 = vpop.f32.mrf.mxu1  ;;  %v6322_v34 = vadd.f32 %v4626_v33, %v6264_v39  ;;  %v6324_v36 = vadd.f32 %v4629_v55, %v4628_v46  ;;  %v6326_v63 = vadd.f32 %v4632_v5, %v4631_v32 }
 0x1d6   : > { %v4548_v0 = vadd.f32 %v4547_v35, %v4546_v60  ;;  %v6281_v28 = vadd.f32 %v6177_v51, %v2227_v40  ;;  %v4597_v35 = vadd.f32 %v6192_v22, %v6186_v44  ;;  %v4603_v51 = vadd.f32 %v6208_v52, %v6202_v56 }
 0x1d7   : > { %v4640_v14 = vpop.f32.mrf.mxu0  ;;  %v4549_v11 = vpop.f32.mrf.mxu1  ;;  %v6305_v44 = vadd.f32 %v6240_v18, %v6234_v53  ;;  %v6309_v22 = vadd.f32 %v6248_v2, %v6242_v29  ;;  %v6316_v52 = vadd.f32 %v4623_v59, %v6258_v8  ;;  %v6329_v18 = vadd.f32 %v6149_v41, %v2216_v26 }
 0x1d8   : > { %v2232_v21 = vadd.f32 %v4548_v0, %v6084_v12  ;;  %v6294_v12 = vadd.f32 %v6216_v50, %v6210_v61  ;;  %v6340_v8 = vadd.f32 %v4635_v27, %v4634_v24  ;;  %v6342_v32 = vadd.f32 %v4638_v49, %v4637_v45  ;;  %v3505_v49 = vld [vmem:[%s6351_s27 + $0xc] sm:$0xf] }
 0x1d9   : > { %v4641_v15 = vpop.f32.mrf.mxu0  ;;  %v4550_v23 = vpop.f32.mrf.mxu1 }
 0x1da   : > { %v4551_v43 = vadd.f32 %v4550_v23, %v4549_v11  ;;  %v6338_v46 = vadd.f32 %v6164_v37, %v2232_v21  ;;  %v6344_v59 = vadd.f32 %v4641_v15, %v4640_v14 }
 0x1db   : > { %v4643_v57 = vpop.f32.mrf.mxu0  ;;  %v4826_v6 = vpop.f32.mrf.mxu1 }
 0x1dc   : > { %v2235_v13 = vadd.f32 %v4551_v43, %v6092_v54  ;;  %v2815_v23 = vadd.f32 %v4826_v6, %v4600_v4  ;;  %v6313_v54 = vadd.f32 %v6256_v30, %v6250_v48  ;;  %v6335_v30 = vadd.f32 %v6156_v20, %v2219_v10  ;;  %v3496_v6 = vld [vmem:[%s6351_s27] sm:$0xf] }
 0x1dd   : > { %v4644_v17 = vpop.f32.mrf.mxu0  ;;  %v2806_v56 = vpop.f32.mrf.mxu1 }
 0x1de   : > { %v6319_v61 = vadd.f32 %v2815_v23, %v6108_v38  ;;  %v2807_v50 = vadd.f32 %v4594_v19, %v2806_v56  ;;  %v6356_v39 = vadd.f32 %v4644_v17, %v4643_v57 }
 0x1df   : > { %v4646_v42 = vpop.f32.mrf.mxu0  ;;  %v4827_v53 = vpop.f32.mrf.mxu1 }
 0x1e0   : > { %v4235_v38 = vpack.c.bf16 %v6319_v61, %v6319_v61  ;;  %v2933_v29 = vadd.f32 %v2807_v50, %v6098_v7  ;;  %v2818_v2 = vadd.f32 %v4827_v53, %v4603_v51  ;;  %v6354_v7 = vadd.f32 %v6172_v25, %v2235_v13 }
 0x1e1   : > { %v4647_v48 = vpop.f32.mrf.mxu0  ;;  %v2809_v41 = vpop.f32.mrf.mxu1  ;;  %v3004_v45 = vmul.f32 %v6319_v61, %v6319_v61 }
 0x1e2   : > { %v3191_v20 = vshrl.u32 %v4235_v38, 16  ;;  %v4233_v37 = vpack.c.bf16 %v2933_v29, %v2933_v29  ;;  %v2936_v26 = vadd.f32 %v2818_v2, %v6113_v31  ;;  %v2810_v55 = vadd.f32 %v4597_v35, %v2809_v41 }
 0x1e3   : > { %v6358_v33 = vpop.f32.mrf.mxu0  ;;  %v4830_v10 = vpop.f32.mrf.mxu1  ;;  %v6363_v5 = vadd.f32 %v4647_v48, %v4646_v42  ;;  %v3194_v27 = vshll.u32 %v4235_v38, 16  ;;  %v3002_v0 = vmul.f32 %v2933_v29, %v2933_v29 }
 0x1e4   : > { %v3193_v24 = vrot.slane %v3191_v20, 7  ;;  %v3174_v25 = vshrl.u32 %v4233_v37, 16  ;;  %v2831_v47 = vadd.f32 %v4830_v10, %v4612_v16  ;;  %v3177_v31 = vshll.u32 %v4233_v37, 16  ;;  %v3509_v37 = vld [vmem:[%s6351_s27 + $0x14] sm:$0x1] }
 0x1e5   : > { %v6365_v60 = vpop.f32.mrf.mxu0  ;;  %v4236_v14 = vpack.c.bf16 %v2936_v26, %v2936_v26  ;;  %v2934_v11 = vadd.f32 %v2810_v55, %v6101_v62  ;;  %v2822_v21 = vpop.f32.mrf.mxu1  ;;  %v3005_v43 = vmul.f32 %v2936_v26, %v2936_v26 }
 0x1e6   : > { %v3196_v15 = vor.u32 %v3194_v27, %v3193_v24  ;;  %v3176_v4 = vrot.slane %v3174_v25, 7  ;;  %v6376_v57 = vadd.f32 %v2831_v47, %v6130_v9  ;;  %v3197_v35 = vrot.slane %v3193_v24, 4 }
 0x1e7   : > { %v6378_v19 = vpop.f32.mrf.mxu0  ;;  %v3199_v51 = vshrl.u32 %v4236_v14, 16  ;;  %v2965_v13 = vadd.f32 %v2934_v11, %v2933_v29  ;;  %v3003_v23 = vmul.f32 %v2934_v11, %v2934_v11  ;;  %v4831_v17 = vpop.f32.mrf.mxu1  ;;  %v3202_v56 = vshll.u32 %v4236_v14, 16 }
 0x1e8   : > { %v3506_v62 = vsel %vm6369_vm11, %v3196_v15, %v3505_v49  ;;  %v3179_v16 = vor.u32 %v3177_v31, %v3176_v4  ;;  %v4234_v50 = vpack.c.bf16 %v2934_v11, %v2934_v11  ;;  %v3180_v53 = vrot.slane %v3176_v4, 4 }
 0x1e9   : > { %v6383_v42 = vpop.f32.mrf.mxu0  ;;  %3507 = vst [vmem:[%s6351_s27 + $0xc] sm:$0xf] %v3506_v62  ;;  %v3201_v38 = vrot.slane %v3199_v51, 7  ;;  %v2966_v29 = vadd.f32 %v2965_v13, %v6319_v61  ;;  %v3034_v2 = vadd.f32 %v3003_v23, %v3002_v0  ;;  %v2825_v48 = vpop.f32.mrf.mxu1  ;;  %v4239_v24 = vpack.c.bf16 %v6376_v57, %v6376_v57  ;;  %v3502_v13 = vld [vmem:[%s6351_s27 + $0x8] sm:$0x1] }
 0x1ea   : > { %v3497_v41 = vsel %vm6369_vm11, %v3179_v16, %v3496_v6  ;;  %v3182_v55 = vshrl.u32 %v4234_v50, 16  ;;  %v3185_v10 = vshll.u32 %v4234_v50, 16  ;;  %v2823_v49 = vadd.f32 %v6294_v12, %v2822_v21 }
 0x1eb   : > { %v6404_v27 = vpop.f32.mrf.mxu0  ;;  %3498 = vst [vmem:[%s6351_s27] sm:$0xf] %v3497_v41  ;;  %v3204_v61 = vor.u32 %v3202_v56, %v3201_v38  ;;  %v3206_v25 = vrot.slane %v3201_v38, 4  ;;  %v3035_v47 = vadd.f32 %v3034_v2, %v3004_v45  ;;  %v4834_v0 = vpop.f32.mrf.mxu1  ;;  %v3225_v14 = vshrl.u32 %v4239_v24, 16  ;;  %v3519_v56 = vld [vmem:[%s6351_s27 + $0x24] sm:$0xf] }
 0x1ec   : > { %v3184_v31 = vrot.slane %v3182_v55, 7  ;;  %v3228_v11 = vshll.u32 %v4239_v24, 16  ;;  %v2967_v15 = vadd.f32 %v2966_v29, %v2936_v26  ;;  %v2937_v23 = vadd.f32 %v2823_v49, %v6118_v3 }
 0x1ed   : > { %v6408_v4 = vpop.f32.mrf.mxu0  ;;  %v3205_v6 = vsel %vm6397_vm13, %v3197_v35, %v3204_v61  ;;  %v3510_v51 = vsel %vm6387_vm12, %v3206_v25, %v3509_v37  ;;  %v3036_v45 = vadd.f32 %v3035_v47, %v3005_v43  ;;  %v2838_v12 = vpop.f32.mrf.mxu1  ;;  %v6418_v16 = vrot.slane %v3225_v14, 7  ;;  %v7073_v61 = vld [vmem:[#allocation3_spill] sm:$0xff]  ;;  %v7074_v47 = vld [vmem:[#allocation10_spill] sm:$0xff] }
 0x1ee   : > { %3508 = vst [vmem:[%s6351_s27 + $0x10] sm:$0xf] %v3205_v6  ;;  %3511 = vst [vmem:[%s6351_s27 + $0x14] sm:$0x1] %v3510_v51  ;;  %v3187_v21 = vor.u32 %v3185_v10, %v3184_v31  ;;  %v3189_v62 = vrot.slane %v3184_v31, 4  ;;  %v2834_v26 = vadd.f32 %v4831_v17, %v6305_v44  ;;  %v2968_v50 = vadd.f32 %v2967_v15, %v2937_v23 }
 0x1ef   : > { %v6421_v35 = vpop.f32.mrf.mxu0  ;;  %v3006_v38 = vmul.f32 %v2937_v23, %v2937_v23  ;;  %v4237_v29 = vpack.c.bf16 %v2937_v23, %v2937_v23  ;;  %v2826_v3 = vadd.f32 %v6299_v1, %v2825_v48  ;;  %v6425_v43 = vpop.f32.mrf.mxu1  ;;  %v3230_v17 = vor.u32 %v3228_v11, %v6418_v16 }
 0x1f0   : > { %v3613_v2 = vld [vmem:[%s6351_s27 + $0xc] sm:$0x1]  ;;  %v3188_v41 = vsel %vm6397_vm13, %v3180_v53, %v3187_v21  ;;  %v3503_v44 = vsel %vm6387_vm12, %v3189_v62, %v3502_v13  ;;  %v6435_v37 = vadd.f32 %v6365_v60, %v6358_v33  ;;  %v3008_v53 = vmul.f32 %v6376_v57, %v6376_v57 }
 0x1f1   : > { %v6437_v55 = vpop.f32.mrf.mxu0  ;;  %v3614_v1 = vsel %vm6387_vm12, 0, %v3613_v2  ;;  %3499 = vst [vmem:[%s6351_s27 + $0x4] sm:$0xf] %v3188_v41  ;;  %3504 = vst [vmem:[%s6351_s27 + $0x8] sm:$0x1] %v3503_v44  ;;  %v3037_v48 = vadd.f32 %v3036_v45, %v3006_v38  ;;  %v3208_v10 = vshrl.u32 %v4237_v29, 16  ;;  %v6445_v24 = vpop.f32.mrf.mxu1  ;;  %v3520_v60 = vsel %vm6369_vm11, %v3230_v17, %v3519_v56 }
 0x1f2   : > { %3615 = vst [vmem:[%s6351_s27 + $0xc] sm:$0x1] %v3614_v1  ;;  %v3610_v33 = vld [vmem:[%s6351_s27] sm:$0x1]  ;;  %v2940_v25 = vadd.f32 %v2834_v26, %v7073_v61  ;;  %v2938_v49 = vadd.f32 %v2826_v3, %v7074_v47  ;;  %v2847_v31 = vadd.f32 %v4834_v0, %v6316_v52  ;;  %v3231_v15 = vrot.slane %v6418_v16, 4  ;;  %v7077_v3 = vld [vmem:[#allocation4_spill] sm:$0xff] }
 0x1f3   : > { %v3611_v11 = vsel %vm6387_vm12, 0, %v3610_v33  ;;  %3521 = vst [vmem:[%s6351_s27 + $0x24] sm:$0xf] %v3520_v60  ;;  %v3210_v6 = vrot.slane %v3208_v10, 7  ;;  %v3211_v51 = vshll.u32 %v4237_v29, 16  ;;  %v6464_v13 = vpop.f32.mrf.mxu1  ;;  %v6466_v23 = vpop.f32.mrf.mxu0  ;;  %v2839_v62 = vadd.f32 %v6309_v22, %v2838_v12 }
 0x1f4   : > { %3612 = vst [vmem:[%s6351_s27] sm:$0x1] %v3611_v11  ;;  %v3512_v52 = vld [vmem:[%s6351_s27 + $0x18] sm:$0xf]  ;;  %v4240_v0 = vpack.c.bf16 %v2940_v25, %v2940_v25  ;;  %v2969_v45 = vadd.f32 %v2968_v50, %v2938_v49  ;;  %v3007_v21 = vmul.f32 %v2938_v49, %v2938_v49  ;;  %v3009_v38 = vmul.f32 %v2940_v25, %v2940_v25 }
 0x1f5   : > { %v3662_v26 = vld [vmem:[%s6351_s27 + $0x14] sm:$0x1]  ;;  %v3213_v56 = vor.u32 %v3211_v51, %v3210_v6  ;;  %v4238_v16 = vpack.c.bf16 %v2938_v49, %v2938_v49  ;;  %v6473_v29 = vadd.f32 %v2847_v31, %v7077_v3  ;;  %v6475_v2 = vpop.f32.mrf.mxu1  ;;  %v3214_v44 = vrot.slane %v3210_v6, 4  ;;  %v6485_v60 = vpop.f32.mrf.mxu0  ;;  %v7078_v31 = vld [vmem:[#allocation2_spill] sm:$0xff] }
 0x1f6   : > { %v3663_v41 = vsel %vm6456_vm14, 0, %v3662_v26  ;;  %v3233_v17 = vshrl.u32 %v4240_v0, 16  ;;  %v2970_v50 = vadd.f32 %v2969_v45, %v6376_v57  ;;  %v3236_v12 = vshll.u32 %v4240_v0, 16  ;;  %v3516_v0 = vld [vmem:[%s6351_s27 + $0x20] sm:$0x1] }
 0x1f7   : > { %3664 = vst [vmem:[%s6351_s27 + $0x14] sm:$0x1] %v3663_v41  ;;  %v3513_v22 = vsel %vm6369_vm11, %v3213_v56, %v3512_v52  ;;  %v3038_v1 = vadd.f32 %v3037_v48, %v3007_v21  ;;  %v3216_v10 = vshrl.u32 %v4238_v16, 16  ;;  %v6483_v33 = vpop.f32.mrf.mxu1  ;;  %v3219_v49 = vshll.u32 %v4238_v16, 16  ;;  %v3523_v48 = vld [vmem:[%s6351_s27 + $0x2c] sm:$0x1] }
 0x1f8   : > { %v3659_v61 = vld [vmem:[%s6351_s27 + $0x8] sm:$0x1]  ;;  %3514 = vst [vmem:[%s6351_s27 + $0x18] sm:$0xf] %v3513_v22  ;;  %v3235_v47 = vrot.slane %v3233_v17, 7  ;;  %v4243_v57 = vpack.c.bf16 %v6473_v29, %v6473_v29  ;;  %v2941_v11 = vadd.f32 %v2839_v62, %v7078_v31  ;;  %v2971_v45 = vadd.f32 %v2970_v50, %v2940_v25  ;;  %v6502_v25 = vpop.f32.mrf.mxu0 }
 0x1f9   : > { %v3660_v6 = vsel %vm6456_vm14, 0, %v3659_v61  ;;  %v3039_v51 = vadd.f32 %v3038_v1, %v3008_v53  ;;  %v3218_v52 = vrot.slane %v3216_v10, 7  ;;  %v6496_v21 = vpop.f32.mrf.mxu1 }
 0x1fa   : > { %3661 = vst [vmem:[%s6351_s27 + $0x8] sm:$0x1] %v3660_v6  ;;  %v3619_v26 = vld [vmem:[%s6351_s27 + $0x24] sm:$0x1]  ;;  %v3238_v56 = vor.u32 %v3236_v12, %v3235_v47  ;;  %v3240_v16 = vrot.slane %v3235_v47, 4  ;;  %v3259_v3 = vshrl.u32 %v4243_v57, 16  ;;  %v2972_v22 = vadd.f32 %v2971_v45, %v2941_v11 }
 0x1fb   : > { %v3262_v41 = vshll.u32 %v4243_v57, 16  ;;  %v3620_v62 = vsel %vm6387_vm12, 0, %v3619_v26  ;;  %v3221_v17 = vor.u32 %v3219_v49, %v3218_v52  ;;  %v3223_v53 = vrot.slane %v3218_v52, 4  ;;  %v6511_v61 = vpop.f32.mrf.mxu1  ;;  %v3533_v57 = vld [vmem:[%s6351_s27 + $0x3c] sm:$0xf]  ;;  %v6535_v26 = vpop.f32.mrf.mxu0 }
 0x1fc   : > { %3621 = vst [vmem:[%s6351_s27 + $0x24] sm:$0x1] %v3620_v62  ;;  %v3239_v50 = vsel %vm6397_vm13, %v3231_v15, %v3238_v56  ;;  %v3524_v12 = vsel %vm6387_vm12, %v3240_v16, %v3523_v48  ;;  %v6509_v1 = vrot.slane %v3259_v3, 7  ;;  %v3010_v10 = vmul.f32 %v2941_v11, %v2941_v11 }
 0x1fd   : > { %3522 = vst [vmem:[%s6351_s27 + $0x28] sm:$0xf] %v3239_v50  ;;  %3525 = vst [vmem:[%s6351_s27 + $0x2c] sm:$0x1] %v3524_v12  ;;  %v3222_v47 = vsel %vm6397_vm13, %v3214_v44, %v3221_v17  ;;  %v3517_v49 = vsel %vm6387_vm12, %v3223_v53, %v3516_v0  ;;  %v3040_v31 = vadd.f32 %v3039_v51, %v3009_v38  ;;  %v3526_v17 = vld [vmem:[%s6351_s27 + $0x30] sm:$0xf] }
 0x1fe   : > { %v4241_v15 = vpack.c.bf16 %v2941_v11, %v2941_v11  ;;  %3515 = vst [vmem:[%s6351_s27 + $0x1c] sm:$0xf] %v3222_v47  ;;  %3518 = vst [vmem:[%s6351_s27 + $0x20] sm:$0x1] %v3517_v49  ;;  %v3012_v6 = vmul.f32 %v6473_v29, %v6473_v29  ;;  %v3264_v48 = vor.u32 %v3262_v41, %v6509_v1  ;;  %v3265_v38 = vrot.slane %v6509_v1, 4  ;;  %v7080_v41 = vld [vmem:[#allocation5_spill] sm:$0xff] }
 0x1ff   : > { %v6527_v52 = vadd.f32 %v6383_v42, %v6378_v19  ;;  %v2850_v44 = vadd.f32 %v6425_v43, %v6322_v34  ;;  %v3616_v0 = vld [vmem:[%s6351_s27 + $0x18] sm:$0x1]  ;;  %v3041_v11 = vadd.f32 %v3040_v31, %v3010_v10  ;;  %v2842_v45 = vadd.f32 %v6313_v54, %v6445_v24  ;;  %v7079_v42 = vld [vmem:[#allocation7_spill] sm:$0xff]  ;;  %v6544_v43 = vpop.f32.mrf.mxu1  ;;  %v7081_v12 = vld [vmem:[#allocation8_spill] sm:$0xff] }
 0x200   : > { %v3242_v51 = vshrl.u32 %v4241_v15, 16  ;;  %v3617_v56 = vsel %vm6387_vm12, 0, %v3616_v0  ;;  %v3534_v19 = vsel %vm6369_vm11, %v3264_v48, %v3533_v57  ;;  %v2863_v34 = vadd.f32 %v6464_v13, %v6340_v8 }
 0x201   : > { %v2944_v16 = vadd.f32 %v2850_v44, %v7079_v42  ;;  %3618 = vst [vmem:[%s6351_s27 + $0x18] sm:$0x1] %v3617_v56  ;;  %3535 = vst [vmem:[%s6351_s27 + $0x3c] sm:$0xf] %v3534_v19  ;;  %v3245_v54 = vshll.u32 %v4241_v15, 16  ;;  %v6552_v24 = vadd.f32 %v6408_v4, %v6404_v27  ;;  %v2942_v62 = vadd.f32 %v2842_v45, %v7080_v41  ;;  %v6564_v4 = vpop.f32.mrf.mxu0 }
 0x202   : > { %v6548_v3 = vrot.slane %v3242_v51, 7  ;;  %v6557_v8 = vadd.f32 %v2863_v34, %v7081_v12  ;;  %v2855_v13 = vadd.f32 %v6324_v36, %v6475_v2  ;;  %v2866_v27 = vadd.f32 %v6483_v33, %v6342_v32  ;;  %v6568_v36 = vpop.f32.mrf.mxu1  ;;  %v3537_v42 = vld [vmem:[%s6351_s27 + $0x44] sm:$0x1] }
 0x203   : > { %v3013_v53 = vmul.f32 %v2944_v16, %v2944_v16  ;;  %v4244_v50 = vpack.c.bf16 %v2944_v16, %v2944_v16  ;;  %v2973_v47 = vadd.f32 %v2972_v22, %v2942_v62  ;;  %v3011_v49 = vmul.f32 %v2942_v62, %v2942_v62 }
 0x204   : > { %v3247_v10 = vor.u32 %v3245_v54, %v6548_v3  ;;  %v3668_v57 = vld [vmem:[%s6351_s27 + $0x2c] sm:$0x1]  ;;  %v3248_v31 = vrot.slane %v6548_v3, 4  ;;  %v4242_v44 = vpack.c.bf16 %v2942_v62, %v2942_v62  ;;  %v4247_v3 = vpack.c.bf16 %v6557_v8, %v6557_v8  ;;  %v7082_v54 = vld [vmem:[#allocation6_spill] sm:$0xff] }
 0x205   : > { %v3267_v15 = vshrl.u32 %v4244_v50, 16  ;;  %v3270_v48 = vshll.u32 %v4244_v50, 16  ;;  %v3669_v2 = vsel %vm6456_vm14, 0, %v3668_v57  ;;  %v3665_v22 = vld [vmem:[%s6351_s27 + $0x20] sm:$0x1]  ;;  %v2974_v32 = vadd.f32 %v2973_v47, %v6473_v29 }
 0x206   : > { %v3527_v0 = vsel %vm6369_vm11, %v3247_v10, %v3526_v17  ;;  %v3042_v33 = vadd.f32 %v3041_v11, %v3011_v49  ;;  %3670 = vst [vmem:[%s6351_s27 + $0x2c] sm:$0x1] %v3669_v2  ;;  %v3666_v51 = vsel %vm6456_vm14, 0, %v3665_v22  ;;  %v3250_v56 = vshrl.u32 %v4242_v44, 16  ;;  %v6585_v11 = vpop.f32.mrf.mxu0  ;;  %v7083_v10 = vld [vmem:[#allocation11_spill] sm:$0xff]  ;;  %v6591_v49 = vpop.f32.mrf.mxu1 }
 0x207   : > { %3528 = vst [vmem:[%s6351_s27 + $0x30] sm:$0xf] %v3527_v0  ;;  %v3269_v45 = vrot.slane %v3267_v15, 7  ;;  %v3253_v19 = vshll.u32 %v4242_v44, 16  ;;  %3667 = vst [vmem:[%s6351_s27 + $0x20] sm:$0x1] %v3666_v51  ;;  %v2945_v41 = vadd.f32 %v2855_v13, %v7082_v54  ;;  %v2975_v29 = vadd.f32 %v2974_v32, %v2944_v16 }
 0x208   : > { %v3043_v34 = vadd.f32 %v3042_v33, %v3012_v6  ;;  %v3625_v62 = vld [vmem:[%s6351_s27 + $0x3c] sm:$0x1]  ;;  %v3252_v12 = vrot.slane %v3250_v56, 7  ;;  %v6589_v47 = vadd.f32 %v2866_v27, %v7083_v10  ;;  %v3530_v57 = vld [vmem:[%s6351_s27 + $0x38] sm:$0x1]  ;;  %v3293_v15 = vshrl.u32 %v4247_v3, 16  ;;  %v6605_v51 = vpop.f32.mrf.mxu0 }
 0x209   : > { %v3272_v17 = vor.u32 %v3270_v48, %v3269_v45  ;;  %v3274_v50 = vrot.slane %v3269_v45, 4  ;;  %v3626_v6 = vsel %vm6387_vm12, 0, %v3625_v62  ;;  %v3296_v13 = vshll.u32 %v4247_v3, 16  ;;  %v3547_v45 = vld [vmem:[%s6351_s27 + $0x54] sm:$0xf] }
 0x20a   : > { %v2976_v16 = vadd.f32 %v2975_v29, %v2945_v41  ;;  %3627 = vst [vmem:[%s6351_s27 + $0x3c] sm:$0x1] %v3626_v6  ;;  %v3255_v44 = vor.u32 %v3253_v19, %v3252_v12  ;;  %v3257_v2 = vrot.slane %v3252_v12, 4  ;;  %v3295_v22 = vrot.slane %v3293_v15, 7  ;;  %v6638_v10 = vpop.f32.mrf.mxu0  ;;  %v3540_v6 = vld [vmem:[%s6351_s27 + $0x48] sm:$0xf] }
 0x20b   : > { %v3273_v48 = vsel %vm6397_vm13, %v3265_v38, %v3272_v17  ;;  %v3538_v27 = vsel %vm6387_vm12, %v3274_v50, %v3537_v42  ;;  %v3014_v0 = vmul.f32 %v2945_v41, %v2945_v41  ;;  %v3044_v32 = vadd.f32 %v3043_v34, %v3013_v53  ;;  %v6618_v42 = vpop.f32.mrf.mxu1 }
 0x20c   : > { %3536 = vst [vmem:[%s6351_s27 + $0x40] sm:$0xf] %v3273_v48  ;;  %3539 = vst [vmem:[%s6351_s27 + $0x44] sm:$0x1] %v3538_v27  ;;  %v4245_v33 = vpack.c.bf16 %v2945_v41, %v2945_v41  ;;  %v3256_v1 = vsel %vm6397_vm13, %v3248_v31, %v3255_v44  ;;  %v3531_v38 = vsel %vm6387_vm12, %v3257_v2, %v3530_v57  ;;  %v3551_v2 = vld [vmem:[%s6351_s27 + $0x5c] sm:$0x1] }
 0x20d   : > { %v6614_v56 = vadd.f32 %v6437_v55, %v6421_v35  ;;  %v4248_v19 = vpack.c.bf16 %v6589_v47, %v6589_v47  ;;  %3529 = vst [vmem:[%s6351_s27 + $0x34] sm:$0xf] %v3256_v1  ;;  %3532 = vst [vmem:[%s6351_s27 + $0x38] sm:$0x1] %v3531_v38  ;;  %v3016_v31 = vmul.f32 %v6557_v8, %v6557_v8  ;;  %v3299_v55 = vrot.slane %v3295_v22, 4  ;;  %v6646_v27 = vpop.f32.mrf.mxu1 }
 0x20e   : > { %v3622_v53 = vld [vmem:[%s6351_s27 + $0x30] sm:$0x1]  ;;  %v3298_v34 = vor.u32 %v3296_v13, %v3295_v22  ;;  %v3045_v3 = vadd.f32 %v3044_v32, %v3014_v0  ;;  %v3276_v54 = vshrl.u32 %v4245_v33, 16  ;;  %v6629_v41 = vmul.f32 %v6589_v47, %v6589_v47  ;;  %v7085_v0 = vld [vmem:[#allocation14_spill] sm:$0xff] }
 0x20f   : > { %v3623_v35 = vsel %vm6387_vm12, 0, %v3622_v53  ;;  %v3301_v29 = vshrl.u32 %v4248_v19, 16  ;;  %v3279_v50 = vshll.u32 %v4245_v33, 16  ;;  %v2858_v12 = vadd.f32 %v6326_v63, %v6496_v21  ;;  %v7084_v21 = vld [vmem:[#allocation9_spill] sm:$0xff]  ;;  %v7086_v33 = vld [vmem:[#allocation12_spill] sm:$0xff] }
 0x210   : > { %3624 = vst [vmem:[%s6351_s27 + $0x30] sm:$0x1] %v3623_v35  ;;  %v3548_v62 = vsel %vm6369_vm11, %v3298_v34, %v3547_v45  ;;  %v6634_v17 = vrot.slane %v3276_v54, 7  ;;  %v3304_v15 = vshll.u32 %v4248_v19, 16  ;;  %v2879_v13 = vadd.f32 %v6511_v61, %v6363_v5  ;;  %v6679_v35 = vpop.f32.mrf.mxu1 }
 0x211   : > { %3549 = vst [vmem:[%s6351_s27 + $0x54] sm:$0xf] %v3548_v62  ;;  %v3303_v57 = vrot.slane %v3301_v29, 7  ;;  %v2871_v48 = vadd.f32 %v6344_v59, %v6544_v43  ;;  %v6652_v63 = vadd.f32 %v6485_v60, %v6466_v23  ;;  %v2946_v22 = vadd.f32 %v2858_v12, %v7084_v21 }
 0x212   : > { %v3281_v44 = vor.u32 %v3279_v50, %v6634_v17  ;;  %v6657_v5 = vadd.f32 %v6535_v26, %v6502_v25  ;;  %v6661_v32 = vadd.f32 %v2879_v13, %v7085_v0  ;;  %v6668_v25 = vpop.f32.mrf.mxu0  ;;  %v2882_v54 = vadd.f32 %v6568_v36, %v6435_v37 }
 0x213   : > { %v3674_v61 = vld [vmem:[%s6351_s27 + $0x44] sm:$0x1]  ;;  %v3306_v59 = vor.u32 %v3304_v15, %v3303_v57  ;;  %v3308_v43 = vrot.slane %v3303_v57, 4  ;;  %v2949_v1 = vadd.f32 %v2871_v48, %v7086_v33  ;;  %v2977_v38 = vadd.f32 %v2976_v16, %v2946_v22 }
 0x214   : > { %v3675_v23 = vsel %vm6456_vm14, 0, %v3674_v61  ;;  %v3541_v60 = vsel %vm6369_vm11, %v3281_v44, %v3540_v6  ;;  %v3015_v45 = vmul.f32 %v2946_v22, %v2946_v22  ;;  %v3671_v26 = vld [vmem:[%s6351_s27 + $0x38] sm:$0x1]  ;;  %v4246_v34 = vpack.c.bf16 %v2946_v22, %v2946_v22  ;;  %v3544_v22 = vld [vmem:[%s6351_s27 + $0x50] sm:$0x1] }
 0x215   : > { %3676 = vst [vmem:[%s6351_s27 + $0x44] sm:$0x1] %v3675_v23  ;;  %3542 = vst [vmem:[%s6351_s27 + $0x48] sm:$0xf] %v3541_v60  ;;  %v3307_v19 = vsel %vm6397_vm13, %v3299_v55, %v3306_v59  ;;  %v3552_v53 = vsel %vm6387_vm12, %v3308_v43, %v3551_v2  ;;  %v3672_v16 = vsel %vm6456_vm14, 0, %v3671_v26  ;;  %v2978_v29 = vadd.f32 %v2977_v38, %v6557_v8  ;;  %v4674_v8 = vpop.f32.mrf.mxu0  ;;  %v7087_v59 = vld [vmem:[#allocation15_spill] sm:$0xff] }
 0x216   : > { %3550 = vst [vmem:[%s6351_s27 + $0x58] sm:$0xf] %v3307_v19  ;;  %3553 = vst [vmem:[%s6351_s27 + $0x5c] sm:$0x1] %v3552_v53  ;;  %v3046_v62 = vadd.f32 %v3045_v3, %v3015_v45  ;;  %v4251_v55 = vpack.c.bf16 %v6661_v32, %v6661_v32  ;;  %v3282_v50 = vrot.slane %v6634_v17, 4  ;;  %v3284_v12 = vshrl.u32 %v4246_v34, 16  ;;  %v2889_v17 = vpop.f32.mrf.mxu1 }
 0x217   : > { %3673 = vst [vmem:[%s6351_s27 + $0x38] sm:$0x1] %v3672_v16  ;;  %v3287_v37 = vshll.u32 %v4246_v34, 16  ;;  %v4249_v36 = vpack.c.bf16 %v2949_v1, %v2949_v1  ;;  %v2979_v13 = vadd.f32 %v2978_v29, %v6589_v47  ;;  %v3018_v48 = vmul.f32 %v2949_v1, %v2949_v1  ;;  %v3561_v23 = vld [vmem:[%s6351_s27 + $0x6c] sm:$0xf]  ;;  %v6716_v34 = vpop.f32.mrf.mxu0 }
 0x218   : > { %v3631_v6 = vld [vmem:[%s6351_s27 + $0x54] sm:$0x1]  ;;  %v3047_v57 = vadd.f32 %v3046_v62, %v3016_v31  ;;  %v3327_v15 = vshrl.u32 %v4251_v55, 16  ;;  %v3286_v44 = vrot.slane %v3284_v12, 7  ;;  %v3330_v2 = vshll.u32 %v4251_v55, 16  ;;  %v4850_v12 = vpop.f32.mrf.mxu1 }
 0x219   : > { %v3632_v3 = vsel %vm6387_vm12, 0, %v3631_v6  ;;  %v3310_v21 = vshrl.u32 %v4249_v36, 16  ;;  %v2980_v31 = vadd.f32 %v2979_v13, %v2949_v1  ;;  %v6700_v43 = vadd.f32 %v2882_v54, %v7087_v59  ;;  %v3554_v19 = vld [vmem:[%s6351_s27 + $0x60] sm:$0xf]  ;;  %v7090_v59 = vld [vmem:[#allocation16_spill] sm:$0xff] }
 0x21a   : > { %3633 = vst [vmem:[%s6351_s27 + $0x54] sm:$0x1] %v3632_v3  ;;  %v6696_v61 = vrot.slane %v3327_v15, 7  ;;  %v3048_v47 = vadd.f32 %v3047_v57, %v6629_v41  ;;  %v3289_v0 = vor.u32 %v3287_v37, %v3286_v44  ;;  %v3291_v33 = vrot.slane %v3286_v44, 4 }
 0x21b   : > { %v6703_v60 = vrot.slane %v3310_v21, 7  ;;  %v3313_v38 = vshll.u32 %v4249_v36, 16  ;;  %v6708_v26 = vmul.f32 %v6661_v32, %v6661_v32  ;;  %v6714_v53 = vadd.f32 %v6585_v11, %v6564_v4 }
 0x21c   : > { %v3628_v45 = vld [vmem:[%s6351_s27 + $0x48] sm:$0x1]  ;;  %v3332_v1 = vor.u32 %v3330_v2, %v6696_v61  ;;  %v3049_v41 = vadd.f32 %v3048_v47, %v3018_v48  ;;  %v3290_v29 = vsel %vm6397_vm13, %v3282_v50, %v3289_v0  ;;  %v3545_v62 = vsel %vm6387_vm12, %v3291_v33, %v3544_v22  ;;  %v6752_v2 = vpop.f32.mrf.mxu0  ;;  %v7088_v22 = vld [vmem:[#allocation13_spill] sm:$0xff] }
 0x21d   : > { %v3629_v54 = vsel %vm6387_vm12, 0, %v3628_v45  ;;  %v3680_v16 = vld [vmem:[%s6351_s27 + $0x5c] sm:$0x1]  ;;  %v3315_v55 = vor.u32 %v3313_v38, %v6703_v60  ;;  %3543 = vst [vmem:[%s6351_s27 + $0x4c] sm:$0xf] %v3290_v29  ;;  %v3333_v11 = vrot.slane %v6696_v61, 4  ;;  %v4252_v50 = vpack.c.bf16 %v6700_v43, %v6700_v43 }
 0x21e   : > { %3630 = vst [vmem:[%s6351_s27 + $0x48] sm:$0x1] %v3629_v54  ;;  %v3681_v4 = vsel %vm6456_vm14, 0, %v3680_v16  ;;  %3546 = vst [vmem:[%s6351_s27 + $0x50] sm:$0x1] %v3545_v62  ;;  %v3562_v37 = vsel %vm6369_vm11, %v3332_v1, %v3561_v23  ;;  %v3021_v6 = vmul.f32 %v6700_v43, %v6700_v43  ;;  %v2874_v57 = vadd.f32 %v6356_v39, %v6591_v49  ;;  %v7089_v39 = vld [vmem:[#allocation18_spill] sm:$0xff] }
 0x21f   : > { %3682 = vst [vmem:[%s6351_s27 + $0x5c] sm:$0x1] %v3681_v4  ;;  %3563 = vst [vmem:[%s6351_s27 + $0x6c] sm:$0xf] %v3562_v37  ;;  %v3555_v36 = vsel %vm6369_vm11, %v3315_v55, %v3554_v19  ;;  %v2895_v15 = vadd.f32 %v6618_v42, %v6614_v56  ;;  %v3316_v13 = vrot.slane %v6703_v60, 4  ;;  %v3335_v48 = vshrl.u32 %v4252_v50, 16  ;;  %v6760_v42 = vpop.f32.mrf.mxu1 }
 0x220   : > { %3556 = vst [vmem:[%s6351_s27 + $0x60] sm:$0xf] %v3555_v36  ;;  %v2887_v3 = vadd.f32 %v6527_v52, %v6646_v27  ;;  %v2898_v44 = vadd.f32 %v6679_v35, %v6652_v63  ;;  %v3338_v21 = vshll.u32 %v4252_v50, 16  ;;  %v2950_v61 = vadd.f32 %v2874_v57, %v7088_v22  ;;  %v3565_v35 = vld [vmem:[%s6351_s27 + $0x74] sm:$0x1]  ;;  %v7091_v38 = vld [vmem:[#allocation19_spill] sm:$0xff] }
 0x221   : > { %v6756_v49 = vadd.f32 %v2895_v15, %v7089_v39  ;;  %v4672_v56 = vadd.f32 %v6638_v10, %v6605_v51  ;;  %v3337_v47 = vrot.slane %v3335_v48, 7  ;;  %v6764_v27 = vadd.f32 %v4674_v8, %v6668_v25  ;;  %v6773_v25 = vpop.f32.mrf.mxu0  ;;  %v4851_v16 = vpop.f32.mrf.mxu1  ;;  %v3558_v57 = vld [vmem:[%s6351_s27 + $0x68] sm:$0x1]  ;;  %v7092_v60 = vld [vmem:[#allocation17_spill] sm:$0xff] }
 0x222   : > { %v2953_v52 = vadd.f32 %v2887_v3, %v7090_v59  ;;  %v2890_v63 = vadd.f32 %v6552_v24, %v2889_v17  ;;  %v2981_v0 = vadd.f32 %v2980_v31, %v2950_v61  ;;  %v3019_v33 = vmul.f32 %v2950_v61, %v2950_v61 }
 0x223   : > { %v4250_v23 = vpack.c.bf16 %v2950_v61, %v2950_v61  ;;  %v6769_v45 = vadd.f32 %v2898_v44, %v7091_v38  ;;  %v3340_v51 = vor.u32 %v3338_v21, %v3337_v47  ;;  %v3342_v10 = vrot.slane %v3337_v47, 4  ;;  %v6798_v44 = vpop.f32.mrf.mxu0 }
 0x224   : > { %v4255_v1 = vpack.c.bf16 %v6756_v49, %v6756_v49  ;;  %v2911_v19 = vadd.f32 %v4850_v12, %v4672_v56  ;;  %v2982_v8 = vadd.f32 %v2981_v0, %v6661_v32  ;;  %v3050_v17 = vadd.f32 %v3049_v41, %v3019_v33  ;;  %v6802_v56 = vpop.f32.mrf.mxu1 }
 0x225   : > { %v3677_v24 = vld [vmem:[%s6351_s27 + $0x50] sm:$0x1]  ;;  %v3318_v31 = vshrl.u32 %v4250_v23, 16  ;;  %v3321_v54 = vshll.u32 %v4250_v23, 16  ;;  %v3341_v55 = vsel %vm6397_vm13, %v3333_v11, %v3340_v51  ;;  %v3566_v12 = vsel %vm6387_vm12, %v3342_v10, %v3565_v35 }
 0x226   : > { %v3678_v29 = vsel %vm6456_vm14, 0, %v3677_v24  ;;  %v3637_v62 = vld [vmem:[%s6351_s27 + $0x6c] sm:$0x1]  ;;  %v3361_v4 = vshrl.u32 %v4255_v1, 16  ;;  %3564 = vst [vmem:[%s6351_s27 + $0x70] sm:$0xf] %v3341_v55  ;;  %v3051_v37 = vadd.f32 %v3050_v17, %v6708_v26  ;;  %v2983_v48 = vadd.f32 %v2982_v8, %v6700_v43 }
 0x227   : > { %3679 = vst [vmem:[%s6351_s27 + $0x50] sm:$0x1] %v3678_v29  ;;  %v3638_v32 = vsel %vm6387_vm12, 0, %v3637_v62  ;;  %v3634_v41 = vld [vmem:[%s6351_s27 + $0x60] sm:$0x1]  ;;  %v3320_v50 = vrot.slane %v3318_v31, 7  ;;  %v4253_v3 = vpack.c.bf16 %v2953_v52, %v2953_v52  ;;  %v3022_v61 = vmul.f32 %v2953_v52, %v2953_v52 }
 0x228   : > { %3567 = vst [vmem:[%s6351_s27 + $0x74] sm:$0x1] %v3566_v12  ;;  %v3364_v36 = vshll.u32 %v4255_v1, 16  ;;  %3639 = vst [vmem:[%s6351_s27 + $0x6c] sm:$0x1] %v3638_v32  ;;  %v3635_v11 = vsel %vm6387_vm12, 0, %v3634_v41  ;;  %v3052_v39 = vadd.f32 %v3051_v37, %v3021_v6  ;;  %v3024_v47 = vmul.f32 %v6756_v49, %v6756_v49  ;;  %v6822_v1 = vpop.f32.mrf.mxu0 }
 0x229   : > { %v6795_v15 = vrot.slane %v3361_v4, 7  ;;  %3636 = vst [vmem:[%s6351_s27 + $0x60] sm:$0x1] %v3635_v11  ;;  %v3323_v21 = vor.u32 %v3321_v54, %v3320_v50  ;;  %v3325_v22 = vrot.slane %v3320_v50, 4  ;;  %v3575_v26 = vld [vmem:[%s6351_s27 + $0x84] sm:$0xf]  ;;  %v2984_v43 = vadd.f32 %v2983_v48, %v2953_v52  ;;  %v6834_v54 = vpop.f32.mrf.mxu1 }
 0x22a   : > { %v3344_v35 = vshrl.u32 %v4253_v3, 16  ;;  %v3053_v6 = vadd.f32 %v3052_v39, %v3022_v61  ;;  %v3347_v23 = vshll.u32 %v4253_v3, 16  ;;  %v4256_v52 = vpack.c.bf16 %v6769_v45, %v6769_v45  ;;  %v3568_v24 = vld [vmem:[%s6351_s27 + $0x78] sm:$0xf]  ;;  %v4683_v50 = vpop.f32.mrf.mxu0 }
 0x22b   : > { %v3366_v59 = vor.u32 %v3364_v36, %v6795_v15  ;;  %v3324_v0 = vsel %vm6397_vm13, %v3316_v13, %v3323_v21  ;;  %v3559_v33 = vsel %vm6387_vm12, %v3325_v22, %v3558_v57  ;;  %v2954_v10 = vadd.f32 %v2890_v63, %v7092_v60  ;;  %v3579_v36 = vld [vmem:[%s6351_s27 + $0x8c] sm:$0x1]  ;;  %v3589_v60 = vld [vmem:[%s6351_s27 + $0x9c] sm:$0xf] }
 0x22c   : > { %3557 = vst [vmem:[%s6351_s27 + $0x64] sm:$0xf] %v3324_v0  ;;  %3560 = vst [vmem:[%s6351_s27 + $0x68] sm:$0x1] %v3559_v33  ;;  %v6817_v51 = vrot.slane %v3344_v35, 7  ;;  %v3367_v13 = vrot.slane %v6795_v15, 4  ;;  %v3025_v8 = vmul.f32 %v6769_v45, %v6769_v45  ;;  %v6830_v17 = vadd.f32 %v2911_v19, %v6329_v18  ;;  %v2918_v15 = vpop.f32.mrf.mxu1 }
 0x22d   : > { %v3576_v38 = vsel %vm6369_vm11, %v3366_v59, %v3575_v26  ;;  %v2903_v31 = vadd.f32 %v6657_v5, %v6760_v42  ;;  %v3369_v55 = vshrl.u32 %v4256_v52, 16  ;;  %v2914_v12 = vadd.f32 %v4851_v16, %v6764_v27  ;;  %v7093_v59 = vld [vmem:[#allocation20_spill] sm:$0xff] }
 0x22e   : > { %3577 = vst [vmem:[%s6351_s27 + $0x84] sm:$0xf] %v3576_v38  ;;  %v3349_v29 = vor.u32 %v3347_v23, %v6817_v51  ;;  %v3350_v62 = vrot.slane %v6817_v51, 4  ;;  %v2985_v18 = vadd.f32 %v2984_v43, %v2954_v10  ;;  %v3023_v19 = vmul.f32 %v2954_v10, %v2954_v10  ;;  %v3572_v23 = vld [vmem:[%s6351_s27 + $0x80] sm:$0x1] }
 0x22f   : > { %v3686_v63 = vld [vmem:[%s6351_s27 + $0x74] sm:$0x1]  ;;  %v4254_v32 = vpack.c.bf16 %v2954_v10, %v2954_v10  ;;  %v3371_v42 = vrot.slane %v3369_v55, 7  ;;  %v3372_v41 = vshll.u32 %v4256_v52, 16  ;;  %v4259_v37 = vpack.c.bf16 %v6830_v17, %v6830_v17 }
 0x230   : > { %v3687_v4 = vsel %vm6456_vm14, 0, %v3686_v63  ;;  %v3569_v5 = vsel %vm6369_vm11, %v3349_v29, %v3568_v24  ;;  %v2986_v27 = vadd.f32 %v2985_v18, %v6756_v49  ;;  %v3054_v16 = vadd.f32 %v3053_v6, %v3023_v19 }
 0x231   : > { %3688 = vst [vmem:[%s6351_s27 + $0x74] sm:$0x1] %v3687_v4  ;;  %3570 = vst [vmem:[%s6351_s27 + $0x78] sm:$0xf] %v3569_v5  ;;  %v3352_v11 = vshrl.u32 %v4254_v32, 16  ;;  %v3355_v57 = vshll.u32 %v4254_v32, 16  ;;  %v3374_v48 = vor.u32 %v3372_v41, %v3371_v42  ;;  %v2957_v43 = vadd.f32 %v2903_v31, %v7093_v59 }
 0x232   : > { %v3376_v3 = vrot.slane %v3371_v42, 4  ;;  %v3395_v21 = vshrl.u32 %v4259_v37, 16  ;;  %v3398_v22 = vshll.u32 %v4259_v37, 16  ;;  %v3055_v61 = vadd.f32 %v3054_v16, %v3024_v47  ;;  %v4685_v47 = vpop.f32.mrf.mxu0  ;;  %v7094_v16 = vld [vmem:[#allocation21_spill] sm:$0xff] }
 0x233   : > { %v3683_v26 = vld [vmem:[%s6351_s27 + $0x68] sm:$0x1]  ;;  %v3354_v39 = vrot.slane %v3352_v11, 7  ;;  %v2987_v49 = vadd.f32 %v2986_v27, %v6769_v45  ;;  %v3375_v33 = vsel %vm6397_vm13, %v3367_v13, %v3374_v48  ;;  %v6869_v13 = vpop.f32.mrf.mxu1  ;;  %v4678_v31 = vadd.f32 %v6752_v2, %v6716_v34 }
 0x234   : > { %v3684_v35 = vsel %vm6456_vm14, 0, %v3683_v26  ;;  %v3580_v6 = vsel %vm6387_vm12, %v3376_v3, %v3579_v36  ;;  %v6861_v38 = vrot.slane %v3395_v21, 7  ;;  %3578 = vst [vmem:[%s6351_s27 + $0x88] sm:$0xf] %v3375_v33  ;;  %v3026_v63 = vmul.f32 %v2957_v43, %v2957_v43 }
 0x235   : > { %v3643_v0 = vld [vmem:[%s6351_s27 + $0x84] sm:$0x1]  ;;  %3685 = vst [vmem:[%s6351_s27 + $0x68] sm:$0x1] %v3684_v35  ;;  %3581 = vst [vmem:[%s6351_s27 + $0x8c] sm:$0x1] %v3580_v6  ;;  %v3357_v45 = vor.u32 %v3355_v57, %v3354_v39  ;;  %v2988_v10 = vadd.f32 %v2987_v49, %v2957_v43  ;;  %v3056_v29 = vadd.f32 %v3055_v61, %v3025_v8  ;;  %v2921_v37 = vpop.f32.mrf.mxu1 }
 0x236   : > { %v3644_v51 = vsel %vm6387_vm12, 0, %v3643_v0  ;;  %v3359_v52 = vrot.slane %v3354_v39, 4  ;;  %v3400_v24 = vor.u32 %v3398_v22, %v6861_v38  ;;  %v4257_v18 = vpack.c.bf16 %v2957_v43, %v2957_v43  ;;  %v3582_v22 = vld [vmem:[%s6351_s27 + $0x90] sm:$0xf]  ;;  %v3593_v6 = vld [vmem:[%s6351_s27 + $0xa4] sm:$0x1] }
 0x237   : > { %3645 = vst [vmem:[%s6351_s27 + $0x84] sm:$0x1] %v3644_v51  ;;  %v3358_v55 = vsel %vm6397_vm13, %v3350_v62, %v3357_v45  ;;  %v2960_v19 = vadd.f32 %v2914_v12, %v6335_v30  ;;  %v3028_v5 = vmul.f32 %v6830_v17, %v6830_v17  ;;  %v3057_v2 = vadd.f32 %v3056_v29, %v3026_v63  ;;  %v4686_v62 = vpop.f32.mrf.mxu0  ;;  %v3586_v29 = vld [vmem:[%s6351_s27 + $0x98] sm:$0x1] }
 0x238   : > { %v3573_v4 = vsel %vm6387_vm12, %v3359_v52, %v3572_v23  ;;  %v3640_v32 = vld [vmem:[%s6351_s27 + $0x78] sm:$0x1]  ;;  %3571 = vst [vmem:[%s6351_s27 + $0x7c] sm:$0xf] %v3358_v55  ;;  %v3590_v34 = vsel %vm6369_vm11, %v3400_v24, %v3589_v60  ;;  %v2906_v8 = vadd.f32 %v6714_v53, %v6802_v56  ;;  %v3401_v30 = vrot.slane %v6861_v38, 4 }
 0x239   : > { %3574 = vst [vmem:[%s6351_s27 + $0x80] sm:$0x1] %v3573_v4  ;;  %v3641_v42 = vsel %vm6387_vm12, 0, %v3640_v32  ;;  %3591 = vst [vmem:[%s6351_s27 + $0x9c] sm:$0xf] %v3590_v34  ;;  %v3378_v12 = vshrl.u32 %v4257_v18, 16  ;;  %v4681_v41 = vadd.f32 %v6798_v44, %v6773_v25  ;;  %v4260_v27 = vpack.c.bf16 %v2960_v19, %v2960_v19 }
 0x23a   : > { %3642 = vst [vmem:[%s6351_s27 + $0x78] sm:$0x1] %v3641_v42  ;;  %v3381_v36 = vshll.u32 %v4257_v18, 16  ;;  %v2958_v11 = vadd.f32 %v2906_v8, %v7094_v16  ;;  %v4684_v53 = vadd.f32 %v4683_v50, %v6822_v1  ;;  %v3029_v57 = vmul.f32 %v2960_v19, %v2960_v19 }
 0x23b   : > { %v3380_v56 = vrot.slane %v3378_v12, 7  ;;  %v2919_v48 = vadd.f32 %v4678_v31, %v2918_v15  ;;  %v4687_v3 = vadd.f32 %v4686_v62, %v4685_v47  ;;  %v3403_v26 = vshrl.u32 %v4260_v27, 16 }
 0x23c   : > { %v3692_v21 = vld [vmem:[%s6351_s27 + $0x8c] sm:$0x1]  ;;  %v2989_v61 = vadd.f32 %v2988_v10, %v2958_v11  ;;  %v3027_v25 = vmul.f32 %v2958_v11, %v2958_v11  ;;  %v2922_v44 = vadd.f32 %v4681_v41, %v2921_v37  ;;  %v3406_v43 = vshll.u32 %v4260_v27, 16 }
 0x23d   : > { %v3693_v39 = vsel %vm6456_vm14, 0, %v3692_v21  ;;  %v3383_v59 = vor.u32 %v3381_v36, %v3380_v56  ;;  %v4258_v1 = vpack.c.bf16 %v2958_v11, %v2958_v11  ;;  %v3405_v50 = vrot.slane %v3403_v26, 7  ;;  %v3603_v11 = vld [vmem:[%s6351_s27 + $0xb4] sm:$0xf] }
 0x23e   : > { %3694 = vst [vmem:[%s6351_s27 + $0x8c] sm:$0x1] %v3693_v39  ;;  %v2990_v15 = vadd.f32 %v2989_v61, %v6830_v17  ;;  %v3058_v49 = vadd.f32 %v3057_v2, %v3027_v25  ;;  %v2927_v35 = vadd.f32 %v6834_v54, %v4684_v53  ;;  %v2961_v47 = vadd.f32 %v2919_v48, %v6277_v58 }
 0x23f   : > { %v3583_v33 = vsel %vm6369_vm11, %v3383_v59, %v3582_v22  ;;  %v3386_v23 = vshrl.u32 %v4258_v1, 16  ;;  %v3389_v38 = vshll.u32 %v4258_v1, 16  ;;  %v3408_v17 = vor.u32 %v3406_v43, %v3405_v50 }
 0x240   : > { %v3689_v0 = vld [vmem:[%s6351_s27 + $0x80] sm:$0x1]  ;;  %v3649_v45 = vld [vmem:[%s6351_s27 + $0x9c] sm:$0x1]  ;;  %3584 = vst [vmem:[%s6351_s27 + $0x90] sm:$0xf] %v3583_v33  ;;  %v3059_v52 = vadd.f32 %v3058_v49, %v3028_v5  ;;  %v2963_v24 = vadd.f32 %v2927_v35, %v6338_v46  ;;  %v2991_v31 = vadd.f32 %v2990_v15, %v2960_v19  ;;  %v3030_v55 = vmul.f32 %v2961_v47, %v2961_v47 }
 0x241   : > { %v3690_v51 = vsel %vm6456_vm14, 0, %v3689_v0  ;;  %v3410_v54 = vrot.slane %v3405_v50, 4  ;;  %v3650_v60 = vsel %vm6387_vm12, 0, %v3649_v45  ;;  %v3388_v10 = vrot.slane %v3386_v23, 7  ;;  %v3607_v33 = vld [vmem:[%s6351_s27 + $0xbc] sm:$0x1] }
 0x242   : > { %3691 = vst [vmem:[%s6351_s27 + $0x80] sm:$0x1] %v3690_v51  ;;  %3651 = vst [vmem:[%s6351_s27 + $0x9c] sm:$0x1] %v3650_v60  ;;  %v3409_v58 = vsel %vm6397_vm13, %v3401_v30, %v3408_v17  ;;  %v3060_v4 = vadd.f32 %v3059_v52, %v3029_v57  ;;  %v3384_v18 = vrot.slane %v3380_v56, 4  ;;  %v4263_v46 = vpack.c.bf16 %v2963_v24, %v2963_v24 }
 0x243   : > { %v3594_v63 = vsel %vm6387_vm12, %v3410_v54, %v3593_v6  ;;  %3592 = vst [vmem:[%s6351_s27 + $0xa0] sm:$0xf] %v3409_v58  ;;  %v3391_v32 = vor.u32 %v3389_v38, %v3388_v10  ;;  %v3393_v5 = vrot.slane %v3388_v10, 4  ;;  %v2992_v19 = vadd.f32 %v2991_v31, %v2961_v47  ;;  %v3600_v58 = vld [vmem:[%s6351_s27 + $0xb0] sm:$0x1] }
 0x244   : > { %3595 = vst [vmem:[%s6351_s27 + $0xa4] sm:$0x1] %v3594_v63  ;;  %v3061_v34 = vadd.f32 %v3060_v4, %v3030_v55  ;;  %v4261_v2 = vpack.c.bf16 %v2961_v47, %v2961_v47  ;;  %v2930_v8 = vadd.f32 %v6869_v13, %v4687_v3  ;;  %v3429_v30 = vshrl.u32 %v4263_v46, 16  ;;  %v3596_v3 = vld [vmem:[%s6351_s27 + $0xa8] sm:$0xf] }
 0x245   : > { %v3392_v62 = vsel %vm6397_vm13, %v3384_v18, %v3391_v32  ;;  %v3587_v42 = vsel %vm6387_vm12, %v3393_v5, %v3586_v29  ;;  %v2962_v37 = vadd.f32 %v2922_v44, %v6281_v28  ;;  %v3432_v13 = vshll.u32 %v4263_v46, 16 }
 0x246   : > { %3585 = vst [vmem:[%s6351_s27 + $0x94] sm:$0xf] %v3392_v62  ;;  %3588 = vst [vmem:[%s6351_s27 + $0x98] sm:$0x1] %v3587_v42  ;;  %v3412_v12 = vshrl.u32 %v4261_v2, 16  ;;  %v2964_v41 = vadd.f32 %v2930_v8, %v6354_v7  ;;  %v3431_v27 = vrot.slane %v3429_v30, 7  ;;  %v3032_v28 = vmul.f32 %v2963_v24, %v2963_v24 }
 0x247   : > { %v3646_v36 = vld [vmem:[%s6351_s27 + $0x90] sm:$0x1]  ;;  %v3415_v56 = vshll.u32 %v4261_v2, 16  ;;  %v2993_v21 = vadd.f32 %v2992_v19, %v2962_v37  ;;  %v3031_v7 = vmul.f32 %v2962_v37, %v2962_v37  ;;  %v4262_v15 = vpack.c.bf16 %v2962_v37, %v2962_v37 }
 0x248   : > { %v3647_v16 = vsel %vm6387_vm12, 0, %v3646_v36  ;;  %v3414_v53 = vrot.slane %v3412_v12, 7  ;;  %v4264_v57 = vpack.c.bf16 %v2964_v41, %v2964_v41  ;;  %v3434_v48 = vor.u32 %v3432_v13, %v3431_v27 }
 0x249   : > { %3648 = vst [vmem:[%s6351_s27 + $0x90] sm:$0x1] %v3647_v16  ;;  %v2994_v39 = vadd.f32 %v2993_v21, %v2963_v24  ;;  %v3062_v59 = vadd.f32 %v3061_v34, %v3031_v7  ;;  %v3435_v35 = vrot.slane %v3431_v27, 4  ;;  %v3033_v0 = vmul.f32 %v2964_v41, %v2964_v41 }
 0x24a   : > { %v3417_v26 = vor.u32 %v3415_v56, %v3414_v53  ;;  %v3437_v61 = vshrl.u32 %v4264_v57, 16  ;;  %v3604_v44 = vsel %vm6369_vm11, %v3434_v48, %v3603_v11  ;;  %v3440_v50 = vshll.u32 %v4264_v57, 16 }
 0x24b   : > { %v3698_v22 = vld [vmem:[%s6351_s27 + $0xa4] sm:$0x1]  ;;  %3605 = vst [vmem:[%s6351_s27 + $0xb4] sm:$0xf] %v3604_v44  ;;  %v2995_v6 = vadd.f32 %v2994_v39, %v2964_v41  ;;  %v3063_v23 = vadd.f32 %v3062_v59, %v3032_v28  ;;  %v3420_v51 = vshrl.u32 %v4262_v15, 16  ;;  %v3423_v10 = vshll.u32 %v4262_v15, 16 }
 0x24c   : > { %v3699_v25 = vsel %vm6456_vm14, 0, %v3698_v22  ;;  %v3597_v43 = vsel %vm6369_vm11, %v3417_v26, %v3596_v3  ;;  %v3439_v1 = vrot.slane %v3437_v61, 7  ;;  %v3418_v63 = vrot.slane %v3414_v53, 4 }
 0x24d   : > { %3700 = vst [vmem:[%s6351_s27 + $0xa4] sm:$0x1] %v3699_v25  ;;  %v3695_v49 = vld [vmem:[%s6351_s27 + $0x98] sm:$0x1]  ;;  %3598 = vst [vmem:[%s6351_s27 + $0xa8] sm:$0xf] %v3597_v43  ;;  %v3064_v17 = vadd.f32 %v3063_v23, %v3033_v0 }
 0x24e   : > { %v3696_v38 = vsel %vm6456_vm14, 0, %v3695_v49  ;;  %v3442_v47 = vor.u32 %v3440_v50, %v3439_v1  ;;  %v3444_v40 = vrot.slane %v3439_v1, 4  ;;  %v2996_v45 = vrot.slane %v2995_v6, 4 }
 0x24f   : > { %3697 = vst [vmem:[%s6351_s27 + $0x98] sm:$0x1] %v3696_v38  ;;  %v3422_v60 = vrot.slane %v3420_v51, 7  ;;  %v3065_v31 = vrot.slane %v3064_v17, 4 }
 0x250   : > { %v3443_v54 = vsel %vm6397_vm13, %v3435_v35, %v3442_v47  ;;  %v3608_v52 = vsel %vm6387_vm12, %v3444_v40, %v3607_v33  ;;  %v2997_v24 = vadd.f32 %v2996_v45, %v2995_v6 }
 0x251   : > { %3606 = vst [vmem:[%s6351_s27 + $0xb8] sm:$0xf] %v3443_v54  ;;  %3609 = vst [vmem:[%s6351_s27 + $0xbc] sm:$0x1] %v3608_v52  ;;  %v3425_v29 = vor.u32 %v3423_v10, %v3422_v60  ;;  %v3427_v55 = vrot.slane %v3422_v60, 4  ;;  %v3066_v32 = vadd.f32 %v3065_v31, %v3064_v17 }
 0x252   : > { %v3655_v4 = vld [vmem:[%s6351_s27 + $0xb4] sm:$0x1]  ;;  %v2998_v18 = vrot.slane %v2997_v24, 2 }
 0x253   : > { %v3656_v5 = vsel %vm6387_vm12, 0, %v3655_v4  ;;  %v3426_v19 = vsel %vm6397_vm13, %v3418_v63, %v3425_v29  ;;  %v3601_v34 = vsel %vm6387_vm12, %v3427_v55, %v3600_v58  ;;  %v3067_v62 = vrot.slane %v3066_v32, 2 }
 0x254   : > { %v3652_v46 = vld [vmem:[%s6351_s27 + $0xa8] sm:$0x1]  ;;  %3657 = vst [vmem:[%s6351_s27 + $0xb4] sm:$0x1] %v3656_v5  ;;  %v2999_v8 = vadd.f32 %v2998_v18, %v2997_v24  ;;  %3599 = vst [vmem:[%s6351_s27 + $0xac] sm:$0xf] %v3426_v19 }
 0x255   : > { %v3653_v2 = vsel %vm6387_vm12, 0, %v3652_v46  ;;  %3602 = vst [vmem:[%s6351_s27 + $0xb0] sm:$0x1] %v3601_v34  ;;  %v3068_v30 = vadd.f32 %v3067_v62, %v3066_v32 }
 0x256   : > { %3654 = vst [vmem:[%s6351_s27 + $0xa8] sm:$0x1] %v3653_v2  ;;  %v3000_v42 = vrot.slane %v2999_v8, 1 }
 0x257   : > { %v3069_v41 = vrot.slane %v3068_v30, 1 }
 0x258   : > { %v3704_v12 = vld [vmem:[%s6351_s27 + $0xbc] sm:$0x1]  ;;  %v3001_v9 = vadd.f32 %v3000_v42, %v2999_v8 }
 0x259   : > { %v3705_v20 = vsel %vm6456_vm14, 0, %v3704_v12  ;;  %v3070_v37 = vadd.f32 %v3069_v41, %v3068_v30 }
 0x25a   : > { %3706 = vst [vmem:[%s6351_s27 + $0xbc] sm:$0x1] %v3705_v20 }
 0x25b   : > { %v3072_v27 = vsel %vm3071_vm8, %v3001_v9, %v3070_v37 }
 0x25c   : > { %v3701_v36 = vld [vmem:[%s6351_s27 + $0xb0] sm:$0x1]  ;;  %3073 = vst [vmem:[%s461_s30] sm:$0x3] %v3072_v27 }
 0x25d   : > { %v3702_v13 = vsel %vm6456_vm14, 0, %v3701_v36 }
 0x25e   : > { %3703 = vst [vmem:[%s6351_s27 + $0xb0] sm:$0x1] %v3702_v13 }
 0x25f PF: > { %s18_s2 = sadd.s32 1, %s4996_s2   ;;  %s7095_s23 = smov %s4992_s24 }
 0x260   : > { %p15_p5 = scmp.ge.s32.totalorder %s18_s2, 4   ;;  %s7096_s24 = smov %s7098_s25 }
 0x262   :  { %17 = sbr.rel (!%p15_p5) target bundleno = 2 (0x2), region = 94 }

</bundles_post_ra>
